<compile_context>
chip_gen: v6e
topology: v6e:2x2x1
jax: 0.10.0
libtpu: 0.0.40
codegen_flags: <defaults>
</compile_context>

<pallas_src>
import jax
import jax.numpy as jnp
from jax import lax
from jax.experimental import pallas as pl
from jax.experimental.pallas import tpu as pltpu


# ----------------------------------------------------------------------------
# Fused kernel: conv1+ReLU+pool -> conv2+ReLU+pool -> fc1+ReLU -> fc2
# (one image per grid step; all weight refs are VMEM-resident constants)
# ----------------------------------------------------------------------------
def _net_kernel(x_ref, c1w_ref, c1b_ref, sh1_ref, sw1_ref,
                c2w_ref, c2b_ref, sh2_ref, sw2_ref,
                fc1w_ref, fc1b_ref, fc2w_ref, fc2b_ref, out_ref):
    f32 = jnp.float32
    bf16 = jnp.bfloat16
    x = x_ref[0]                                            # (28, 28) f32

    # conv1 (1->20, 5x5, valid) + bias + ReLU  -> (24, 24*20), cols = w*20 + c
    a1 = jnp.zeros((24, 24 * 20), f32)
    for i in range(5):
        a1 = a1 + jnp.dot(x[i:i + 24, :].astype(bf16), c1w_ref[i],
                          preferred_element_type=f32)
    a1 = jnp.maximum(a1 + c1b_ref[...], 0.0)

    # maxpool 2x2 stride 2 -> (12, 12*20)
    ph = jnp.maximum(jnp.dot(sh1_ref[0], a1, preferred_element_type=f32),
                     jnp.dot(sh1_ref[1], a1, preferred_element_type=f32))
    p1 = jnp.maximum(jnp.dot(ph, sw1_ref[0], preferred_element_type=f32),
                     jnp.dot(ph, sw1_ref[1], preferred_element_type=f32))

    # conv2 (20->50, 5x5, valid) + bias + ReLU -> (8, 8*50), cols = w*50 + c
    a2 = jnp.zeros((8, 8 * 50), f32)
    for i in range(5):
        a2 = a2 + jnp.dot(p1[i:i + 8, :].astype(bf16), c2w_ref[i],
                          preferred_element_type=f32)
    a2 = jnp.maximum(a2 + c2b_ref[...], 0.0)

    # maxpool 2x2 stride 2 -> (4, 4*50)
    ph2 = jnp.maximum(jnp.dot(sh2_ref[0], a2, preferred_element_type=f32),
                      jnp.dot(sh2_ref[1], a2, preferred_element_type=f32))
    p2 = jnp.maximum(jnp.dot(ph2, sw2_ref[0], preferred_element_type=f32),
                     jnp.dot(ph2, sw2_ref[1], preferred_element_type=f32))

    # fc1 + ReLU  (PyTorch NCHW flatten folded into the weight)  -> (1, 500)
    h1 = jnp.zeros((1, 500), f32)
    for r in range(4):
        h1 = h1 + jnp.dot(p2[r:r + 1, :].astype(bf16), fc1w_ref[r],
                          preferred_element_type=f32)
    h1 = jnp.maximum(h1 + fc1b_ref[...], 0.0)

    # fc2 -> (1, 10)
    logits = jnp.dot(h1.astype(bf16), fc2w_ref[...],
                     preferred_element_type=f32) + fc2b_ref[...]
    out_ref[...] = logits.reshape(1, 1, 10)


# ----------------------------------------------------------------------------
# One-time weight preparation (plain JAX, zero runtime cost per forward call)
# ----------------------------------------------------------------------------
def prepare_params(params):
    f32, bf16 = jnp.float32, jnp.bfloat16
    w1 = params["conv1_w"].astype(f32)[:, 0]        # (20, 5, 5)  [c, i, j]
    w2 = params["conv2_w"].astype(f32)              # (50, 20, 5, 5)
    fw1 = params["fc1_w"].astype(f32)               # (500, 800)
    fw2 = params["fc2_w"].astype(f32)               # (10, 500)

    # conv1 banded weights: c1w[i, v, w*20+c] = w1[c, i, v-w]  for 0 <= v-w < 5
    v = jnp.arange(28)[:, None, None]
    w = jnp.arange(24)[None, :, None]
    c = jnp.arange(20)[None, None, :]
    j = v - w
    valid = (j >= 0) & (j < 5)
    jc = jnp.clip(j, 0, 4)
    c1w = jnp.stack(
        [jnp.where(valid, w1[:, i, :][c, jc], 0.0) for i in range(5)], 0)
    c1w = c1w.reshape(5, 28, 24 * 20).astype(bf16)
    c1b = jnp.tile(params["conv1_b"].astype(f32), 24).reshape(1, 24 * 20)

    # conv2 banded weights: c2w[i, v*20+ci, w*50+co] = w2[co, ci, i, v-w]
    v = jnp.arange(12)[:, None, None, None]
    ci = jnp.arange(20)[None, :, None, None]
    w = jnp.arange(8)[None, None, :, None]
    co = jnp.arange(50)[None, None, None, :]
    j = v - w
    valid = (j >= 0) & (j < 5)
    jc = jnp.clip(j, 0, 4)
    c2w = jnp.stack(
        [jnp.where(valid, w2[:, :, i, :][co, ci, jc], 0.0) for i in range(5)], 0)
    c2w = c2w.reshape(5, 12 * 20, 8 * 50).astype(bf16)
    c2b = jnp.tile(params["conv2_b"].astype(f32), 8).reshape(1, 8 * 50)

    # max-pool selection matrices (exact 0/1, kept f32)
    def sel_rows(n_out, n_in):
        k = jnp.arange(n_out)[:, None]
        r = jnp.arange(n_in)[None, :]
        return jnp.stack([(r == 2 * k).astype(f32),
                          (r == 2 * k + 1).astype(f32)])

    def sel_cols(w_in, w_out, C):
        a = jnp.arange(w_in * C)
        b = jnp.arange(w_out * C)
        wi, cin = a // C, a % C
        wo, cout = b // C, b % C

        def mk(p):
            return ((wi[:, None] == 2 * wo[None, :] + p)
                    & (cin[:, None] == cout[None, :])).astype(f32)

        return jnp.stack([mk(0), mk(1)])

    sh1 = sel_rows(12, 24)            # (2, 12, 24)
    sw1 = sel_cols(24, 12, 20)        # (2, 480, 240)
    sh2 = sel_rows(4, 8)              # (2, 4, 8)
    sw2 = sel_cols(8, 4, 50)          # (2, 400, 200)

    # fc1: fold PyTorch flatten (idx = c*16 + h*4 + w) into the weight so the
    # kernel consumes the (h, w*50+c)-packed pooled activation directly.
    h = jnp.arange(4)[:, None, None]
    w = jnp.arange(4)[None, :, None]
    c = jnp.arange(50)[None, None, :]
    src = c * 16 + h * 4 + w                          # (4, 4, 50)
    fc1w = fw1.T[src].reshape(4, 200, 500).astype(bf16)
    fc1b = params["fc1_b"].astype(f32).reshape(1, 500)
    fc2w = fw2.T.astype(bf16)                         # (500, 10)
    fc2b = params["fc2_b"].astype(f32).reshape(1, 10)

    return dict(c1w=c1w, c1b=c1b, sh1=sh1, sw1=sw1,
                c2w=c2w, c2b=c2b, sh2=sh2, sw2=sw2,
                fc1w=fc1w, fc1b=fc1b, fc2w=fc2w, fc2b=fc2b)


_PREP_KEYS = ("c1w", "c1b", "sh1", "sw1", "c2w", "c2b", "sh2", "sw2",
              "fc1w", "fc1b", "fc2w", "fc2b")


# ----------------------------------------------------------------------------
# Forward pass (matches PyTorch Net.forward)
# ----------------------------------------------------------------------------
@jax.jit
def net_forward(x_nchw, prep):
    N = x_nchw.shape[0]
    x = x_nchw.astype(jnp.float32).reshape(N, 28, 28)     # Cin == 1

    def const_spec(a):
        return pl.BlockSpec(a.shape, lambda *_: (0,) * a.ndim)

    in_specs = [pl.BlockSpec((1, 28, 28), lambda i: (i, 0, 0))]
    in_specs += [const_spec(prep[k]) for k in _PREP_KEYS]

    out = pl.pallas_call(
        _net_kernel,
        out_shape=jax.ShapeDtypeStruct((N, 1, 10), jnp.float32),
        grid=(N,),
        in_specs=in_specs,
        out_specs=pl.BlockSpec((1, 1, 10), lambda i: (i, 0, 0)),
        compiler_params=pltpu.CompilerParams(
            dimension_semantics=("parallel",)),
    )(x, *[prep[k] for k in _PREP_KEYS])
    return out.reshape(N, 10)


# ----------------------------------------------------------------------------
# Pure-JAX reference (for correctness check of the Pallas path)
# ----------------------------------------------------------------------------
def net_forward_ref(x_nchw, params):
    def conv(x, w, b):
        y = lax.conv_general_dilated(
            x, w, window_strides=(1, 1), padding="VALID",
            dimension_numbers=("NCHW", "OIHW", "NCHW"),
            precision=lax.Precision.HIGHEST)
        return y + b[None, :, None, None]

    def pool(x):
        return lax.reduce_window(x, -jnp.inf, lax.max,
                                 (1, 1, 2, 2), (1, 1, 2, 2), "VALID")

    x = x_nchw.astype(jnp.float32)
    x = pool(jax.nn.relu(conv(x, params["conv1_w"], params["conv1_b"])))
    x = pool(jax.nn.relu(conv(x, params["conv2_w"], params["conv2_b"])))
    x = x.reshape(x.shape[0], -1)
    x = jax.nn.relu(x @ params["fc1_w"].T + params["fc1_b"])
    return x @ params["fc2_w"].T + params["fc2_b"]


def init_params(key):
    ks = jax.random.split(key, 8)
    s = 0.05
    return {
        "conv1_w": s * jax.random.normal(ks[0], (20, 1, 5, 5), jnp.float32),
        "conv1_b": s * jax.random.normal(ks[1], (20,), jnp.float32),
        "conv2_w": s * jax.random.normal(ks[2], (50, 20, 5, 5), jnp.float32),
        "conv2_b": s * jax.random.normal(ks[3], (50,), jnp.float32),
        "fc1_w": s * jax.random.normal(ks[4], (500, 800), jnp.float32),
        "fc1_b": s * jax.random.normal(ks[5], (500,), jnp.float32),
        "fc2_w": s * jax.random.normal(ks[6], (10, 500), jnp.float32),
        "fc2_b": s * jax.random.normal(ks[7], (10,), jnp.float32),
    }


if __name__ == "__main__":
    key = jax.random.PRNGKey(0)
    pkey, xkey = jax.random.split(key)
    params = init_params(pkey)
    prep = prepare_params(params)          # one-time weight preparation

    # Input: batch=2, 1 channel, 28x28 (required by the 4*4*50 flatten).
    x = jax.random.normal(xkey, (2, 1, 28, 28), jnp.float32)

    out = jax.block_until_ready(net_forward(x, prep))
    ref = jax.block_until_ready(net_forward_ref(x, params))

    assert out.shape == (2, 10), out.shape
    assert jnp.allclose(out, ref, rtol=1e-2, atol=1e-2), (out, ref)
    print("KERNEL_OK")
</pallas_src>

<mosaic_0001>
module attributes {stable_mosaic.version = 11 : i64} {
  func.func @_net_kernel(%arg0: i32, %arg1: memref<1x28x28xf32, #tpu.memory_space<vmem>>, %arg2: memref<5x28x480xbf16, #tpu.memory_space<vmem>>, %arg3: memref<1x480xf32, #tpu.memory_space<vmem>>, %arg4: memref<2x12x24xf32, #tpu.memory_space<vmem>>, %arg5: memref<2x480x240xf32, #tpu.memory_space<vmem>>, %arg6: memref<5x240x400xbf16, #tpu.memory_space<vmem>>, %arg7: memref<1x400xf32, #tpu.memory_space<vmem>>, %arg8: memref<2x4x8xf32, #tpu.memory_space<vmem>>, %arg9: memref<2x400x200xf32, #tpu.memory_space<vmem>>, %arg10: memref<4x200x500xbf16, #tpu.memory_space<vmem>>, %arg11: memref<1x500xf32, #tpu.memory_space<vmem>>, %arg12: memref<500x10xbf16, #tpu.memory_space<vmem>>, %arg13: memref<1x10xf32, #tpu.memory_space<vmem>>, %arg14: memref<1x1x10xf32, #tpu.memory_space<vmem>>) attributes {dimension_semantics = [#tpu.dimension_semantics<parallel>], iteration_bounds = array<i64: 2>, scalar_prefetch = 0 : i64, scratch_operands = 0 : i64, tpu.core_type = #tpu.core_type<tc>, window_params = [{transform_indices = @transform_0, window_bounds = array<i64: 1, 28, 28>}, {pipeline_mode = #tpu.pipeline_mode<synchronous>, transform_indices = @transform_1, window_bounds = array<i64: 5, 28, 480>}, {pipeline_mode = #tpu.pipeline_mode<synchronous>, transform_indices = @transform_2, window_bounds = array<i64: 1, 480>}, {pipeline_mode = #tpu.pipeline_mode<synchronous>, transform_indices = @transform_3, window_bounds = array<i64: 2, 12, 24>}, {pipeline_mode = #tpu.pipeline_mode<synchronous>, transform_indices = @transform_4, window_bounds = array<i64: 2, 480, 240>}, {pipeline_mode = #tpu.pipeline_mode<synchronous>, transform_indices = @transform_5, window_bounds = array<i64: 5, 240, 400>}, {pipeline_mode = #tpu.pipeline_mode<synchronous>, transform_indices = @transform_6, window_bounds = array<i64: 1, 400>}, {pipeline_mode = #tpu.pipeline_mode<synchronous>, transform_indices = @transform_7, window_bounds = array<i64: 2, 4, 8>}, {pipeline_mode = #tpu.pipeline_mode<synchronous>, transform_indices = @transform_8, window_bounds = array<i64: 2, 400, 200>}, {pipeline_mode = #tpu.pipeline_mode<synchronous>, transform_indices = @transform_9, window_bounds = array<i64: 4, 200, 500>}, {pipeline_mode = #tpu.pipeline_mode<synchronous>, transform_indices = @transform_10, window_bounds = array<i64: 1, 500>}, {pipeline_mode = #tpu.pipeline_mode<synchronous>, transform_indices = @transform_11, window_bounds = array<i64: 500, 10>}, {pipeline_mode = #tpu.pipeline_mode<synchronous>, transform_indices = @transform_12, window_bounds = array<i64: 1, 10>}, {transform_indices = @transform_13, window_bounds = array<i64: 1, 1, 10>}]} {
    %c0 = arith.constant 0 : index
    %c0_0 = arith.constant 0 : index
    %c0_1 = arith.constant 0 : index
    %0 = vector.load %arg1[%c0, %c0_0, %c0_1] : memref<1x28x28xf32, #tpu.memory_space<vmem>>, vector<1x28x28xf32>
    %1 = vector.shape_cast %0 : vector<1x28x28xf32> to vector<28x28xf32>
    %cst = arith.constant 0.000000e+00 : f32
    %2 = vector.broadcast %cst : f32 to vector<24x480xf32>
    %3 = vector.extract_strided_slice %1 {offsets = [0, 0], sizes = [24, 28], strides = [1, 1]} : vector<28x28xf32> to vector<24x28xf32>
    %4 = arith.truncf %3 : vector<24x28xf32> to vector<24x28xbf16>
    %c0_2 = arith.constant 0 : index
    %c0_3 = arith.constant 0 : index
    %c0_4 = arith.constant 0 : index
    %5 = vector.load %arg2[%c0_2, %c0_3, %c0_4] : memref<5x28x480xbf16, #tpu.memory_space<vmem>>, vector<1x28x480xbf16>
    %6 = vector.shape_cast %5 : vector<1x28x480xbf16> to vector<28x480xbf16>
    %cst_5 = arith.constant dense<0.000000e+00> : vector<24x480xf32>
    %7 = tpu.matmul %4, %6, %cst_5 {dimension_numbers = #tpu.dot_dimension_numbers<[1], [0], [0], [1], [0, 0, 1, 1], [], []>} : vector<24x28xbf16>, vector<28x480xbf16>, vector<24x480xf32> -> vector<24x480xf32>
    %8 = arith.addf %2, %7 : vector<24x480xf32>
    %9 = vector.extract_strided_slice %1 {offsets = [1, 0], sizes = [24, 28], strides = [1, 1]} : vector<28x28xf32> to vector<24x28xf32>
    %10 = arith.truncf %9 : vector<24x28xf32> to vector<24x28xbf16>
    %c1 = arith.constant 1 : index
    %c0_6 = arith.constant 0 : index
    %c0_7 = arith.constant 0 : index
    %11 = vector.load %arg2[%c1, %c0_6, %c0_7] : memref<5x28x480xbf16, #tpu.memory_space<vmem>>, vector<1x28x480xbf16>
    %12 = vector.shape_cast %11 : vector<1x28x480xbf16> to vector<28x480xbf16>
    %cst_8 = arith.constant dense<0.000000e+00> : vector<24x480xf32>
    %13 = tpu.matmul %10, %12, %cst_8 {dimension_numbers = #tpu.dot_dimension_numbers<[1], [0], [0], [1], [0, 0, 1, 1], [], []>} : vector<24x28xbf16>, vector<28x480xbf16>, vector<24x480xf32> -> vector<24x480xf32>
    %14 = arith.addf %8, %13 : vector<24x480xf32>
    %15 = vector.extract_strided_slice %1 {offsets = [2, 0], sizes = [24, 28], strides = [1, 1]} : vector<28x28xf32> to vector<24x28xf32>
    %16 = arith.truncf %15 : vector<24x28xf32> to vector<24x28xbf16>
    %c2 = arith.constant 2 : index
    %c0_9 = arith.constant 0 : index
    %c0_10 = arith.constant 0 : index
    %17 = vector.load %arg2[%c2, %c0_9, %c0_10] : memref<5x28x480xbf16, #tpu.memory_space<vmem>>, vector<1x28x480xbf16>
    %18 = vector.shape_cast %17 : vector<1x28x480xbf16> to vector<28x480xbf16>
    %cst_11 = arith.constant dense<0.000000e+00> : vector<24x480xf32>
    %19 = tpu.matmul %16, %18, %cst_11 {dimension_numbers = #tpu.dot_dimension_numbers<[1], [0], [0], [1], [0, 0, 1, 1], [], []>} : vector<24x28xbf16>, vector<28x480xbf16>, vector<24x480xf32> -> vector<24x480xf32>
    %20 = arith.addf %14, %19 : vector<24x480xf32>
    %21 = vector.extract_strided_slice %1 {offsets = [3, 0], sizes = [24, 28], strides = [1, 1]} : vector<28x28xf32> to vector<24x28xf32>
    %22 = arith.truncf %21 : vector<24x28xf32> to vector<24x28xbf16>
    %c3 = arith.constant 3 : index
    %c0_12 = arith.constant 0 : index
    %c0_13 = arith.constant 0 : index
    %23 = vector.load %arg2[%c3, %c0_12, %c0_13] : memref<5x28x480xbf16, #tpu.memory_space<vmem>>, vector<1x28x480xbf16>
    %24 = vector.shape_cast %23 : vector<1x28x480xbf16> to vector<28x480xbf16>
    %cst_14 = arith.constant dense<0.000000e+00> : vector<24x480xf32>
    %25 = tpu.matmul %22, %24, %cst_14 {dimension_numbers = #tpu.dot_dimension_numbers<[1], [0], [0], [1], [0, 0, 1, 1], [], []>} : vector<24x28xbf16>, vector<28x480xbf16>, vector<24x480xf32> -> vector<24x480xf32>
    %26 = arith.addf %20, %25 : vector<24x480xf32>
    %27 = vector.extract_strided_slice %1 {offsets = [4, 0], sizes = [24, 28], strides = [1, 1]} : vector<28x28xf32> to vector<24x28xf32>
    %28 = arith.truncf %27 : vector<24x28xf32> to vector<24x28xbf16>
    %c4 = arith.constant 4 : index
    %c0_15 = arith.constant 0 : index
    %c0_16 = arith.constant 0 : index
    %29 = vector.load %arg2[%c4, %c0_15, %c0_16] : memref<5x28x480xbf16, #tpu.memory_space<vmem>>, vector<1x28x480xbf16>
    %30 = vector.shape_cast %29 : vector<1x28x480xbf16> to vector<28x480xbf16>
    %cst_17 = arith.constant dense<0.000000e+00> : vector<24x480xf32>
    %31 = tpu.matmul %28, %30, %cst_17 {dimension_numbers = #tpu.dot_dimension_numbers<[1], [0], [0], [1], [0, 0, 1, 1], [], []>} : vector<24x28xbf16>, vector<28x480xbf16>, vector<24x480xf32> -> vector<24x480xf32>
    %32 = arith.addf %26, %31 : vector<24x480xf32>
    %c0_18 = arith.constant 0 : index
    %c0_19 = arith.constant 0 : index
    %33 = vector.load %arg3[%c0_18, %c0_19] : memref<1x480xf32, #tpu.memory_space<vmem>>, vector<1x480xf32>
    %34 = vector.broadcast %33 : vector<1x480xf32> to vector<24x480xf32>
    %35 = arith.addf %32, %34 : vector<24x480xf32>
    %cst_20 = arith.constant 0.000000e+00 : f32
    %36 = vector.broadcast %cst_20 : f32 to vector<24x480xf32>
    %37 = arith.maximumf %35, %36 : vector<24x480xf32>
    %c0_21 = arith.constant 0 : index
    %c0_22 = arith.constant 0 : index
    %c0_23 = arith.constant 0 : index
    %38 = vector.load %arg4[%c0_21, %c0_22, %c0_23] : memref<2x12x24xf32, #tpu.memory_space<vmem>>, vector<1x12x24xf32>
    %39 = vector.shape_cast %38 : vector<1x12x24xf32> to vector<12x24xf32>
    %cst_24 = arith.constant dense<0.000000e+00> : vector<12x480xf32>
    %40 = tpu.matmul %39, %37, %cst_24 {dimension_numbers = #tpu.dot_dimension_numbers<[1], [0], [0], [1], [0, 0, 1, 1], [], []>} : vector<12x24xf32>, vector<24x480xf32>, vector<12x480xf32> -> vector<12x480xf32>
    %c1_25 = arith.constant 1 : index
    %c0_26 = arith.constant 0 : index
    %c0_27 = arith.constant 0 : index
    %41 = vector.load %arg4[%c1_25, %c0_26, %c0_27] : memref<2x12x24xf32, #tpu.memory_space<vmem>>, vector<1x12x24xf32>
    %42 = vector.shape_cast %41 : vector<1x12x24xf32> to vector<12x24xf32>
    %cst_28 = arith.constant dense<0.000000e+00> : vector<12x480xf32>
    %43 = tpu.matmul %42, %37, %cst_28 {dimension_numbers = #tpu.dot_dimension_numbers<[1], [0], [0], [1], [0, 0, 1, 1], [], []>} : vector<12x24xf32>, vector<24x480xf32>, vector<12x480xf32> -> vector<12x480xf32>
    %44 = arith.maximumf %40, %43 : vector<12x480xf32>
    %c0_29 = arith.constant 0 : index
    %c0_30 = arith.constant 0 : index
    %c0_31 = arith.constant 0 : index
    %45 = vector.load %arg5[%c0_29, %c0_30, %c0_31] : memref<2x480x240xf32, #tpu.memory_space<vmem>>, vector<1x480x240xf32>
    %46 = vector.shape_cast %45 : vector<1x480x240xf32> to vector<480x240xf32>
    %cst_32 = arith.constant dense<0.000000e+00> : vector<12x240xf32>
    %47 = tpu.matmul %44, %46, %cst_32 {dimension_numbers = #tpu.dot_dimension_numbers<[1], [0], [0], [1], [0, 0, 1, 1], [], []>} : vector<12x480xf32>, vector<480x240xf32>, vector<12x240xf32> -> vector<12x240xf32>
    %c1_33 = arith.constant 1 : index
    %c0_34 = arith.constant 0 : index
    %c0_35 = arith.constant 0 : index
    %48 = vector.load %arg5[%c1_33, %c0_34, %c0_35] : memref<2x480x240xf32, #tpu.memory_space<vmem>>, vector<1x480x240xf32>
    %49 = vector.shape_cast %48 : vector<1x480x240xf32> to vector<480x240xf32>
    %cst_36 = arith.constant dense<0.000000e+00> : vector<12x240xf32>
    %50 = tpu.matmul %44, %49, %cst_36 {dimension_numbers = #tpu.dot_dimension_numbers<[1], [0], [0], [1], [0, 0, 1, 1], [], []>} : vector<12x480xf32>, vector<480x240xf32>, vector<12x240xf32> -> vector<12x240xf32>
    %51 = arith.maximumf %47, %50 : vector<12x240xf32>
    %cst_37 = arith.constant 0.000000e+00 : f32
    %52 = vector.broadcast %cst_37 : f32 to vector<8x400xf32>
    %53 = vector.extract_strided_slice %51 {offsets = [0, 0], sizes = [8, 240], strides = [1, 1]} : vector<12x240xf32> to vector<8x240xf32>
    %54 = arith.truncf %53 : vector<8x240xf32> to vector<8x240xbf16>
    %c0_38 = arith.constant 0 : index
    %c0_39 = arith.constant 0 : index
    %c0_40 = arith.constant 0 : index
    %55 = vector.load %arg6[%c0_38, %c0_39, %c0_40] : memref<5x240x400xbf16, #tpu.memory_space<vmem>>, vector<1x240x400xbf16>
    %56 = vector.shape_cast %55 : vector<1x240x400xbf16> to vector<240x400xbf16>
    %cst_41 = arith.constant dense<0.000000e+00> : vector<8x400xf32>
    %57 = tpu.matmul %54, %56, %cst_41 {dimension_numbers = #tpu.dot_dimension_numbers<[1], [0], [0], [1], [0, 0, 1, 1], [], []>} : vector<8x240xbf16>, vector<240x400xbf16>, vector<8x400xf32> -> vector<8x400xf32>
    %58 = arith.addf %52, %57 : vector<8x400xf32>
    %59 = vector.extract_strided_slice %51 {offsets = [1, 0], sizes = [8, 240], strides = [1, 1]} : vector<12x240xf32> to vector<8x240xf32>
    %60 = arith.truncf %59 : vector<8x240xf32> to vector<8x240xbf16>
    %c1_42 = arith.constant 1 : index
    %c0_43 = arith.constant 0 : index
    %c0_44 = arith.constant 0 : index
    %61 = vector.load %arg6[%c1_42, %c0_43, %c0_44] : memref<5x240x400xbf16, #tpu.memory_space<vmem>>, vector<1x240x400xbf16>
    %62 = vector.shape_cast %61 : vector<1x240x400xbf16> to vector<240x400xbf16>
    %cst_45 = arith.constant dense<0.000000e+00> : vector<8x400xf32>
    %63 = tpu.matmul %60, %62, %cst_45 {dimension_numbers = #tpu.dot_dimension_numbers<[1], [0], [0], [1], [0, 0, 1, 1], [], []>} : vector<8x240xbf16>, vector<240x400xbf16>, vector<8x400xf32> -> vector<8x400xf32>
    %64 = arith.addf %58, %63 : vector<8x400xf32>
    %65 = vector.extract_strided_slice %51 {offsets = [2, 0], sizes = [8, 240], strides = [1, 1]} : vector<12x240xf32> to vector<8x240xf32>
    %66 = arith.truncf %65 : vector<8x240xf32> to vector<8x240xbf16>
    %c2_46 = arith.constant 2 : index
    %c0_47 = arith.constant 0 : index
    %c0_48 = arith.constant 0 : index
    %67 = vector.load %arg6[%c2_46, %c0_47, %c0_48] : memref<5x240x400xbf16, #tpu.memory_space<vmem>>, vector<1x240x400xbf16>
    %68 = vector.shape_cast %67 : vector<1x240x400xbf16> to vector<240x400xbf16>
    %cst_49 = arith.constant dense<0.000000e+00> : vector<8x400xf32>
    %69 = tpu.matmul %66, %68, %cst_49 {dimension_numbers = #tpu.dot_dimension_numbers<[1], [0], [0], [1], [0, 0, 1, 1], [], []>} : vector<8x240xbf16>, vector<240x400xbf16>, vector<8x400xf32> -> vector<8x400xf32>
    %70 = arith.addf %64, %69 : vector<8x400xf32>
    %71 = vector.extract_strided_slice %51 {offsets = [3, 0], sizes = [8, 240], strides = [1, 1]} : vector<12x240xf32> to vector<8x240xf32>
    %72 = arith.truncf %71 : vector<8x240xf32> to vector<8x240xbf16>
    %c3_50 = arith.constant 3 : index
    %c0_51 = arith.constant 0 : index
    %c0_52 = arith.constant 0 : index
    %73 = vector.load %arg6[%c3_50, %c0_51, %c0_52] : memref<5x240x400xbf16, #tpu.memory_space<vmem>>, vector<1x240x400xbf16>
    %74 = vector.shape_cast %73 : vector<1x240x400xbf16> to vector<240x400xbf16>
    %cst_53 = arith.constant dense<0.000000e+00> : vector<8x400xf32>
    %75 = tpu.matmul %72, %74, %cst_53 {dimension_numbers = #tpu.dot_dimension_numbers<[1], [0], [0], [1], [0, 0, 1, 1], [], []>} : vector<8x240xbf16>, vector<240x400xbf16>, vector<8x400xf32> -> vector<8x400xf32>
    %76 = arith.addf %70, %75 : vector<8x400xf32>
    %77 = vector.extract_strided_slice %51 {offsets = [4, 0], sizes = [8, 240], strides = [1, 1]} : vector<12x240xf32> to vector<8x240xf32>
    %78 = arith.truncf %77 : vector<8x240xf32> to vector<8x240xbf16>
    %c4_54 = arith.constant 4 : index
    %c0_55 = arith.constant 0 : index
    %c0_56 = arith.constant 0 : index
    %79 = vector.load %arg6[%c4_54, %c0_55, %c0_56] : memref<5x240x400xbf16, #tpu.memory_space<vmem>>, vector<1x240x400xbf16>
    %80 = vector.shape_cast %79 : vector<1x240x400xbf16> to vector<240x400xbf16>
    %cst_57 = arith.constant dense<0.000000e+00> : vector<8x400xf32>
    %81 = tpu.matmul %78, %80, %cst_57 {dimension_numbers = #tpu.dot_dimension_numbers<[1], [0], [0], [1], [0, 0, 1, 1], [], []>} : vector<8x240xbf16>, vector<240x400xbf16>, vector<8x400xf32> -> vector<8x400xf32>
    %82 = arith.addf %76, %81 : vector<8x400xf32>
    %c0_58 = arith.constant 0 : index
    %c0_59 = arith.constant 0 : index
    %83 = vector.load %arg7[%c0_58, %c0_59] : memref<1x400xf32, #tpu.memory_space<vmem>>, vector<1x400xf32>
    %84 = vector.broadcast %83 : vector<1x400xf32> to vector<8x400xf32>
    %85 = arith.addf %82, %84 : vector<8x400xf32>
    %cst_60 = arith.constant 0.000000e+00 : f32
    %86 = vector.broadcast %cst_60 : f32 to vector<8x400xf32>
    %87 = arith.maximumf %85, %86 : vector<8x400xf32>
    %c0_61 = arith.constant 0 : index
    %c0_62 = arith.constant 0 : index
    %c0_63 = arith.constant 0 : index
    %88 = vector.load %arg8[%c0_61, %c0_62, %c0_63] : memref<2x4x8xf32, #tpu.memory_space<vmem>>, vector<1x4x8xf32>
    %89 = vector.shape_cast %88 : vector<1x4x8xf32> to vector<4x8xf32>
    %cst_64 = arith.constant dense<0.000000e+00> : vector<4x400xf32>
    %90 = tpu.matmul %89, %87, %cst_64 {dimension_numbers = #tpu.dot_dimension_numbers<[1], [0], [0], [1], [0, 0, 1, 1], [], []>} : vector<4x8xf32>, vector<8x400xf32>, vector<4x400xf32> -> vector<4x400xf32>
    %c1_65 = arith.constant 1 : index
    %c0_66 = arith.constant 0 : index
    %c0_67 = arith.constant 0 : index
    %91 = vector.load %arg8[%c1_65, %c0_66, %c0_67] : memref<2x4x8xf32, #tpu.memory_space<vmem>>, vector<1x4x8xf32>
    %92 = vector.shape_cast %91 : vector<1x4x8xf32> to vector<4x8xf32>
    %cst_68 = arith.constant dense<0.000000e+00> : vector<4x400xf32>
    %93 = tpu.matmul %92, %87, %cst_68 {dimension_numbers = #tpu.dot_dimension_numbers<[1], [0], [0], [1], [0, 0, 1, 1], [], []>} : vector<4x8xf32>, vector<8x400xf32>, vector<4x400xf32> -> vector<4x400xf32>
    %94 = arith.maximumf %90, %93 : vector<4x400xf32>
    %c0_69 = arith.constant 0 : index
    %c0_70 = arith.constant 0 : index
    %c0_71 = arith.constant 0 : index
    %95 = vector.load %arg9[%c0_69, %c0_70, %c0_71] : memref<2x400x200xf32, #tpu.memory_space<vmem>>, vector<1x400x200xf32>
    %96 = vector.shape_cast %95 : vector<1x400x200xf32> to vector<400x200xf32>
    %cst_72 = arith.constant dense<0.000000e+00> : vector<4x200xf32>
    %97 = tpu.matmul %94, %96, %cst_72 {dimension_numbers = #tpu.dot_dimension_numbers<[1], [0], [0], [1], [0, 0, 1, 1], [], []>} : vector<4x400xf32>, vector<400x200xf32>, vector<4x200xf32> -> vector<4x200xf32>
    %c1_73 = arith.constant 1 : index
    %c0_74 = arith.constant 0 : index
    %c0_75 = arith.constant 0 : index
    %98 = vector.load %arg9[%c1_73, %c0_74, %c0_75] : memref<2x400x200xf32, #tpu.memory_space<vmem>>, vector<1x400x200xf32>
    %99 = vector.shape_cast %98 : vector<1x400x200xf32> to vector<400x200xf32>
    %cst_76 = arith.constant dense<0.000000e+00> : vector<4x200xf32>
    %100 = tpu.matmul %94, %99, %cst_76 {dimension_numbers = #tpu.dot_dimension_numbers<[1], [0], [0], [1], [0, 0, 1, 1], [], []>} : vector<4x400xf32>, vector<400x200xf32>, vector<4x200xf32> -> vector<4x200xf32>
    %101 = arith.maximumf %97, %100 : vector<4x200xf32>
    %cst_77 = arith.constant 0.000000e+00 : f32
    %102 = vector.broadcast %cst_77 : f32 to vector<1x500xf32>
    %103 = vector.extract_strided_slice %101 {offsets = [0, 0], sizes = [1, 200], strides = [1, 1]} : vector<4x200xf32> to vector<1x200xf32>
    %104 = arith.truncf %103 : vector<1x200xf32> to vector<1x200xbf16>
    %c0_78 = arith.constant 0 : index
    %c0_79 = arith.constant 0 : index
    %c0_80 = arith.constant 0 : index
    %105 = vector.load %arg10[%c0_78, %c0_79, %c0_80] : memref<4x200x500xbf16, #tpu.memory_space<vmem>>, vector<1x200x500xbf16>
    %106 = vector.shape_cast %105 : vector<1x200x500xbf16> to vector<200x500xbf16>
    %cst_81 = arith.constant dense<0.000000e+00> : vector<1x500xf32>
    %107 = tpu.matmul %104, %106, %cst_81 {dimension_numbers = #tpu.dot_dimension_numbers<[1], [0], [0], [1], [0, 0, 1, 1], [], []>} : vector<1x200xbf16>, vector<200x500xbf16>, vector<1x500xf32> -> vector<1x500xf32>
    %108 = arith.addf %102, %107 : vector<1x500xf32>
    %109 = vector.extract_strided_slice %101 {offsets = [1, 0], sizes = [1, 200], strides = [1, 1]} : vector<4x200xf32> to vector<1x200xf32>
    %110 = arith.truncf %109 : vector<1x200xf32> to vector<1x200xbf16>
    %c1_82 = arith.constant 1 : index
    %c0_83 = arith.constant 0 : index
    %c0_84 = arith.constant 0 : index
    %111 = vector.load %arg10[%c1_82, %c0_83, %c0_84] : memref<4x200x500xbf16, #tpu.memory_space<vmem>>, vector<1x200x500xbf16>
    %112 = vector.shape_cast %111 : vector<1x200x500xbf16> to vector<200x500xbf16>
    %cst_85 = arith.constant dense<0.000000e+00> : vector<1x500xf32>
    %113 = tpu.matmul %110, %112, %cst_85 {dimension_numbers = #tpu.dot_dimension_numbers<[1], [0], [0], [1], [0, 0, 1, 1], [], []>} : vector<1x200xbf16>, vector<200x500xbf16>, vector<1x500xf32> -> vector<1x500xf32>
    %114 = arith.addf %108, %113 : vector<1x500xf32>
    %115 = vector.extract_strided_slice %101 {offsets = [2, 0], sizes = [1, 200], strides = [1, 1]} : vector<4x200xf32> to vector<1x200xf32>
    %116 = arith.truncf %115 : vector<1x200xf32> to vector<1x200xbf16>
    %c2_86 = arith.constant 2 : index
    %c0_87 = arith.constant 0 : index
    %c0_88 = arith.constant 0 : index
    %117 = vector.load %arg10[%c2_86, %c0_87, %c0_88] : memref<4x200x500xbf16, #tpu.memory_space<vmem>>, vector<1x200x500xbf16>
    %118 = vector.shape_cast %117 : vector<1x200x500xbf16> to vector<200x500xbf16>
    %cst_89 = arith.constant dense<0.000000e+00> : vector<1x500xf32>
    %119 = tpu.matmul %116, %118, %cst_89 {dimension_numbers = #tpu.dot_dimension_numbers<[1], [0], [0], [1], [0, 0, 1, 1], [], []>} : vector<1x200xbf16>, vector<200x500xbf16>, vector<1x500xf32> -> vector<1x500xf32>
    %120 = arith.addf %114, %119 : vector<1x500xf32>
    %121 = vector.extract_strided_slice %101 {offsets = [3, 0], sizes = [1, 200], strides = [1, 1]} : vector<4x200xf32> to vector<1x200xf32>
    %122 = arith.truncf %121 : vector<1x200xf32> to vector<1x200xbf16>
    %c3_90 = arith.constant 3 : index
    %c0_91 = arith.constant 0 : index
    %c0_92 = arith.constant 0 : index
    %123 = vector.load %arg10[%c3_90, %c0_91, %c0_92] : memref<4x200x500xbf16, #tpu.memory_space<vmem>>, vector<1x200x500xbf16>
    %124 = vector.shape_cast %123 : vector<1x200x500xbf16> to vector<200x500xbf16>
    %cst_93 = arith.constant dense<0.000000e+00> : vector<1x500xf32>
    %125 = tpu.matmul %122, %124, %cst_93 {dimension_numbers = #tpu.dot_dimension_numbers<[1], [0], [0], [1], [0, 0, 1, 1], [], []>} : vector<1x200xbf16>, vector<200x500xbf16>, vector<1x500xf32> -> vector<1x500xf32>
    %126 = arith.addf %120, %125 : vector<1x500xf32>
    %c0_94 = arith.constant 0 : index
    %c0_95 = arith.constant 0 : index
    %127 = vector.load %arg11[%c0_94, %c0_95] : memref<1x500xf32, #tpu.memory_space<vmem>>, vector<1x500xf32>
    %128 = arith.addf %126, %127 : vector<1x500xf32>
    %cst_96 = arith.constant 0.000000e+00 : f32
    %129 = vector.broadcast %cst_96 : f32 to vector<1x500xf32>
    %130 = arith.maximumf %128, %129 : vector<1x500xf32>
    %131 = arith.truncf %130 : vector<1x500xf32> to vector<1x500xbf16>
    %c0_97 = arith.constant 0 : index
    %c0_98 = arith.constant 0 : index
    %132 = vector.load %arg12[%c0_97, %c0_98] : memref<500x10xbf16, #tpu.memory_space<vmem>>, vector<500x10xbf16>
    %cst_99 = arith.constant dense<0.000000e+00> : vector<1x10xf32>
    %133 = tpu.matmul %131, %132, %cst_99 {dimension_numbers = #tpu.dot_dimension_numbers<[1], [0], [0], [1], [0, 0, 1, 1], [], []>} : vector<1x500xbf16>, vector<500x10xbf16>, vector<1x10xf32> -> vector<1x10xf32>
    %c0_100 = arith.constant 0 : index
    %c0_101 = arith.constant 0 : index
    %134 = vector.load %arg13[%c0_100, %c0_101] : memref<1x10xf32, #tpu.memory_space<vmem>>, vector<1x10xf32>
    %135 = arith.addf %133, %134 : vector<1x10xf32>
    %136 = vector.shape_cast %135 : vector<1x10xf32> to vector<1x1x10xf32>
    %c0_102 = arith.constant 0 : index
    %c0_103 = arith.constant 0 : index
    %c0_104 = arith.constant 0 : index
    %137 = vector.load %arg14[%c0_102, %c0_103, %c0_104] : memref<1x1x10xf32, #tpu.memory_space<vmem>>, vector<1x1x10xf32>
    tpu.vector_store %arg14[%c0_102, %c0_103, %c0_104], %136 {strides = array<i32>} : memref<1x1x10xf32, #tpu.memory_space<vmem>>, vector<1x1x10xf32>,
    return
  }
  func.func @transform_0(%arg0: i32) -> (i32, i32, i32) {
    %c0_i32 = arith.constant 0 : i32
    %c0_i32_0 = arith.constant 0 : i32
    %c0_i32_1 = arith.constant 0 : i32
    return %arg0, %c0_i32, %c0_i32_0 : i32, i32, i32
  }
  func.func @transform_1(%arg0: i32) -> (i32, i32, i32) {
    %c0_i32 = arith.constant 0 : i32
    %c0_i32_0 = arith.constant 0 : i32
    %c0_i32_1 = arith.constant 0 : i32
    %c0_i32_2 = arith.constant 0 : i32
    return %c0_i32, %c0_i32_0, %c0_i32_1 : i32, i32, i32
  }
  func.func @transform_2(%arg0: i32) -> (i32, i32) {
    %c0_i32 = arith.constant 0 : i32
    %c0_i32_0 = arith.constant 0 : i32
    %c0_i32_1 = arith.constant 0 : i32
    return %c0_i32, %c0_i32_0 : i32, i32
  }
  func.func @transform_3(%arg0: i32) -> (i32, i32, i32) {
    %c0_i32 = arith.constant 0 : i32
    %c0_i32_0 = arith.constant 0 : i32
    %c0_i32_1 = arith.constant 0 : i32
    %c0_i32_2 = arith.constant 0 : i32
    return %c0_i32, %c0_i32_0, %c0_i32_1 : i32, i32, i32
  }
  func.func @transform_4(%arg0: i32) -> (i32, i32, i32) {
    %c0_i32 = arith.constant 0 : i32
    %c0_i32_0 = arith.constant 0 : i32
    %c0_i32_1 = arith.constant 0 : i32
    %c0_i32_2 = arith.constant 0 : i32
    return %c0_i32, %c0_i32_0, %c0_i32_1 : i32, i32, i32
  }
  func.func @transform_5(%arg0: i32) -> (i32, i32, i32) {
    %c0_i32 = arith.constant 0 : i32
    %c0_i32_0 = arith.constant 0 : i32
    %c0_i32_1 = arith.constant 0 : i32
    %c0_i32_2 = arith.constant 0 : i32
    return %c0_i32, %c0_i32_0, %c0_i32_1 : i32, i32, i32
  }
  func.func @transform_6(%arg0: i32) -> (i32, i32) {
    %c0_i32 = arith.constant 0 : i32
    %c0_i32_0 = arith.constant 0 : i32
    %c0_i32_1 = arith.constant 0 : i32
    return %c0_i32, %c0_i32_0 : i32, i32
  }
  func.func @transform_7(%arg0: i32) -> (i32, i32, i32) {
    %c0_i32 = arith.constant 0 : i32
    %c0_i32_0 = arith.constant 0 : i32
    %c0_i32_1 = arith.constant 0 : i32
    %c0_i32_2 = arith.constant 0 : i32
    return %c0_i32, %c0_i32_0, %c0_i32_1 : i32, i32, i32
  }
  func.func @transform_8(%arg0: i32) -> (i32, i32, i32) {
    %c0_i32 = arith.constant 0 : i32
    %c0_i32_0 = arith.constant 0 : i32
    %c0_i32_1 = arith.constant 0 : i32
    %c0_i32_2 = arith.constant 0 : i32
    return %c0_i32, %c0_i32_0, %c0_i32_1 : i32, i32, i32
  }
  func.func @transform_9(%arg0: i32) -> (i32, i32, i32) {
    %c0_i32 = arith.constant 0 : i32
    %c0_i32_0 = arith.constant 0 : i32
    %c0_i32_1 = arith.constant 0 : i32
    %c0_i32_2 = arith.constant 0 : i32
    return %c0_i32, %c0_i32_0, %c0_i32_1 : i32, i32, i32
  }
  func.func @transform_10(%arg0: i32) -> (i32, i32) {
    %c0_i32 = arith.constant 0 : i32
    %c0_i32_0 = arith.constant 0 : i32
    %c0_i32_1 = arith.constant 0 : i32
    return %c0_i32, %c0_i32_0 : i32, i32
  }
  func.func @transform_11(%arg0: i32) -> (i32, i32) {
    %c0_i32 = arith.constant 0 : i32
    %c0_i32_0 = arith.constant 0 : i32
    %c0_i32_1 = arith.constant 0 : i32
    return %c0_i32, %c0_i32_0 : i32, i32
  }
  func.func @transform_12(%arg0: i32) -> (i32, i32) {
    %c0_i32 = arith.constant 0 : i32
    %c0_i32_0 = arith.constant 0 : i32
    %c0_i32_1 = arith.constant 0 : i32
    return %c0_i32, %c0_i32_0 : i32, i32
  }
  func.func @transform_13(%arg0: i32) -> (i32, i32, i32) {
    %c0_i32 = arith.constant 0 : i32
    %c0_i32_0 = arith.constant 0 : i32
    %c0_i32_1 = arith.constant 0 : i32
    return %arg0, %c0_i32, %c0_i32_0 : i32, i32, i32
  }
}

</mosaic_0001>

<bundles_post_ra>
// kernel: net_forward.1
= control target key start
LH: loop header
LB: loop body
LE: loop exit
PB: predicated region body
PF: predicated region fallthrough
CT: control target
= control target key end

     0   :  { %s12705_s0 = inlined_call_operand.vmem [shape: f32[2,28,28], index: 0, kind: input, shape index: {}]   ;;  %s12706_s1 = inlined_call_operand.vmem [shape: bf16[5,28,480], index: 1, kind: input, shape index: {}]   ;;  %s12707_s2 = inlined_call_operand.vmem [shape: f32[1,480], index: 2, kind: input, shape index: {}]   ;;  %s12708_s3 = inlined_call_operand.vmem [shape: f32[2,12,24], index: 3, kind: input, shape index: {}]   ;;  %s12709_s4 = inlined_call_operand.vmem [shape: f32[2,480,240], index: 4, kind: input, shape index: {}]   ;;  %s12710_s5 = inlined_call_operand.vmem [shape: bf16[5,240,400], index: 5, kind: input, shape index: {}]   ;;  %s12711_s6 = inlined_call_operand.vmem [shape: f32[1,400], index: 6, kind: input, shape index: {}]   ;;  %s12712_s7 = inlined_call_operand.vmem [shape: f32[2,4,8], index: 7, kind: input, shape index: {}]   ;;  %s12713_s8 = inlined_call_operand.vmem [shape: f32[2,400,200], index: 8, kind: input, shape index: {}]   ;;  %s12714_s9 = inlined_call_operand.hbm [shape: bf16[4,200,500], index: 9, kind: input, shape index: {}]   ;;  %s12715_s10 = inlined_call_operand.vmem [shape: f32[1,500], index: 10, kind: input, shape index: {}]   ;;  %s12716_s11 = inlined_call_operand.vmem [shape: bf16[500,10], index: 11, kind: input, shape index: {}]   ;;  %s12717_s12 = inlined_call_operand.vmem [shape: f32[1,10], index: 12, kind: input, shape index: {}]   ;;  %s12718_s13 = inlined_call_operand.hbm [shape: f32[2,1,10], index: 13, kind: output, shape index: {}]  }
   0x1   :  { %12729 = sst [smem:[#allocation14_spill]] %s12714_s9 }
   0x2   :  { %18 = vsyncpa [#allocation3], 0 }
   0x3   :  { %19 = vsyncpa [#allocation4], 0 }
   0x4   :  { %21 = vsyncpa [#allocation4 + $0x1], 0  ;;  %s9740_s25 = smov 0   ;;  %s9742_s26 = smov 0  }
   0x5   :  { %s9744_s27 = smov 0   ;;  %s9746_s28 = smov 0  }
   0x6 LB: > { %12730 = sst [smem:[#allocation8_spill]] %s9658_s27  ;;  %s9761_s29 = sadd.s32 4294967295, %s9662_s28   ;;  %s9662_s28 = sphi %s9746_s28, %s12745_s28   ;;  %s9658_s27 = sphi %s9744_s27, %s12747_s27   ;;  %s9654_s26 = sphi %s9742_s26, %s12749_s26   ;;  %s9650_s25 = sphi %s9740_s25, %s12748_s25  }
   0x7   : > { %s7465_s30 = sadd.s32 4294967294, %s9662_s28   ;;  %s9765_s14 = sadd.s32 1, %s9662_s28  }
   0x8   : > { %12731 = sst [smem:[#allocation9_spill]] %s9765_s14  ;;  %s312_s15 = sadd.s32 1, %s9658_s27 }
   0x9   : > { %s309_s16 = ssub.s32 %s9662_s28, %s9765_s14  ;;  %p322_p0 = scmp.ne.s32.totalorder %s9658_s27, %s9654_s26 }
   0xa   : > { %p310_p1 = scmp.eq.s32.totalorder %s309_s16, 0  ;;  %p323_p2 = scmp.eq.s32.totalorder %s9761_s29, 1 }
   0xb   : > { %p328_p3 = scmp.ne.s32.totalorder %s9654_s26, %s9650_s25  ;;  %p329_p4 = scmp.eq.s32.totalorder %s7465_s30, 1 }
   0xc   : > { %s9776_s17 = scalar_select %p310_p1, %s9658_s27, %s312_s15  }
   0xd   : > { %p9778_p5 = por %p323_p2, %p322_p0  ;;  %p9782_p6 = por %p329_p4, %p328_p3 }
   0xe   : > { %12732 = sst [smem:[#allocation10_spill]] %s9776_s17  ;;  %p7466_p7 = scmp.ge.s32.totalorder %s9662_s28, 1 }
   0xf   : > { %s12734_s19 = scalar_select %p9782_p6, 1, 0 }
  0x10   : > { %p336_p8 = scmp.lt.s32.totalorder %s9662_s28, 3  ;;  %p8686_p9 = scmp.eq.s32.totalorder %s9761_s29, 0 }
  0x11   : > { %s9664_s21 = smov [#allocation2]  }
  0x12   : > { %p9789_p10 = pnand %p7466_p7, %p336_p8  ;;  %s372_s22 = sshll.u32 %s9664_s21, 4  ;;  %s373_s22 = int_to_ptr.vmem [resolvable:$true] %s372_s22 }
  0x13   : > { %s9583_s23 = scalar_lea.vmem %s373_s22, 25600  ;;  %p9591_p3 = scmp.lt.s32.totalorder %s373_s22, %s373_s22 }
  0x14   : > { %p8678_p11 = pneg %p9789_p10  ;;  %p9584_p0 = scmp.ne.s32.totalorder %s373_s22, %s9583_s23 }
  0x15   : > { %p9592_p4 = scmp.lt.s32.totalorder %s9583_s23, %s9583_s23 }
  0x16   : > { %p8679_p12 = pnand %p8686_p9, %p8678_p11 }
  0x17   : > { %p9593_p6 = por %p9592_p4, %p9591_p3 }
  0x18   : > { %p9574_p13 = pneg %p8679_p12 }
  0x1a   : > { %p9586_p1 = pnand %p9584_p0, %p9574_p13 }
  0x1c   : > { %p9587_p2 = pneg %p9586_p1 }
  0x1e   : > { %p9594_p7 = pnand %p9593_p6, %p9587_p2 }
  0x20   : > { %9597 = shalt.err (!%p9594_p7)
}
  0x21   : > { %s9665_s24 = smov 256   ;;  %s9666_s30 = smov 16  }
  0x22   : > { %s12736_s9 = sld [smem:[#allocation14_spill]] }
  0x24   : > { %405 = sbr.rel (%p9789_p10) target bundleno = 2312 (0x908), region = 72 }
  0x28   : > { %8681 = dma.hbm_to_vmem [thread:$0]  (!%p8679_p12), %s12736_s9, 25600, %s373_s22, [#allocation3], %s9665_s24, %s9665_s24, %s9666_s30  }
  0x29   : > { %9641 = dma.done.wait (%p8686_p9), [#allocation3], 25600  }
  0x2a   : > { %9643 = vsyncadd (%p8686_p9), [#allocation3], 4294941696  ;;  %p448_p8 = scmp.lt.s32.totalorder %s9761_s29, 1  ;;  %v9667_v0 = vmov 0   ;;  %vm537_vm0 = vcmask 1045504   ;;  %vm530_vm2 = vcmask 228352  }
  0x2b   : > { %582 = vmatprep.mubr.bf16.mxu0 %v9667_v0  ;;  %633 = vmatprep.mubr.bf16.mxu1 %v9667_v0  ;;  %v8726_v1 = vld [vmem:[%s12706_s1 + $0x64] ss:$16 sps:$4 sm:$0x3f]   ;;  %v8728_v2 = vld [vmem:[%s12706_s1 + $0x6c] ss:$16 sps:$4 sm:$0x3f]  }
  0x2c   : > { %s449_s21 = scalar_select %p448_p8, %s9761_s29, 1  ;;  %7489 = vmatprep.subr.msk.bf16.mxu0 %vm537_vm0, %v8726_v1  ;;  %v8730_v3 = vld [vmem:[%s12706_s1 + $0x60] ss:$16 sps:$4 sm:$0x3f]   ;;  %7492 = vmatprep.subr.msk.bf16.mxu1 %vm537_vm0, %v8728_v2  ;;  %v8732_v5 = vld [vmem:[%s12706_s1 + $0x44] ss:$16 sps:$4 sm:$0xff]  }
  0x2d   : > { %v8731_v4 = vld [vmem:[%s12706_s1 + $0x68] ss:$16 sps:$4 sm:$0x3f]   ;;  %v539_v6 = vsel %vm537_vm0, %v8730_v3, 0  ;;  %v8734_v8 = vld [vmem:[%s12706_s1 + $0x4c] ss:$16 sps:$4 sm:$0xff]  }
  0x2e   : > { %s8626_s22 = sshll.u32 %s449_s21, 5  ;;  %v545_v7 = vsel %vm537_vm0, %v8731_v4, 0  ;;  %563 = vmatpush1.bf16.msra.mxu0 %v539_v6  ;;  %v8736_v9 = vld [vmem:[%s12706_s1 + $0x40] ss:$16 sps:$4 sm:$0xff]   ;;  %v8737_v10 = vld [vmem:[%s12706_s1 + $0x48] ss:$16 sps:$4 sm:$0xff]  }
  0x2f   : > { %s452_s14 = scalar_lea.vmem %s12705_s0, %s8626_s22  ;;  %614 = vmatpush1.bf16.msra.mxu1 %v545_v7  ;;  %564 = vmatprep.subr.bf16.mxu0 %v8732_v5  ;;  %v8738_v17 = vld [vmem:[%s12706_s1 + $0x24] ss:$16 sps:$4 sm:$0x3f]   ;;  %v8740_v18 = vld [vmem:[%s12706_s1 + $0x2c] ss:$16 sps:$4 sm:$0x3f]  }
  0x30   : > { %v454_v11 = vld [vmem:[%s452_s14] sm:$0xff]  ;;  %615 = vmatprep.subr.bf16.mxu1 %v8734_v8  ;;  %v455_v12 = vld [vmem:[%s452_s14 + $0x8] sm:$0xff]  ;;  %v9841_v13 = vld [vmem:[%s452_s14 + $0x10] sm:$0xff]  ;;  %vm478_vm1 = vsmask.f32 7424  ;;  %vm818_vm3 = vcmask 1046528  }
  0x31   : > { %v457_v14 = vld [vmem:[%s452_s14 + $0x18] sm:$0xf]  ;;  %v9843_v15 = vpack.c.bf16 %v455_v12, %v454_v11  ;;  %v8742_v22 = vld [vmem:[%s12706_s1 + $0x20] ss:$16 sps:$4 sm:$0x3f]   ;;  %v459_v51 = vpack.c.bf16 %v9841_v13, %v9841_v13  ;;  %vm1404_vm5 = vcmask 195584  }
  0x32   : > { %v9846_v16 = vpack.c.bf16 %v457_v14, %v9841_v13  ;;  %565 = vmatpush1.bf16.msra.mxu0 %v8736_v9  ;;  %v8743_v23 = vld [vmem:[%s12706_s1 + $0x28] ss:$16 sps:$4 sm:$0x3f]   ;;  %v694_v27 = vsel %vm537_vm0, %v8742_v22, 0  ;;  %v8746_v29 = vld [vmem:[%s12706_s1 + $0x4] ss:$16 sps:$4 sm:$0xff]  }
  0x33   : > { %616 = vmatpush1.bf16.msra.mxu1 %v8737_v10  ;;  %v480_v19 = vshrl.u32 %v9843_v15, 16  ;;  %v482_v20 = vshll.u32 %v9843_v15, 16  ;;  %7503 = vmatprep.subr.msk.bf16.mxu0 %vm537_vm0, %v8738_v17  ;;  %v700_v28 = vsel %vm537_vm0, %v8743_v23, 0  ;;  %v8749_v31 = vld [vmem:[%s12706_s1 + $0xc] ss:$16 sps:$4 sm:$0xff]   ;;  %v1185_v32 = vrot.slane %v9843_v15, 2 }
  0x34   : > { %v487_v21 = vshll.u32 %v9846_v16, 16  ;;  %7506 = vmatprep.subr.msk.bf16.mxu1 %vm537_vm0, %v8740_v18  ;;  %v491_v33 = vshrl.u32 %v9846_v16, 16  ;;  %v8744_v34 = vld [vmem:[%s12706_s1] ss:$16 sps:$4 sm:$0xff]   ;;  %v9889_v35 = vrot.slane %v9846_v16, 2  ;;  %v819_v52 = vrot.slane %v9843_v15, 1 }
  0x35   : > { %v484_v24 = vrot.slane %v482_v20, 1  ;;  %v8747_v36 = vld [vmem:[%s12706_s1 + $0x8] ss:$16 sps:$4 sm:$0xff]   ;;  %v8750_v37 = vld [vmem:[%s12706_s1 + $0xa4] ss:$16 sps:$4 sm:$0x3f]  }
  0x36   : > { %v489_v25 = vrot.slane %v487_v21, 1  ;;  %v8752_v38 = vld [vmem:[%s12706_s1 + $0xac] ss:$16 sps:$4 sm:$0x3f]   ;;  %v9902_v39 = vsel %vm537_vm0, %v1185_v32, %v9889_v35  ;;  %v8758_v43 = vld [vmem:[%s12706_s1 + $0x84] ss:$16 sps:$4 sm:$0xff]  }
  0x37   : > { %v485_v26 = vor.u32 %v484_v24, %v480_v19  ;;  %v8754_v41 = vld [vmem:[%s12706_s1 + $0xa0] ss:$16 sps:$4 sm:$0x3f]   ;;  %v8755_v42 = vld [vmem:[%s12706_s1 + $0xa8] ss:$16 sps:$4 sm:$0x3f]  }
  0x38   : > { %v493_v40 = vor.u32 %v491_v33, %v489_v25  ;;  %v865_v44 = vsel %vm537_vm0, %v8754_v41, 0  ;;  %v871_v45 = vsel %vm537_vm0, %v8755_v42, 0  ;;  %v8761_v46 = vld [vmem:[%s12706_s1 + $0x8c] ss:$16 sps:$4 sm:$0xff]   ;;  %v8756_v47 = vld [vmem:[%s12706_s1 + $0x80] ss:$16 sps:$4 sm:$0xff]  }
  0x39   : > { %v490_v30 = vsel %vm478_vm1, %v485_v26, %v489_v25  ;;  %v8759_v48 = vld [vmem:[%s12706_s1 + $0x88] ss:$16 sps:$4 sm:$0xff]   ;;  %v8762_v49 = vld [vmem:[%s12706_s1 + $0xe4] ss:$16 sps:$4 sm:$0x3f]   ;;  %v820_v53 = vrot.slane %v9846_v16, 1 }
  0x3a   : > { %7490 = vmatmul.mubr.msk.bf16.vlgmr.msra.gmra.mxu0 %vm530_vm2, %v490_v30  ;;  %7493 = vmatmul.mubr.msk.bf16.vlgmr.msra.gmra.mxu1 %vm530_vm2, %v490_v30  ;;  %v8764_v50 = vld [vmem:[%s12706_s1 + $0xec] ss:$16 sps:$4 sm:$0x3f]   ;;  %v8766_v54 = vld [vmem:[%s12706_s1 + $0xe0] ss:$16 sps:$4 sm:$0x3f]  }
  0x3b   : > { %592 = vmatprep.mubr.bf16.mxu0 %v9667_v0  ;;  %643 = vmatprep.mubr.bf16.mxu1 %v9667_v0  ;;  %v8767_v55 = vld [vmem:[%s12706_s1 + $0xe8] ss:$16 sps:$4 sm:$0x3f]   ;;  %v821_v56 = vsel %vm818_vm3, %v819_v52, %v820_v53  ;;  %v8770_v57 = vld [vmem:[%s12706_s1 + $0xc4] ss:$16 sps:$4 sm:$0xff]   ;;  %v1050_v59 = vsel %vm537_vm0, %v8766_v54, 0 }
  0x3c   : > { %718 = vmatpush1.bf16.msra.mxu0 %v694_v27  ;;  %769 = vmatpush1.bf16.msra.mxu1 %v700_v28  ;;  %v8773_v58 = vld [vmem:[%s12706_s1 + $0xcc] ss:$16 sps:$4 sm:$0xff]   ;;  %v1056_v60 = vsel %vm537_vm0, %v8767_v55, 0  ;;  %v8768_v61 = vld [vmem:[%s12706_s1 + $0xc0] ss:$16 sps:$4 sm:$0xff]   ;;  %v1000_v2 = vrot.slane %v480_v19, 1 }
  0x3d   : > { %719 = vmatprep.subr.bf16.mxu0 %v8746_v29  ;;  %770 = vmatprep.subr.bf16.mxu1 %v8749_v31  ;;  %v8771_v62 = vld [vmem:[%s12706_s1 + $0xc8] ss:$16 sps:$4 sm:$0xff]   ;;  %v8774_v63 = vld [vmem:[%s12706_s1 + $0x124] ss:$16 sps:$4 sm:$0x3f]   ;;  %v1001_v3 = vrot.slane %v482_v20, 2 }
  0x3e   : > { %v8776_v1 = vld [vmem:[%s12706_s1 + $0x12c] ss:$16 sps:$4 sm:$0x3f]   ;;  %v1004_v4 = vrot.slane %v487_v21, 2  ;;  %v1003_v5 = vrot.slane %v491_v33, 1  ;;  %v12722_v17 = vmov 0.0  }
  0x3f   : > { %v1002_v6 = vor.u32 %v1001_v3, %v1000_v2  ;;  %v8778_v8 = vld [vmem:[%s12706_s1 + $0x120] ss:$16 sps:$4 sm:$0x3f]   ;;  %v8779_v9 = vld [vmem:[%s12706_s1 + $0x128] ss:$16 sps:$4 sm:$0x3f]  }
  0x40   : > { %720 = vmatpush1.bf16.msra.mxu0 %v8744_v34  ;;  %771 = vmatpush1.bf16.msra.mxu1 %v8747_v36  ;;  %v1005_v7 = vor.u32 %v1004_v4, %v1003_v5  ;;  %vm999_vm4 = vsmask.f32 6400  ;;  %v8782_v11 = vld [vmem:[%s12706_s1 + $0x104] ss:$16 sps:$4 sm:$0xff]   ;;  %v8785_v12 = vld [vmem:[%s12706_s1 + $0x10c] ss:$16 sps:$4 sm:$0xff]  }
  0x41   : > { %7525 = vmatprep.subr.msk.bf16.mxu0 %vm537_vm0, %v8750_v37  ;;  %7528 = vmatprep.subr.msk.bf16.mxu1 %vm537_vm0, %v8752_v38  ;;  %v1231_v13 = vsel %vm537_vm0, %v8778_v8, 0  ;;  %v1237_v14 = vsel %vm537_vm0, %v8779_v9, 0  ;;  %v8783_v16 = vld [vmem:[%s12706_s1 + $0x108] ss:$16 sps:$4 sm:$0xff]   ;;  %v1358_v8 = vlaneseq  ;;  %vm1856_vm6 = vcmask 785408   ;;  %s446_s24 = sand.u32 1, %s9654_s26  }
  0x42   : > { %7491 = vmatmul.mubr.msk.bf16.gmra.mxu0 %vm530_vm2, %v493_v40  ;;  %7494 = vmatmul.mubr.msk.bf16.gmra.mxu1 %vm530_vm2, %v493_v40  ;;  %v1006_v10 = vsel %vm999_vm4, %v1002_v6, %v1005_v7  ;;  %vm2736_vm7 = vcmask 916480   ;;  %vm4603_vm8 = vcmask 64512   ;;  %vm5000_vm9 = vcmask 130048   ;;  %s8623_s17 = sshll.u32 %s9761_s29, 4  ;;  %s447_s27 = scalar_lea.vmem [#allocation5], %s446_s24 }
  0x43   : > { %737 = vmatprep.mubr.bf16.mxu0 %v9667_v0  ;;  %788 = vmatprep.mubr.bf16.mxu1 %v9667_v0  ;;  %vm5755_vm10 = vcmask 1043456   ;;  %vm5751_vm11 = vcmask 588800   ;;  %vm7299_vm12 = vcmask 1041408   ;;  %vm7295_vm13 = vcmask 949248   ;;  %s7398_s22 = sshll.u32 %s447_s27, 4  ;;  %s7396_s21 = scalar_lea.hbm %s12718_s13, %s8623_s17  ;;  %s7399_s22 = int_to_ptr.vmem [resolvable:$true] %s7398_s22 }
  0x44   : > { %vm7383_vm14 = vcmask 73728   ;;  %s7386_s23 = scalar_lea.sflag [#allocation4], %s446_s24  ;;  %s9598_s14 = scalar_lea.vmem %s7399_s22, 16 }
  0x45   : > { %p9599_p6 = scmp.ne.s32.totalorder %s7399_s22, %s9598_s14  ;;  %s9669_s29 = smov [#allocation5]  }
  0x46   : > { %s9602_s20 = sshll.u32 %s9669_s29, 4  ;;  %s9603_s20 = int_to_ptr.vmem [resolvable:$false] %s9602_s20 }
  0x47   : > { %p9600_p9 = pnand %p9599_p6, %p9778_p5  ;;  %s9604_s30 = scalar_lea.vmem %s9603_s20, 32 }
  0x48   : > { %p9605_p11 = scmp.lt.s32.totalorder %s7399_s22, %s9603_s20  ;;  %p9606_p12 = scmp.lt.s32.totalorder %s9604_s30, %s9598_s14 }
  0x49   : > { %p9601_p10 = pneg %p9600_p9 }
  0x4a   : > { %7504 = vmatmul.mubr.msk.bf16.vlgmr.msra.gmra.mxu0 %vm530_vm2, %v9843_v15  ;;  %7507 = vmatmul.mubr.msk.bf16.vlgmr.msra.gmra.mxu1 %vm530_vm2, %v9843_v15  ;;  %v8780_v15 = vld [vmem:[%s12706_s1 + $0x100] ss:$16 sps:$4 sm:$0xff]   ;;  %p9607_p13 = por %p9606_p12, %p9605_p11 }
  0x4b   : > { %747 = vmatprep.mubr.bf16.mxu0 %v9667_v0  ;;  %798 = vmatprep.mubr.bf16.mxu1 %v9667_v0 }
  0x4c   : > { %889 = vmatpush1.bf16.msra.mxu0 %v865_v44  ;;  %940 = vmatpush1.bf16.msra.mxu1 %v871_v45  ;;  %p9608_p0 = pnand %p9607_p13, %p9601_p10 }
  0x4d   : > { %890 = vmatprep.subr.bf16.mxu0 %v8758_v43  ;;  %941 = vmatprep.subr.bf16.mxu1 %v8761_v46 }
  0x50   : > { %891 = vmatpush1.bf16.msra.mxu0 %v8756_v47  ;;  %942 = vmatpush1.bf16.msra.mxu1 %v8759_v48 }
  0x51   : > { %7547 = vmatprep.subr.msk.bf16.mxu0 %vm537_vm0, %v8762_v49  ;;  %7550 = vmatprep.subr.msk.bf16.mxu1 %vm537_vm0, %v8764_v50 }
  0x52   : > { %7505 = vmatmul.mubr.msk.bf16.gmra.mxu0 %vm530_vm2, %v459_v51  ;;  %7508 = vmatmul.mubr.msk.bf16.gmra.mxu1 %vm530_vm2, %v459_v51 }
  0x53   : > { %908 = vmatprep.mubr.bf16.mxu0 %v9667_v0  ;;  %959 = vmatprep.mubr.bf16.mxu1 %v9667_v0 }
  0x5a   : > { %7526 = vmatmul.mubr.msk.bf16.vlgmr.msra.gmra.mxu0 %vm530_vm2, %v821_v56  ;;  %7529 = vmatmul.mubr.msk.bf16.vlgmr.msra.gmra.mxu1 %vm530_vm2, %v821_v56 }
  0x5b   : > { %918 = vmatprep.mubr.bf16.mxu0 %v9667_v0  ;;  %969 = vmatprep.mubr.bf16.mxu1 %v9667_v0 }
  0x5c   : > { %1074 = vmatpush1.bf16.msra.mxu0 %v1050_v59  ;;  %1125 = vmatpush1.bf16.msra.mxu1 %v1056_v60 }
  0x5d   : > { %1075 = vmatprep.subr.bf16.mxu0 %v8770_v57  ;;  %1126 = vmatprep.subr.bf16.mxu1 %v8773_v58 }
  0x60   : > { %1076 = vmatpush1.bf16.msra.mxu0 %v8768_v61  ;;  %1127 = vmatpush1.bf16.msra.mxu1 %v8771_v62 }
  0x61   : > { %7569 = vmatprep.subr.msk.bf16.mxu0 %vm537_vm0, %v8774_v63  ;;  %7572 = vmatprep.subr.msk.bf16.mxu1 %vm537_vm0, %v8776_v1 }
  0x62   : > { %7527 = vmatmul.mubr.msk.bf16.gmra.mxu0 %vm530_vm2, %v820_v53  ;;  %7530 = vmatmul.mubr.msk.bf16.gmra.mxu1 %vm530_vm2, %v820_v53 }
  0x63   : > { %1093 = vmatprep.mubr.bf16.mxu0 %v9667_v0  ;;  %1144 = vmatprep.mubr.bf16.mxu1 %v9667_v0 }
  0x6a   : > { %7548 = vmatmul.mubr.msk.bf16.vlgmr.msra.gmra.mxu0 %vm530_vm2, %v1006_v10  ;;  %7551 = vmatmul.mubr.msk.bf16.vlgmr.msra.gmra.mxu1 %vm530_vm2, %v1006_v10 }
  0x6b   : > { %1103 = vmatprep.mubr.bf16.mxu0 %v9667_v0  ;;  %1154 = vmatprep.mubr.bf16.mxu1 %v9667_v0 }
  0x6c   : > { %1255 = vmatpush1.bf16.msra.mxu0 %v1231_v13  ;;  %1306 = vmatpush1.bf16.msra.mxu1 %v1237_v14  ;;  %v1359_v13 = vshrl.u32 %v1358_v8, 7 }
  0x6d   : > { %1256 = vmatprep.subr.bf16.mxu0 %v8782_v11  ;;  %1307 = vmatprep.subr.bf16.mxu1 %v8785_v12 }
  0x70   : > { %1257 = vmatpush1.bf16.msra.mxu0 %v8780_v15  ;;  %1308 = vmatpush1.bf16.msra.mxu1 %v8783_v16 }
  0x72   : > { %7549 = vmatmul.mubr.msk.bf16.gmra.mxu0 %vm530_vm2, %v1005_v7  ;;  %7552 = vmatmul.mubr.msk.bf16.gmra.mxu1 %vm530_vm2, %v1005_v7 }
  0x73   : > { %1274 = vmatprep.mubr.bf16.mxu0 %v9667_v0  ;;  %1325 = vmatprep.mubr.bf16.mxu1 %v9667_v0 }
  0x7a   : > { %7570 = vmatmul.mubr.msk.bf16.vlgmr.msra.gmra.mxu0 %vm530_vm2, %v9902_v39  ;;  %7573 = vmatmul.mubr.msk.bf16.vlgmr.msra.gmra.mxu1 %vm530_vm2, %v9902_v39 }
  0x7b   : > { %1284 = vmatprep.mubr.bf16.mxu0 %v9667_v0  ;;  %1335 = vmatprep.mubr.bf16.mxu1 %v9667_v0 }
  0x82   : > { %7571 = vmatmul.mubr.msk.bf16.gmra.mxu0 %vm530_vm2, %v9889_v35  ;;  %7574 = vmatmul.mubr.msk.bf16.gmra.mxu1 %vm530_vm2, %v9889_v35 }
  0x83   : > { %1475 = vmatprep.mubr.f32.mxu0 %v12722_v17  ;;  %1552 = vmatprep.mubr.f32.mxu1 %v12722_v17 }
  0xfa   : > { %v10038_v18 = vpop.f32.mrf.mxu0  ;;  %v10040_v19 = vpop.f32.mrf.mxu1 }
  0xfc   : > { %v10042_v20 = vpop.f32.mrf.mxu0  ;;  %v10044_v21 = vpop.f32.mrf.mxu1 }
  0xfe   : > { %v10046_v0 = vpop.f32.mrf.mxu0  ;;  %v10048_v22 = vpop.f32.mrf.mxu1 }
 0x100   : > { %v10050_v23 = vpop.f32.mrf.mxu0  ;;  %v10052_v24 = vpop.f32.mrf.mxu1 }
 0x102   : > { %v10054_v25 = vpop.f32.mrf.mxu0  ;;  %v10056_v26 = vpop.f32.mrf.mxu1 }
 0x104   : > { %v10058_v27 = vpop.f32.mrf.mxu0  ;;  %v10060_v28 = vpop.f32.mrf.mxu1 }
 0x106   : > { %v598_v29 = vpop.f32.mrf.mxu0  ;;  %v649_v30 = vpop.f32.mrf.mxu1 }
 0x107   : > { %v10094_v30 = vsub.s32 0, %v1359_v13 }
 0x108   : > { %v599_v31 = vpop.f32.mrf.mxu0  ;;  %v650_v32 = vpop.f32.mrf.mxu1 }
 0x109   : > { %12737 = vst [vmem:[#allocation11_spill] sm:$0xff] %v10094_v30  ;;  %v10096_v31 = vsub.s32 2, %v1359_v13  ;;  %v1356_v32 = vld [vmem:[%s12707_s2] sm:$0xf] }
 0x10a   : > { %v739_v33 = vpop.f32.mrf.mxu0  ;;  %v790_v34 = vpop.f32.mrf.mxu1 }
 0x10b   : > { %12738 = vst [vmem:[#allocation12_spill] sm:$0xff] %v10096_v31  ;;  %v740_v8 = vadd.f32 %v739_v33, %v10038_v18 }
 0x10c   : > { %v741_v35 = vpop.f32.mrf.mxu0  ;;  %v792_v36 = vpop.f32.mrf.mxu1 }
 0x10e   : > { %v743_v37 = vpop.f32.mrf.mxu0  ;;  %v794_v38 = vpop.f32.mrf.mxu1 }
 0x10f   : > { %v744_v17 = vadd.f32 %v743_v37, %v10046_v0 }
 0x110   : > { %v10062_v39 = vpop.f32.mrf.mxu0  ;;  %v10064_v40 = vpop.f32.mrf.mxu1 }
 0x111   : > { %v746_v18 = vadd.f32 %v10062_v39, %v10050_v23 }
 0x112   : > { %v10066_v41 = vpop.f32.mrf.mxu0  ;;  %v10068_v42 = vpop.f32.mrf.mxu1 }
 0x113   : > { %v750_v33 = vadd.f32 %v10066_v41, %v10054_v25 }
 0x114   : > { %v10070_v43 = vpop.f32.mrf.mxu0  ;;  %v10072_v44 = vpop.f32.mrf.mxu1 }
 0x115   : > { %v803_v0 = vadd.f32 %v10072_v44, %v10060_v28 }
 0x116   : > { %v753_v45 = vpop.f32.mrf.mxu0  ;;  %v804_v46 = vpop.f32.mrf.mxu1 }
 0x117   : > { %v10101_v45 = vsub.s32 1, %v1359_v13  ;;  %v10103_v46 = vsub.s32 3, %v1359_v13 }
 0x118   : > { %v754_v47 = vpop.f32.mrf.mxu0  ;;  %v805_v48 = vpop.f32.mrf.mxu1 }
 0x119   : > { %v10121_v13 = vrot.slane %v1356_v32, %v10103_v46 }
 0x11a   : > { %v910_v49 = vpop.f32.mrf.mxu0  ;;  %v961_v50 = vpop.f32.mrf.mxu1 }
 0x11c   : > { %v912_v51 = vpop.f32.mrf.mxu0  ;;  %v963_v52 = vpop.f32.mrf.mxu1 }
 0x11e   : > { %v10074_v53 = vpop.f32.mrf.mxu0  ;;  %v10076_v54 = vpop.f32.mrf.mxu1 }
 0x11f   : > { %v982_v39 = vadd.f32 %v10074_v53, %v744_v17 }
 0x120   : > { %v10078_v55 = vpop.f32.mrf.mxu0  ;;  %v10080_v56 = vpop.f32.mrf.mxu1 }
 0x122   : > { %v920_v57 = vpop.f32.mrf.mxu0  ;;  %v971_v58 = vpop.f32.mrf.mxu1 }
 0x124   : > { %v10082_v59 = vpop.f32.mrf.mxu0  ;;  %v10084_v60 = vpop.f32.mrf.mxu1 }
 0x126   : > { %v924_v61 = vpop.f32.mrf.mxu0  ;;  %v975_v62 = vpop.f32.mrf.mxu1 }
 0x127   : > { %v10108_v62 = vrot.slane %v1356_v32, %v10094_v30  ;;  %v795_v30 = vadd.f32 %v794_v38, %v10048_v22  ;;  %v978_v22 = vadd.f32 %v910_v49, %v740_v8  ;;  %v986_v38 = vadd.f32 %v920_v57, %v750_v33 }
 0x128   : > { %v925_v63 = vpop.f32.mrf.mxu0  ;;  %v976_v1 = vpop.f32.mrf.mxu1 }
 0x129   : > { %v10113_v1 = vrot.slane %v1356_v32, %v10096_v31  ;;  %v984_v25 = vadd.f32 %v10076_v54, %v795_v30 }
 0x12a   : > { %v10086_v2 = vpop.f32.mrf.mxu0  ;;  %v10088_v3 = vpop.f32.mrf.mxu1 }
 0x12b   : > { %12739 = vst [vmem:[#allocation13_spill] sm:$0xff] %v10113_v1 }
 0x12c   : > { %v1097_v4 = vpop.f32.mrf.mxu0  ;;  %v1148_v5 = vpop.f32.mrf.mxu1 }
 0x12e   : > { %v10090_v6 = vpop.f32.mrf.mxu0  ;;  %v10092_v7 = vpop.f32.mrf.mxu1 }
 0x12f   : > { %v1167_v53 = vadd.f32 %v10090_v6, %v982_v39  ;;  %v1169_v54 = vadd.f32 %v10092_v7, %v984_v25 }
 0x130   : > { %v1101_v9 = vpop.f32.mrf.mxu0  ;;  %v1152_v10 = vpop.f32.mrf.mxu1 }
 0x132   : > { %v1105_v11 = vpop.f32.mrf.mxu0  ;;  %v1156_v12 = vpop.f32.mrf.mxu1 }
 0x134   : > { %v1107_v14 = vpop.f32.mrf.mxu0  ;;  %v1158_v15 = vpop.f32.mrf.mxu1 }
 0x136   : > { %v1109_v16 = vpop.f32.mrf.mxu0  ;;  %v1160_v29 = vpop.f32.mrf.mxu1 }
 0x137   : > { %v791_v16 = vadd.f32 %v790_v34, %v10040_v19  ;;  %v10118_v29 = vrot.slane %v1356_v32, %v10101_v45  ;;  %v797_v19 = vadd.f32 %v10064_v40, %v10052_v24 }
 0x138   : > { %v1110_v47 = vpop.f32.mrf.mxu0  ;;  %v1161_v48 = vpop.f32.mrf.mxu1 }
 0x139   : > { %v742_v47 = vadd.f32 %v741_v35, %v10042_v20  ;;  %v793_v48 = vadd.f32 %v792_v36, %v10044_v21  ;;  %v801_v20 = vadd.f32 %v10068_v42, %v10056_v26  ;;  %v752_v21 = vadd.f32 %v10070_v43, %v10058_v27 }
 0x13a   : > { %v10105_v61 = vpop.f32.mrf.mxu0  ;;  %v10110_v63 = vpop.f32.mrf.mxu1  ;;  %v980_v34 = vadd.f32 %v961_v50, %v791_v16  ;;  %v983_v26 = vadd.f32 %v10078_v55, %v746_v18  ;;  %v985_v40 = vadd.f32 %v10080_v56, %v797_v19  ;;  %v989_v42 = vadd.f32 %v10084_v60, %v803_v0  ;;  %v12740_v18 = vld [vmem:[#allocation13_spill] sm:$0xff] }
 0x13b   : > { %v979_v23 = vadd.f32 %v912_v51, %v742_v47  ;;  %v981_v37 = vadd.f32 %v963_v52, %v793_v48  ;;  %v988_v24 = vadd.f32 %v971_v58, %v801_v20  ;;  %v987_v28 = vadd.f32 %v10082_v59, %v752_v21 }
 0x13c   : > { %v1278_v31 = vpop.f32.mrf.mxu0  ;;  %v1329_v1 = vpop.f32.mrf.mxu1  ;;  %v1171_v43 = vadd.f32 %v1105_v11, %v986_v38  ;;  %v1168_v51 = vadd.f32 %v1101_v9, %v983_v26  ;;  %v1170_v52 = vadd.f32 %v1152_v10, %v985_v40  ;;  %v1174_v30 = vadd.f32 %v1158_v15, %v989_v42  ;;  %v1767_v42 = vld [vmem:[%s12709_s4 + $0xf8] sm:$0xff] }
 0x13d   : > { %v1173_v44 = vadd.f32 %v1156_v12, %v988_v24  ;;  %v1164_v49 = vadd.f32 %v1097_v4, %v979_v23  ;;  %v1166_v50 = vadd.f32 %v1148_v5, %v981_v37  ;;  %v1172_v58 = vadd.f32 %v1107_v14, %v987_v28  ;;  %v7579_v28 = vld [vmem:[%s12708_s3 + $0x10] sm:$0xff] }
 0x13e   : > { %v1280_v35 = vpop.f32.mrf.mxu0  ;;  %v1331_v36 = vpop.f32.mrf.mxu1  ;;  %v1163_v11 = vadd.f32 %v10086_v2, %v978_v22  ;;  %v1165_v4 = vadd.f32 %v10088_v3, %v980_v34 }
 0x13f   : > { %v1348_v5 = vadd.f32 %v1280_v35, %v1167_v53  ;;  %v1350_v9 = vadd.f32 %v1331_v36, %v1169_v54  ;;  %v1345_v10 = vadd.f32 %v1278_v31, %v1164_v49  ;;  %v1347_v12 = vadd.f32 %v1329_v1, %v1166_v50  ;;  %v1830_v49 = vld [vmem:[%s12709_s4 + $0x2f0] sm:$0xff]  ;;  %v7580_v50 = vld [vmem:[%s12708_s3 + $0x18] sm:$0xf] }
 0x140   : > { %v1282_v27 = vpop.f32.mrf.mxu0  ;;  %v1333_v41 = vpop.f32.mrf.mxu1  ;;  %v1344_v48 = vadd.f32 %v10105_v61, %v1163_v11  ;;  %v1346_v14 = vadd.f32 %v10110_v63, %v1165_v4  ;;  %v1763_v53 = vld [vmem:[%s12709_s4 + $0xd8] sm:$0xff]  ;;  %v1758_v11 = vld [vmem:[%s12709_s4 + $0xb0] sm:$0xff] }
 0x141   : > { %v1349_v32 = vadd.f32 %v1282_v27, %v1168_v51  ;;  %v1351_v59 = vadd.f32 %v1333_v41, %v1170_v52  ;;  %v1382_v21 = vadd.f32 %v10108_v62, %v1348_v5  ;;  %v1384_v61 = vadd.f32 %v12740_v18, %v1350_v9  ;;  %v1403_v27 = vld [vmem:[%s12708_s3 + $0x8] sm:$0xf]  ;;  %v1827_v54 = vld [vmem:[%s12709_s4 + $0x2d8] sm:$0xff]  ;;  %v1822_v4 = vld [vmem:[%s12709_s4 + $0x2b0] sm:$0xff] }
 0x142   : > { %v1286_v57 = vpop.f32.mrf.mxu0  ;;  %v1337_v17 = vpop.f32.mrf.mxu1  ;;  %v1379_v63 = vadd.f32 %v10118_v29, %v1345_v10  ;;  %v1381_v0 = vadd.f32 %v10121_v13, %v1347_v12  ;;  %v1378_v35 = vadd.f32 %v10108_v62, %v1344_v48  ;;  %v1380_v36 = vadd.f32 %v12740_v18, %v1346_v14  ;;  %v1765_v51 = vld [vmem:[%s12709_s4 + $0xe8] sm:$0xff]  ;;  %v1756_v10 = vld [vmem:[%s12709_s4 + $0xa0] sm:$0xff] }
 0x143   : > { %v1352_v55 = vadd.f32 %v1286_v57, %v1171_v43  ;;  %v1354_v56 = vadd.f32 %v1337_v17, %v1173_v44  ;;  %v1383_v2 = vadd.f32 %v10118_v29, %v1349_v32  ;;  %v1385_v3 = vadd.f32 %v10121_v13, %v1351_v59  ;;  %v1831_v43 = vld [vmem:[%s12709_s4 + $0x2f8] sm:$0xff]  ;;  %v1766_v44 = vld [vmem:[%s12709_s4 + $0xf0] sm:$0xff]  ;;  %v1829_v52 = vld [vmem:[%s12709_s4 + $0x2e8] sm:$0xff] }
 0x144   : > { %v1288_v8 = vpop.f32.mrf.mxu0  ;;  %v1339_v60 = vpop.f32.mrf.mxu1  ;;  %v1394_v39 = vmax.f32 %v1382_v21, 0.0  ;;  %v1396_v25 = vmax.f32 %v1384_v61, 0.0  ;;  %v1391_v26 = vmax.f32 %v1379_v63, 0.0  ;;  %v1392_v40 = vmax.f32 %v1380_v36, 0.0  ;;  %v1764_v57 = vld [vmem:[%s12709_s4 + $0xe0] sm:$0xff]  ;;  %v1757_v5 = vld [vmem:[%s12709_s4 + $0xa8] sm:$0xff] }
 0x145   : > { %v1353_v16 = vadd.f32 %v1288_v8, %v1172_v58  ;;  %v1355_v6 = vadd.f32 %v1339_v60, %v1174_v30  ;;  %v1386_v15 = vadd.f32 %v10108_v62, %v1352_v55  ;;  %v1388_v19 = vadd.f32 %v12740_v18, %v1354_v56  ;;  %v1402_v62 = vld [vmem:[%s12708_s3] sm:$0xff]  ;;  %v1762_v55 = vld [vmem:[%s12709_s4 + $0xd0] sm:$0xff]  ;;  %v1761_v58 = vld [vmem:[%s12709_s4 + $0xc8] sm:$0xff] }
 0x146   : > { %v1341_v47 = vpop.f32.mrf.mxu1  ;;  %v1290_v7 = vpop.f32.mrf.mxu0  ;;  %v1395_v38 = vmax.f32 %v1383_v2, 0.0  ;;  %v1397_v24 = vmax.f32 %v1385_v3, 0.0  ;;  %v12741_v41 = vmov 0.0   ;;  %v1828_v17 = vld [vmem:[%s12709_s4 + $0x2e0] sm:$0xff]  ;;  %v1826_v56 = vld [vmem:[%s12709_s4 + $0x2d0] sm:$0xff]  ;;  %v1825_v30 = vld [vmem:[%s12709_s4 + $0x2c8] sm:$0xff] }
 0x147   : > { %v1387_v33 = vadd.f32 %v10118_v29, %v1353_v16  ;;  %v1389_v31 = vadd.f32 %v10121_v13, %v1355_v6  ;;  %v1398_v23 = vmax.f32 %v1386_v15, 0.0  ;;  %v1400_v37 = vmax.f32 %v1388_v19, 0.0  ;;  %v1760_v32 = vld [vmem:[%s12709_s4 + $0xc0] sm:$0xff]  ;;  %v1759_v8 = vld [vmem:[%s12709_s4 + $0xb8] sm:$0xff]  ;;  %v1821_v9 = vld [vmem:[%s12709_s4 + $0x2a8] sm:$0xff] }
 0x148   : > { %v1342_v1 = vpop.f32.mrf.mxu1  ;;  %v1291_v20 = vpop.f32.mrf.mxu0  ;;  %v1393_v29 = vmax.f32 %v1381_v0, 0.0  ;;  %v1390_v13 = vmax.f32 %v1378_v35, 0.0  ;;  %v1824_v59 = vld [vmem:[%s12709_s4 + $0x2c0] sm:$0xff]  ;;  %v1823_v60 = vld [vmem:[%s12709_s4 + $0x2b8] sm:$0xff]  ;;  %v1754_v47 = vld [vmem:[%s12709_s4 + $0x90] sm:$0xff] }
 0x149   : > { %v1399_v22 = vmax.f32 %v1387_v33, 0.0  ;;  %v1401_v34 = vmax.f32 %v1389_v31, 0.0  ;;  %v1820_v12 = vld [vmem:[%s12709_s4 + $0x2a0] sm:$0xff]  ;;  %v1755_v16 = vld [vmem:[%s12709_s4 + $0x98] sm:$0xff]  ;;  %v1818_v7 = vld [vmem:[%s12709_s4 + $0x290] sm:$0xff] }
 0x14a   : > { %v1819_v6 = vld [vmem:[%s12709_s4 + $0x298] sm:$0xff]  ;;  %v1753_v48 = vld [vmem:[%s12709_s4 + $0x88] sm:$0xff]  ;;  %v1752_v15 = vld [vmem:[%s12709_s4 + $0x80] sm:$0xff] }
 0x14b   : > { %1437 = vmatprep.subr.mxu0 %v1399_v22  ;;  %1514 = vmatprep.subr.mxu1 %v1401_v34  ;;  %v1817_v14 = vld [vmem:[%s12709_s4 + $0x288] sm:$0xff]  ;;  %v1816_v18 = vld [vmem:[%s12709_s4 + $0x280] sm:$0xff]  ;;  %v1751_v19 = vld [vmem:[%s12709_s4 + $0x78] sm:$0xff] }
 0x14c   : > { %1438 = vmatpush1.msra.mxu0 %v1398_v23  ;;  %1515 = vmatpush1.msra.mxu1 %v1400_v37  ;;  %v1815_v2 = vld [vmem:[%s12709_s4 + $0x278] sm:$0xff]  ;;  %v1750_v3 = vld [vmem:[%s12709_s4 + $0x70] sm:$0xff]  ;;  %v1749_v31 = vld [vmem:[%s12709_s4 + $0x68] sm:$0xff] }
 0x14d   : > { %1439 = vmatprep.subr.mxu0 %v1395_v38  ;;  %1516 = vmatprep.subr.mxu1 %v1397_v24  ;;  %v1814_v33 = vld [vmem:[%s12709_s4 + $0x270] sm:$0xff]  ;;  %v1813_v1 = vld [vmem:[%s12709_s4 + $0x268] sm:$0xff]  ;;  %v1748_v20 = vld [vmem:[%s12709_s4 + $0x60] sm:$0xff] }
 0x14e   : > { %1440 = vmatpush1.msra.mxu0 %v1394_v39  ;;  %1517 = vmatpush1.msra.mxu1 %v1396_v25  ;;  %v1812_v21 = vld [vmem:[%s12709_s4 + $0x260] sm:$0xff]  ;;  %v1747_v61 = vld [vmem:[%s12709_s4 + $0x58] sm:$0xff]  ;;  %v1746_v0 = vld [vmem:[%s12709_s4 + $0x50] sm:$0xff] }
 0x14f   : > { %1441 = vmatprep.subr.mxu0 %v1391_v26  ;;  %1518 = vmatprep.subr.mxu1 %v1393_v29  ;;  %v1811_v63 = vld [vmem:[%s12709_s4 + $0x258] sm:$0xff]  ;;  %v1809_v35 = vld [vmem:[%s12709_s4 + $0x248] sm:$0xff]  ;;  %v1744_v36 = vld [vmem:[%s12709_s4 + $0x40] sm:$0xff] }
 0x150   : > { %1442 = vmatpush1.msra.mxu0 %v1390_v13  ;;  %1519 = vmatpush1.msra.mxu1 %v1392_v40 }
 0x151   : > { %7575 = vmatmul.mubr.msk.f32.vlgmr.msra.gmra.mxu0 %vm1404_vm5, %v1402_v62  ;;  %7577 = vmatmul.mubr.msk.f32.vlgmr.msra.gmra.mxu1 %vm1404_vm5, %v1402_v62  ;;  %v1803_v62 = vld [vmem:[%s12709_s4 + $0x218] sm:$0xff] }
 0x152   : > { %1600 = vmatprep.subr.mxu0 %v1399_v22  ;;  %1677 = vmatprep.subr.mxu1 %v1401_v34  ;;  %v1810_v22 = vld [vmem:[%s12709_s4 + $0x250] sm:$0xff]  ;;  %v1745_v34 = vld [vmem:[%s12709_s4 + $0x48] sm:$0xff] }
 0x153   : > { %1601 = vmatpush1.msra.mxu0 %v1398_v23  ;;  %1678 = vmatpush1.msra.mxu1 %v1400_v37  ;;  %v1808_v23 = vld [vmem:[%s12709_s4 + $0x240] sm:$0xff]  ;;  %v1743_v37 = vld [vmem:[%s12709_s4 + $0x38] sm:$0xff] }
 0x154   : > { %1602 = vmatprep.subr.mxu0 %v1395_v38  ;;  %1679 = vmatprep.subr.mxu1 %v1397_v24  ;;  %v1807_v38 = vld [vmem:[%s12709_s4 + $0x238] sm:$0xff]  ;;  %v1742_v24 = vld [vmem:[%s12709_s4 + $0x30] sm:$0xff] }
 0x155   : > { %1481 = vmatprep.mubr.f32.mxu0 %v12741_v41  ;;  %1558 = vmatprep.mubr.f32.mxu1 %v12741_v41 }
 0x156   : > { %1603 = vmatpush1.msra.mxu0 %v1394_v39  ;;  %1680 = vmatpush1.msra.mxu1 %v1396_v25  ;;  %v1806_v39 = vld [vmem:[%s12709_s4 + $0x230] sm:$0xff]  ;;  %v1741_v25 = vld [vmem:[%s12709_s4 + $0x28] sm:$0xff] }
 0x157   : > { %7576 = vmatmul.mubr.msk.f32.gmra.mxu0 %vm1404_vm5, %v1403_v27  ;;  %7578 = vmatmul.mubr.msk.f32.gmra.mxu1 %vm1404_vm5, %v1403_v27  ;;  %v1738_v27 = vld [vmem:[%s12709_s4 + $0x10] sm:$0xff] }
 0x158   : > { %1604 = vmatprep.subr.mxu0 %v1391_v26  ;;  %1681 = vmatprep.subr.mxu1 %v1393_v29  ;;  %v1805_v26 = vld [vmem:[%s12709_s4 + $0x228] sm:$0xff]  ;;  %v1740_v29 = vld [vmem:[%s12709_s4 + $0x20] sm:$0xff] }
 0x159   : > { %1605 = vmatpush1.msra.mxu0 %v1390_v13  ;;  %1682 = vmatpush1.msra.mxu1 %v1392_v40  ;;  %v1804_v13 = vld [vmem:[%s12709_s4 + $0x220] sm:$0xff]  ;;  %v1739_v40 = vld [vmem:[%s12709_s4 + $0x18] sm:$0xff] }
 0x15a   : > { %1638 = vmatprep.mubr.f32.mxu0 %v12741_v41  ;;  %1715 = vmatprep.mubr.f32.mxu1 %v12741_v41 }
 0x15b   : > { %7581 = vmatmul.mubr.msk.f32.vlgmr.msra.gmra.mxu0 %vm1404_vm5, %v7579_v28  ;;  %7583 = vmatmul.mubr.msk.f32.vlgmr.msra.gmra.mxu1 %vm1404_vm5, %v7579_v28  ;;  %v1802_v28 = vld [vmem:[%s12709_s4 + $0x210] sm:$0xff] }
 0x15c   : > { %1644 = vmatprep.mubr.f32.mxu0 %v12741_v41  ;;  %1721 = vmatprep.mubr.f32.mxu1 %v12741_v41 }
 0x15d   : > { %1863 = vmatprep.subr.mxu0 %v1767_v42  ;;  %1940 = vmatprep.subr.mxu1 %v1831_v43  ;;  %v1737_v42 = vld [vmem:[%s12709_s4 + $0x8] sm:$0xff] }
 0x15e   : > { %1864 = vmatpush1.msra.mxu0 %v1766_v44  ;;  %1941 = vmatpush1.msra.mxu1 %v1830_v49  ;;  %v1801_v43 = vld [vmem:[%s12709_s4 + $0x208] sm:$0xff]  ;;  %v1736_v44 = vld [vmem:[%s12709_s4] sm:$0xff] }
 0x15f   : > { %7582 = vmatmul.mubr.msk.f32.gmra.mxu0 %vm1404_vm5, %v7580_v50  ;;  %7584 = vmatmul.mubr.msk.f32.gmra.mxu1 %vm1404_vm5, %v7580_v50  ;;  %v1800_v49 = vld [vmem:[%s12709_s4 + $0x200] sm:$0xff]  ;;  %v1799_v50 = vld [vmem:[%s12709_s4 + $0x1f8] sm:$0xff] }
 0x160   : > { %1865 = vmatprep.subr.mxu0 %v1765_v51  ;;  %1942 = vmatprep.subr.mxu1 %v1829_v52  ;;  %v1855_v51 = vld [vmem:[%s12709_s4 + $0x3b8] sm:$0xff]  ;;  %v1798_v52 = vld [vmem:[%s12709_s4 + $0x1f0] sm:$0xff] }
 0x161   : > { %1866 = vmatpush1.msra.mxu0 %v1764_v57  ;;  %1943 = vmatpush1.msra.mxu1 %v1828_v17  ;;  %v1854_v57 = vld [vmem:[%s12709_s4 + $0x3b0] sm:$0xff]  ;;  %v1797_v17 = vld [vmem:[%s12709_s4 + $0x1e8] sm:$0xff] }
 0x162   : > { %1867 = vmatprep.subr.mxu0 %v1763_v53  ;;  %1944 = vmatprep.subr.mxu1 %v1827_v54  ;;  %v1853_v53 = vld [vmem:[%s12709_s4 + $0x3a8] sm:$0xff]  ;;  %v1796_v54 = vld [vmem:[%s12709_s4 + $0x1e0] sm:$0xff] }
 0x163   : > { %1868 = vmatpush1.msra.mxu0 %v1762_v55  ;;  %1945 = vmatpush1.msra.mxu1 %v1826_v56  ;;  %v1852_v55 = vld [vmem:[%s12709_s4 + $0x3a0] sm:$0xff]  ;;  %v1795_v56 = vld [vmem:[%s12709_s4 + $0x1d8] sm:$0xff] }
 0x164   : > { %1869 = vmatprep.subr.mxu0 %v1761_v58  ;;  %1946 = vmatprep.subr.mxu1 %v1825_v30  ;;  %v1851_v58 = vld [vmem:[%s12709_s4 + $0x398] sm:$0xff]  ;;  %v1794_v30 = vld [vmem:[%s12709_s4 + $0x1d0] sm:$0xff] }
 0x165   : > { %1870 = vmatpush1.msra.mxu0 %v1760_v32  ;;  %1947 = vmatpush1.msra.mxu1 %v1824_v59  ;;  %v1850_v32 = vld [vmem:[%s12709_s4 + $0x390] sm:$0xff]  ;;  %v1793_v59 = vld [vmem:[%s12709_s4 + $0x1c8] sm:$0xff] }
 0x166   : > { %1871 = vmatprep.subr.mxu0 %v1759_v8  ;;  %1948 = vmatprep.subr.mxu1 %v1823_v60  ;;  %v1849_v8 = vld [vmem:[%s12709_s4 + $0x388] sm:$0xff]  ;;  %v1792_v60 = vld [vmem:[%s12709_s4 + $0x1c0] sm:$0xff] }
 0x167   : > { %1872 = vmatpush1.msra.mxu0 %v1758_v11  ;;  %1949 = vmatpush1.msra.mxu1 %v1822_v4  ;;  %v1848_v11 = vld [vmem:[%s12709_s4 + $0x380] sm:$0xff]  ;;  %v1791_v4 = vld [vmem:[%s12709_s4 + $0x1b8] sm:$0xff] }
 0x168   : > { %1873 = vmatprep.subr.mxu0 %v1757_v5  ;;  %1950 = vmatprep.subr.mxu1 %v1821_v9  ;;  %v1847_v5 = vld [vmem:[%s12709_s4 + $0x378] sm:$0xff]  ;;  %v1790_v9 = vld [vmem:[%s12709_s4 + $0x1b0] sm:$0xff] }
 0x169   : > { %1874 = vmatpush1.msra.mxu0 %v1756_v10  ;;  %1951 = vmatpush1.msra.mxu1 %v1820_v12  ;;  %v1846_v10 = vld [vmem:[%s12709_s4 + $0x370] sm:$0xff]  ;;  %v1789_v12 = vld [vmem:[%s12709_s4 + $0x1a8] sm:$0xff] }
 0x16a   : > { %1875 = vmatprep.subr.mxu0 %v1755_v16  ;;  %1952 = vmatprep.subr.mxu1 %v1819_v6  ;;  %v1845_v16 = vld [vmem:[%s12709_s4 + $0x368] sm:$0xff]  ;;  %v1788_v6 = vld [vmem:[%s12709_s4 + $0x1a0] sm:$0xff] }
 0x16b   : > { %1876 = vmatpush1.msra.mxu0 %v1754_v47  ;;  %1953 = vmatpush1.msra.mxu1 %v1818_v7  ;;  %v1787_v47 = vld [vmem:[%s12709_s4 + $0x198] sm:$0xff]  ;;  %v1786_v7 = vld [vmem:[%s12709_s4 + $0x190] sm:$0xff] }
 0x16c   : > { %1877 = vmatprep.subr.mxu0 %v1753_v48  ;;  %1954 = vmatprep.subr.mxu1 %v1817_v14  ;;  %v1785_v48 = vld [vmem:[%s12709_s4 + $0x188] sm:$0xff]  ;;  %v1784_v14 = vld [vmem:[%s12709_s4 + $0x180] sm:$0xff] }
 0x16d   : > { %1878 = vmatpush1.msra.mxu0 %v1752_v15  ;;  %1955 = vmatpush1.msra.mxu1 %v1816_v18  ;;  %v1783_v15 = vld [vmem:[%s12709_s4 + $0x178] sm:$0xff]  ;;  %v1782_v18 = vld [vmem:[%s12709_s4 + $0x170] sm:$0xff] }
 0x16e   : > { %1879 = vmatprep.subr.mxu0 %v1751_v19  ;;  %1956 = vmatprep.subr.mxu1 %v1815_v2  ;;  %v1781_v19 = vld [vmem:[%s12709_s4 + $0x168] sm:$0xff]  ;;  %v1780_v2 = vld [vmem:[%s12709_s4 + $0x160] sm:$0xff] }
 0x16f   : > { %1880 = vmatpush1.msra.mxu0 %v1750_v3  ;;  %1957 = vmatpush1.msra.mxu1 %v1814_v33  ;;  %v1844_v3 = vld [vmem:[%s12709_s4 + $0x360] sm:$0xff]  ;;  %v1779_v33 = vld [vmem:[%s12709_s4 + $0x158] sm:$0xff] }
 0x170   : > { %1881 = vmatprep.subr.mxu0 %v1749_v31  ;;  %1958 = vmatprep.subr.mxu1 %v1813_v1  ;;  %v1843_v31 = vld [vmem:[%s12709_s4 + $0x358] sm:$0xff]  ;;  %v1778_v1 = vld [vmem:[%s12709_s4 + $0x150] sm:$0xff] }
 0x171   : > { %1882 = vmatpush1.msra.mxu0 %v1748_v20  ;;  %1959 = vmatpush1.msra.mxu1 %v1812_v21  ;;  %v1842_v20 = vld [vmem:[%s12709_s4 + $0x350] sm:$0xff]  ;;  %v1777_v21 = vld [vmem:[%s12709_s4 + $0x148] sm:$0xff] }
 0x172   : > { %1883 = vmatprep.subr.mxu0 %v1747_v61  ;;  %1960 = vmatprep.subr.mxu1 %v1811_v63  ;;  %v1841_v61 = vld [vmem:[%s12709_s4 + $0x348] sm:$0xff]  ;;  %v1776_v63 = vld [vmem:[%s12709_s4 + $0x140] sm:$0xff] }
 0x173   : > { %1884 = vmatpush1.msra.mxu0 %v1746_v0  ;;  %1961 = vmatpush1.msra.mxu1 %v1810_v22  ;;  %v1840_v0 = vld [vmem:[%s12709_s4 + $0x340] sm:$0xff]  ;;  %v1775_v22 = vld [vmem:[%s12709_s4 + $0x138] sm:$0xff] }
 0x174   : > { %1885 = vmatprep.subr.mxu0 %v1745_v34  ;;  %1962 = vmatprep.subr.mxu1 %v1809_v35  ;;  %v1839_v34 = vld [vmem:[%s12709_s4 + $0x338] sm:$0xff]  ;;  %v1774_v35 = vld [vmem:[%s12709_s4 + $0x130] sm:$0xff] }
 0x175   : > { %1886 = vmatpush1.msra.mxu0 %v1744_v36  ;;  %1963 = vmatpush1.msra.mxu1 %v1808_v23  ;;  %v1838_v36 = vld [vmem:[%s12709_s4 + $0x330] sm:$0xff]  ;;  %v1773_v23 = vld [vmem:[%s12709_s4 + $0x128] sm:$0xff] }
 0x176   : > { %1887 = vmatprep.subr.mxu0 %v1743_v37  ;;  %1964 = vmatprep.subr.mxu1 %v1807_v38  ;;  %v1837_v37 = vld [vmem:[%s12709_s4 + $0x328] sm:$0xff]  ;;  %v1772_v38 = vld [vmem:[%s12709_s4 + $0x120] sm:$0xff] }
 0x177   : > { %1888 = vmatpush1.msra.mxu0 %v1742_v24  ;;  %1965 = vmatpush1.msra.mxu1 %v1806_v39  ;;  %v1836_v24 = vld [vmem:[%s12709_s4 + $0x320] sm:$0xff]  ;;  %v1771_v39 = vld [vmem:[%s12709_s4 + $0x118] sm:$0xff] }
 0x178   : > { %1889 = vmatprep.subr.mxu0 %v1741_v25  ;;  %1966 = vmatprep.subr.mxu1 %v1805_v26  ;;  %v1835_v25 = vld [vmem:[%s12709_s4 + $0x318] sm:$0xff]  ;;  %v1770_v26 = vld [vmem:[%s12709_s4 + $0x110] sm:$0xff] }
 0x179   : > { %1890 = vmatpush1.msra.mxu0 %v1740_v29  ;;  %1967 = vmatpush1.msra.mxu1 %v1804_v13  ;;  %v1834_v29 = vld [vmem:[%s12709_s4 + $0x310] sm:$0xff]  ;;  %v1769_v13 = vld [vmem:[%s12709_s4 + $0x108] sm:$0xff] }
 0x17a   : > { %1891 = vmatprep.subr.mxu0 %v1739_v40  ;;  %1968 = vmatprep.subr.mxu1 %v1803_v62  ;;  %v1833_v40 = vld [vmem:[%s12709_s4 + $0x308] sm:$0xff]  ;;  %v1768_v62 = vld [vmem:[%s12709_s4 + $0x100] sm:$0xff] }
 0x17b   : > { %1892 = vmatpush1.msra.mxu0 %v1738_v27  ;;  %1969 = vmatpush1.msra.mxu1 %v1802_v28  ;;  %v1832_v27 = vld [vmem:[%s12709_s4 + $0x300] sm:$0xff]  ;;  %v7618_v28 = vld [vmem:[%s12709_s4 + $0x4b8] sm:$0xff] }
 0x17c   : > { %1893 = vmatprep.subr.mxu0 %v1737_v42  ;;  %1970 = vmatprep.subr.mxu1 %v1801_v43  ;;  %v7682_v42 = vld [vmem:[%s12709_s4 + $0x6b8] sm:$0xff] }
 0x17d   : > { %1894 = vmatpush1.msra.mxu0 %v1736_v44  ;;  %1971 = vmatpush1.msra.mxu1 %v1800_v49 }
 0x17e   : > { %1895 = vmatprep.subr.mxu0 %v1799_v50  ;;  %1980 = vmatprep.subr.mxu1 %v1855_v51 }
 0x17f   : > { %1896 = vmatpush2.msra.mxu0 %v1798_v52  ;;  %1981 = vmatpush2.msra.mxu1 %v1854_v57 }
 0x180   : > { %1897 = vmatprep.subr.mxu0 %v1797_v17  ;;  %1982 = vmatprep.subr.mxu1 %v1853_v53 }
 0x181   : > { %1898 = vmatpush2.msra.mxu0 %v1796_v54  ;;  %1983 = vmatpush2.msra.mxu1 %v1852_v55 }
 0x182   : > { %1899 = vmatprep.subr.mxu0 %v1795_v56  ;;  %1984 = vmatprep.subr.mxu1 %v1851_v58 }
 0x183   : > { %1900 = vmatpush2.msra.mxu0 %v1794_v30  ;;  %1985 = vmatpush2.msra.mxu1 %v1850_v32 }
 0x184   : > { %1901 = vmatprep.subr.mxu0 %v1793_v59  ;;  %1986 = vmatprep.subr.mxu1 %v1849_v8 }
 0x185   : > { %1902 = vmatpush2.msra.mxu0 %v1792_v60  ;;  %1987 = vmatpush2.msra.mxu1 %v1848_v11  ;;  %v7617_v11 = vld [vmem:[%s12709_s4 + $0x4b0] sm:$0xff] }
 0x186   : > { %1903 = vmatprep.subr.mxu0 %v1791_v4  ;;  %1988 = vmatprep.subr.mxu1 %v1847_v5  ;;  %v7681_v4 = vld [vmem:[%s12709_s4 + $0x6b0] sm:$0xff]  ;;  %v7616_v5 = vld [vmem:[%s12709_s4 + $0x4a8] sm:$0xff] }
 0x187   : > { %1904 = vmatpush2.msra.mxu0 %v1790_v9  ;;  %1989 = vmatpush2.msra.mxu1 %v1846_v10  ;;  %v7680_v9 = vld [vmem:[%s12709_s4 + $0x6a8] sm:$0xff] }
 0x188   : > { %1905 = vmatprep.subr.mxu0 %v1789_v12  ;;  %1990 = vmatprep.subr.mxu1 %v1845_v16  ;;  %v7615_v16 = vld [vmem:[%s12709_s4 + $0x4a0] sm:$0xff] }
 0x189   : > { %1906 = vmatpush2.msra.mxu0 %v1788_v6  ;;  %1991 = vmatpush2.msra.mxu1 %v1844_v3  ;;  %v7679_v6 = vld [vmem:[%s12709_s4 + $0x6a0] sm:$0xff]  ;;  %v7612_v3 = vld [vmem:[%s12709_s4 + $0x488] sm:$0xff] }
 0x18a   : > { %1907 = vmatprep.subr.mxu0 %v1787_v47  ;;  %1992 = vmatprep.subr.mxu1 %v1843_v31  ;;  %v7611_v31 = vld [vmem:[%s12709_s4 + $0x480] sm:$0xff] }
 0x18b   : > { %1908 = vmatpush2.msra.mxu0 %v1786_v7  ;;  %1993 = vmatpush2.msra.mxu1 %v1842_v20  ;;  %v7610_v20 = vld [vmem:[%s12709_s4 + $0x478] sm:$0xff] }
 0x18c   : > { %1909 = vmatprep.subr.mxu0 %v1785_v48  ;;  %1994 = vmatprep.subr.mxu1 %v1841_v61  ;;  %v7614_v48 = vld [vmem:[%s12709_s4 + $0x498] sm:$0xff]  ;;  %v7609_v61 = vld [vmem:[%s12709_s4 + $0x470] sm:$0xff] }
 0x18d   : > { %1910 = vmatpush2.msra.mxu0 %v1784_v14  ;;  %1995 = vmatpush2.msra.mxu1 %v1840_v0  ;;  %v7678_v14 = vld [vmem:[%s12709_s4 + $0x698] sm:$0xff]  ;;  %v7608_v0 = vld [vmem:[%s12709_s4 + $0x468] sm:$0xff] }
 0x18e   : > { %1911 = vmatprep.subr.mxu0 %v1783_v15  ;;  %1996 = vmatprep.subr.mxu1 %v1839_v34  ;;  %v7607_v34 = vld [vmem:[%s12709_s4 + $0x460] sm:$0xff] }
 0x18f   : > { %1912 = vmatpush2.msra.mxu0 %v1782_v18  ;;  %1997 = vmatpush2.msra.mxu1 %v1838_v36  ;;  %v7606_v36 = vld [vmem:[%s12709_s4 + $0x458] sm:$0xff] }
 0x190   : > { %1913 = vmatprep.subr.mxu0 %v1781_v19  ;;  %1998 = vmatprep.subr.mxu1 %v1837_v37  ;;  %v7613_v19 = vld [vmem:[%s12709_s4 + $0x490] sm:$0xff] }
 0x191   : > { %1914 = vmatpush2.msra.mxu0 %v1780_v2  ;;  %1999 = vmatpush2.msra.mxu1 %v1836_v24  ;;  %v7677_v2 = vld [vmem:[%s12709_s4 + $0x690] sm:$0xff]  ;;  %v7604_v24 = vld [vmem:[%s12709_s4 + $0x448] sm:$0xff] }
 0x192   : > { %1915 = vmatprep.subr.mxu0 %v1779_v33  ;;  %2000 = vmatprep.subr.mxu1 %v1835_v25  ;;  %v7676_v33 = vld [vmem:[%s12709_s4 + $0x688] sm:$0xff]  ;;  %v7605_v37 = vld [vmem:[%s12709_s4 + $0x450] sm:$0xff]  ;;  %v7603_v25 = vld [vmem:[%s12709_s4 + $0x440] sm:$0xff] }
 0x193   : > { %1916 = vmatpush2.msra.mxu0 %v1778_v1  ;;  %2001 = vmatpush2.msra.mxu1 %v1834_v29  ;;  %v7675_v1 = vld [vmem:[%s12709_s4 + $0x680] sm:$0xff]  ;;  %v7602_v29 = vld [vmem:[%s12709_s4 + $0x438] sm:$0xff] }
 0x194   : > { %1917 = vmatprep.subr.mxu0 %v1777_v21  ;;  %2002 = vmatprep.subr.mxu1 %v1833_v40  ;;  %v7674_v21 = vld [vmem:[%s12709_s4 + $0x678] sm:$0xff]  ;;  %v7601_v40 = vld [vmem:[%s12709_s4 + $0x430] sm:$0xff] }
 0x195   : > { %1918 = vmatpush2.msra.mxu0 %v1776_v63  ;;  %2003 = vmatpush2.msra.mxu1 %v1832_v27  ;;  %v7673_v63 = vld [vmem:[%s12709_s4 + $0x670] sm:$0xff]  ;;  %v7600_v27 = vld [vmem:[%s12709_s4 + $0x428] sm:$0xff] }
 0x196   : > { %1919 = vmatprep.subr.mxu0 %v1775_v22  ;;  %2138 = vmatprep.subr.mxu1 %v7618_v28  ;;  %v7672_v22 = vld [vmem:[%s12709_s4 + $0x668] sm:$0xff] }
 0x197   : > { %1920 = vmatpush2.msra.mxu0 %v1774_v35  ;;  %v7671_v35 = vld [vmem:[%s12709_s4 + $0x660] sm:$0xff]  ;;  %v7664_v28 = vld [vmem:[%s12709_s4 + $0x628] sm:$0xff] }
 0x198   : > { %1921 = vmatprep.subr.mxu0 %v1773_v23  ;;  %v7670_v23 = vld [vmem:[%s12709_s4 + $0x658] sm:$0xff] }
 0x199   : > { %1922 = vmatpush2.msra.mxu0 %v1772_v38  ;;  %v7669_v38 = vld [vmem:[%s12709_s4 + $0x650] sm:$0xff] }
 0x19a   : > { %1923 = vmatprep.subr.mxu0 %v1771_v39  ;;  %v7668_v39 = vld [vmem:[%s12709_s4 + $0x648] sm:$0xff] }
 0x19b   : > { %1924 = vmatpush2.msra.mxu0 %v1770_v26  ;;  %v7667_v26 = vld [vmem:[%s12709_s4 + $0x640] sm:$0xff] }
 0x19c   : > { %1925 = vmatprep.subr.mxu0 %v1769_v13  ;;  %v7666_v13 = vld [vmem:[%s12709_s4 + $0x638] sm:$0xff] }
 0x19d   : > { %1926 = vmatpush2.msra.mxu0 %v1768_v62  ;;  %v7665_v62 = vld [vmem:[%s12709_s4 + $0x630] sm:$0xff] }
 0x19e   : > { %2215 = vmatprep.subr.mxu0 %v7682_v42  ;;  %v7599_v42 = vld [vmem:[%s12709_s4 + $0x420] sm:$0xff] }
 0x211   : > { %v1477_v43 = vpop.f32.mrf.mxu0  ;;  %v1554_v44 = vpop.f32.mrf.mxu1 }
 0x213   : > { %v1479_v49 = vpop.f32.mrf.mxu0  ;;  %v1556_v50 = vpop.f32.mrf.mxu1 }
 0x217   : > { %v1483_v51 = vpop.f32.mrf.mxu0  ;;  %v1560_v52 = vpop.f32.mrf.mxu1 }
 0x219   : > { %v1485_v57 = vpop.f32.mrf.mxu0  ;;  %v1562_v17 = vpop.f32.mrf.mxu1 }
 0x21b   : > { %v1640_v53 = vpop.f32.mrf.mxu0  ;;  %v1717_v54 = vpop.f32.mrf.mxu1 }
 0x21c   : > { %v10555_v32 = vmax.f32 %v1477_v43, %v1640_v53  ;;  %v10557_v59 = vmax.f32 %v1554_v44, %v1717_v54  ;;  %v7663_v43 = vld [vmem:[%s12709_s4 + $0x620] sm:$0xff]  ;;  %v7598_v44 = vld [vmem:[%s12709_s4 + $0x418] sm:$0xff] }
 0x21d   : > { %v1642_v55 = vpop.f32.mrf.mxu0  ;;  %v1719_v56 = vpop.f32.mrf.mxu1  ;;  %v7659_v53 = vld [vmem:[%s12709_s4 + $0x600] sm:$0xff]  ;;  %v7594_v54 = vld [vmem:[%s12709_s4 + $0x3f8] sm:$0xff] }
 0x21e   : > { %v1729_v58 = vmax.f32 %v1479_v49, %v1642_v55  ;;  %v1731_v30 = vmax.f32 %v1556_v50, %v1719_v56  ;;  %v7662_v49 = vld [vmem:[%s12709_s4 + $0x618] sm:$0xff]  ;;  %v7597_v50 = vld [vmem:[%s12709_s4 + $0x410] sm:$0xff] }
 0x21f   : > { %v1646_v8 = vpop.f32.mrf.mxu0  ;;  %v1723_v60 = vpop.f32.mrf.mxu1  ;;  %v7658_v55 = vld [vmem:[%s12709_s4 + $0x5f8] sm:$0xff]  ;;  %v7593_v56 = vld [vmem:[%s12709_s4 + $0x3f0] sm:$0xff] }
 0x220   : > { %1927 = vmatprep.mubr.f32.mxu0 %v1729_v58  ;;  %7585 = vmatprep.mubr.msk.f32.mxu1 %vm1856_vm6, %v1731_v30  ;;  %v10590_v15 = vmax.f32 %v1483_v51, %v1646_v8  ;;  %v10592_v18 = vmax.f32 %v1560_v52, %v1723_v60  ;;  %v7661_v51 = vld [vmem:[%s12709_s4 + $0x610] sm:$0xff]  ;;  %v7596_v52 = vld [vmem:[%s12709_s4 + $0x408] sm:$0xff]  ;;  %v7591_v60 = vld [vmem:[%s12709_s4 + $0x3e0] sm:$0xff] }
 0x221   : > { %v1648_v10 = vpop.f32.mrf.mxu0  ;;  %v1725_v12 = vpop.f32.mrf.mxu1  ;;  %1928 = vmatmul.mubr.f32.vlgmr.msra.gmra.mxu0 %v10555_v32  ;;  %2005 = vmatmul.mubr.f32.vlgmr.msra.gmra.mxu1 %v10557_v59  ;;  %v7656_v8 = vld [vmem:[%s12709_s4 + $0x5e8] sm:$0xff] }
 0x222   : > { %v10580_v47 = vmax.f32 %v1485_v57, %v1648_v10  ;;  %v10582_v7 = vmax.f32 %v1562_v17, %v1725_v12  ;;  %2139 = vmatpush1.msra.mxu1 %v7617_v11  ;;  %2216 = vmatpush1.msra.mxu0 %v7681_v4  ;;  %v7660_v57 = vld [vmem:[%s12709_s4 + $0x608] sm:$0xff]  ;;  %v7595_v17 = vld [vmem:[%s12709_s4 + $0x400] sm:$0xff]  ;;  %v7590_v4 = vld [vmem:[%s12709_s4 + $0x3d8] sm:$0xff] }
 0x223   : > { %2140 = vmatprep.subr.mxu1 %v7616_v5  ;;  %2217 = vmatprep.subr.mxu0 %v7680_v9  ;;  %v7655_v11 = vld [vmem:[%s12709_s4 + $0x5e0] sm:$0xff]  ;;  %v7654_v5 = vld [vmem:[%s12709_s4 + $0x5d8] sm:$0xff]  ;;  %v7589_v9 = vld [vmem:[%s12709_s4 + $0x3d0] sm:$0xff] }
 0x224   : > { %2141 = vmatpush1.msra.mxu1 %v7615_v16  ;;  %2218 = vmatpush1.msra.mxu0 %v7679_v6  ;;  %v7653_v10 = vld [vmem:[%s12709_s4 + $0x5d0] sm:$0xff]  ;;  %v7588_v12 = vld [vmem:[%s12709_s4 + $0x3c8] sm:$0xff]  ;;  %v7587_v6 = vld [vmem:[%s12709_s4 + $0x3c0] sm:$0xff] }
 0x225   : > { %1933 = vmatprep.mubr.f32.mxu0 %v10580_v47  ;;  %7586 = vmatprep.mubr.msk.f32.mxu1 %vm1856_vm6, %v10582_v7  ;;  %v7652_v16 = vld [vmem:[%s12709_s4 + $0x5c8] sm:$0xff] }
 0x226   : > { %2142 = vmatprep.subr.mxu1 %v7614_v48  ;;  %2219 = vmatprep.subr.mxu0 %v7678_v14  ;;  %v7651_v48 = vld [vmem:[%s12709_s4 + $0x5c0] sm:$0xff]  ;;  %v7650_v14 = vld [vmem:[%s12709_s4 + $0x5b8] sm:$0xff] }
 0x227   : > { %1934 = vmatmul.mubr.f32.gmra.mxu0 %v10590_v15  ;;  %2011 = vmatmul.mubr.f32.gmra.mxu1 %v10592_v18 }
 0x228   : > { %2143 = vmatpush1.msra.mxu1 %v7613_v19  ;;  %2220 = vmatpush1.msra.mxu0 %v7677_v2  ;;  %v7706_v19 = vld [vmem:[%s12709_s4 + $0x778] sm:$0xff]  ;;  %v7649_v2 = vld [vmem:[%s12709_s4 + $0x5b0] sm:$0xff] }
 0x229   : > { %2144 = vmatprep.subr.mxu1 %v7612_v3  ;;  %2202 = vmatprep.mubr.f32.mxu1 %v1729_v58  ;;  %v7657_v58 = vld [vmem:[%s12709_s4 + $0x5f0] sm:$0xff] }
 0x22a   : > { %2221 = vmatprep.subr.mxu0 %v7676_v33  ;;  %7707 = vmatprep.mubr.msk.f32.mxu0 %vm1856_vm6, %v1731_v30  ;;  %v7592_v30 = vld [vmem:[%s12709_s4 + $0x3e8] sm:$0xff]  ;;  %v7705_v3 = vld [vmem:[%s12709_s4 + $0x770] sm:$0xff] }
 0x22b   : > { %2145 = vmatpush1.msra.mxu1 %v7611_v31  ;;  %2222 = vmatpush1.msra.mxu0 %v7675_v1  ;;  %v7648_v33 = vld [vmem:[%s12709_s4 + $0x5a8] sm:$0xff]  ;;  %v7647_v1 = vld [vmem:[%s12709_s4 + $0x5a0] sm:$0xff] }
 0x22c   : > { %2146 = vmatprep.subr.mxu1 %v7610_v20  ;;  %2223 = vmatprep.subr.mxu0 %v7674_v21  ;;  %v7704_v31 = vld [vmem:[%s12709_s4 + $0x768] sm:$0xff]  ;;  %v7703_v20 = vld [vmem:[%s12709_s4 + $0x760] sm:$0xff]  ;;  %v7646_v21 = vld [vmem:[%s12709_s4 + $0x598] sm:$0xff] }
 0x22d   : > { %2147 = vmatpush1.msra.mxu1 %v7609_v61  ;;  %2224 = vmatpush1.msra.mxu0 %v7673_v63  ;;  %v7702_v61 = vld [vmem:[%s12709_s4 + $0x758] sm:$0xff]  ;;  %v7645_v63 = vld [vmem:[%s12709_s4 + $0x590] sm:$0xff] }
 0x22e   : > { %2148 = vmatprep.subr.mxu1 %v7608_v0  ;;  %2225 = vmatprep.subr.mxu0 %v7672_v22  ;;  %v7701_v0 = vld [vmem:[%s12709_s4 + $0x750] sm:$0xff]  ;;  %v7644_v22 = vld [vmem:[%s12709_s4 + $0x588] sm:$0xff] }
 0x22f   : > { %2149 = vmatpush1.msra.mxu1 %v7607_v34  ;;  %2226 = vmatpush1.msra.mxu0 %v7671_v35  ;;  %v7700_v34 = vld [vmem:[%s12709_s4 + $0x748] sm:$0xff]  ;;  %v7643_v35 = vld [vmem:[%s12709_s4 + $0x580] sm:$0xff] }
 0x230   : > { %2150 = vmatprep.subr.mxu1 %v7606_v36  ;;  %2227 = vmatprep.subr.mxu0 %v7670_v23  ;;  %v7699_v36 = vld [vmem:[%s12709_s4 + $0x740] sm:$0xff]  ;;  %v7642_v23 = vld [vmem:[%s12709_s4 + $0x578] sm:$0xff] }
 0x231   : > { %2151 = vmatpush1.msra.mxu1 %v7605_v37  ;;  %2228 = vmatpush1.msra.mxu0 %v7669_v38  ;;  %v7698_v37 = vld [vmem:[%s12709_s4 + $0x738] sm:$0xff]  ;;  %v7641_v38 = vld [vmem:[%s12709_s4 + $0x570] sm:$0xff] }
 0x232   : > { %2152 = vmatprep.subr.mxu1 %v7604_v24  ;;  %2229 = vmatprep.subr.mxu0 %v7668_v39  ;;  %v7697_v24 = vld [vmem:[%s12709_s4 + $0x730] sm:$0xff]  ;;  %v7640_v39 = vld [vmem:[%s12709_s4 + $0x568] sm:$0xff] }
 0x233   : > { %2153 = vmatpush1.msra.mxu1 %v7603_v25  ;;  %2230 = vmatpush1.msra.mxu0 %v7667_v26  ;;  %v7696_v25 = vld [vmem:[%s12709_s4 + $0x728] sm:$0xff]  ;;  %v7639_v26 = vld [vmem:[%s12709_s4 + $0x560] sm:$0xff] }
 0x234   : > { %2154 = vmatprep.subr.mxu1 %v7602_v29  ;;  %2231 = vmatprep.subr.mxu0 %v7666_v13  ;;  %v7695_v29 = vld [vmem:[%s12709_s4 + $0x720] sm:$0xff]  ;;  %v7638_v13 = vld [vmem:[%s12709_s4 + $0x558] sm:$0xff] }
 0x235   : > { %2155 = vmatpush1.msra.mxu1 %v7601_v40  ;;  %2232 = vmatpush1.msra.mxu0 %v7665_v62  ;;  %v7694_v40 = vld [vmem:[%s12709_s4 + $0x718] sm:$0xff]  ;;  %v7637_v62 = vld [vmem:[%s12709_s4 + $0x550] sm:$0xff] }
 0x236   : > { %2156 = vmatprep.subr.mxu1 %v7600_v27  ;;  %2233 = vmatprep.subr.mxu0 %v7664_v28  ;;  %v7693_v27 = vld [vmem:[%s12709_s4 + $0x710] sm:$0xff]  ;;  %v7636_v28 = vld [vmem:[%s12709_s4 + $0x548] sm:$0xff] }
 0x237   : > { %2157 = vmatpush1.msra.mxu1 %v7599_v42  ;;  %2234 = vmatpush1.msra.mxu0 %v7663_v43  ;;  %v7692_v42 = vld [vmem:[%s12709_s4 + $0x708] sm:$0xff]  ;;  %v7635_v43 = vld [vmem:[%s12709_s4 + $0x540] sm:$0xff] }
 0x238   : > { %2158 = vmatprep.subr.mxu1 %v7598_v44  ;;  %2235 = vmatprep.subr.mxu0 %v7662_v49  ;;  %v7691_v44 = vld [vmem:[%s12709_s4 + $0x700] sm:$0xff]  ;;  %v7634_v49 = vld [vmem:[%s12709_s4 + $0x538] sm:$0xff] }
 0x239   : > { %2159 = vmatpush1.msra.mxu1 %v7597_v50  ;;  %2236 = vmatpush1.msra.mxu0 %v7661_v51  ;;  %v7690_v50 = vld [vmem:[%s12709_s4 + $0x6f8] sm:$0xff]  ;;  %v7633_v51 = vld [vmem:[%s12709_s4 + $0x530] sm:$0xff] }
 0x23a   : > { %2160 = vmatprep.subr.mxu1 %v7596_v52  ;;  %2237 = vmatprep.subr.mxu0 %v7660_v57  ;;  %v7689_v52 = vld [vmem:[%s12709_s4 + $0x6f0] sm:$0xff]  ;;  %v7632_v57 = vld [vmem:[%s12709_s4 + $0x528] sm:$0xff] }
 0x23b   : > { %2161 = vmatpush1.msra.mxu1 %v7595_v17  ;;  %2238 = vmatpush1.msra.mxu0 %v7659_v53  ;;  %v7688_v17 = vld [vmem:[%s12709_s4 + $0x6e8] sm:$0xff]  ;;  %v7631_v53 = vld [vmem:[%s12709_s4 + $0x520] sm:$0xff] }
 0x23c   : > { %2162 = vmatprep.subr.mxu1 %v7594_v54  ;;  %2239 = vmatprep.subr.mxu0 %v7658_v55  ;;  %v7687_v54 = vld [vmem:[%s12709_s4 + $0x6e0] sm:$0xff]  ;;  %v7630_v55 = vld [vmem:[%s12709_s4 + $0x518] sm:$0xff] }
 0x23d   : > { %2163 = vmatpush1.msra.mxu1 %v7593_v56  ;;  %2240 = vmatpush1.msra.mxu0 %v7657_v58  ;;  %v7686_v56 = vld [vmem:[%s12709_s4 + $0x6d8] sm:$0xff]  ;;  %v7629_v58 = vld [vmem:[%s12709_s4 + $0x510] sm:$0xff] }
 0x23e   : > { %2164 = vmatprep.subr.mxu1 %v7592_v30  ;;  %2241 = vmatprep.subr.mxu0 %v7656_v8  ;;  %v7685_v30 = vld [vmem:[%s12709_s4 + $0x6d0] sm:$0xff]  ;;  %v7628_v8 = vld [vmem:[%s12709_s4 + $0x508] sm:$0xff] }
 0x23f   : > { %2165 = vmatpush1.msra.mxu1 %v7591_v60  ;;  %2242 = vmatpush1.msra.mxu0 %v7655_v11  ;;  %v7684_v60 = vld [vmem:[%s12709_s4 + $0x6c8] sm:$0xff]  ;;  %v7627_v11 = vld [vmem:[%s12709_s4 + $0x500] sm:$0xff] }
 0x240   : > { %2166 = vmatprep.subr.mxu1 %v7590_v4  ;;  %2243 = vmatprep.subr.mxu0 %v7654_v5  ;;  %v7683_v4 = vld [vmem:[%s12709_s4 + $0x6c0] sm:$0xff]  ;;  %v7626_v5 = vld [vmem:[%s12709_s4 + $0x4f8] sm:$0xff] }
 0x241   : > { %2167 = vmatpush1.msra.mxu1 %v7589_v9  ;;  %2244 = vmatpush1.msra.mxu0 %v7653_v10  ;;  %v7625_v9 = vld [vmem:[%s12709_s4 + $0x4f0] sm:$0xff]  ;;  %v7624_v10 = vld [vmem:[%s12709_s4 + $0x4e8] sm:$0xff] }
 0x242   : > { %2168 = vmatprep.subr.mxu1 %v7588_v12  ;;  %2245 = vmatprep.subr.mxu0 %v7652_v16  ;;  %v7623_v12 = vld [vmem:[%s12709_s4 + $0x4e0] sm:$0xff]  ;;  %v7622_v16 = vld [vmem:[%s12709_s4 + $0x4d8] sm:$0xff] }
 0x243   : > { %2169 = vmatpush1.msra.mxu1 %v7587_v6  ;;  %2246 = vmatpush1.msra.mxu0 %v7651_v48  ;;  %v7621_v6 = vld [vmem:[%s12709_s4 + $0x4d0] sm:$0xff] }
 0x244   : > { %2170 = vmatprep.subr.mxu1 %v7650_v14  ;;  %2255 = vmatprep.subr.mxu0 %v7706_v19  ;;  %v8786_v48 = vld [vmem:[%s12710_s5 + $0x2c0] ss:$16 sps:$4 sm:$0xff]   ;;  %v8789_v14 = vld [vmem:[%s12710_s5 + $0x2c8] ss:$16 sps:$4 sm:$0xff]  }
 0x245   : > { %2171 = vmatpush2.msra.mxu1 %v7649_v2  ;;  %2256 = vmatpush2.msra.mxu0 %v7705_v3  ;;  %v8792_v19 = vld [vmem:[%s12710_s5 + $0x2a0] ss:$16 sps:$4 sm:$0xff]   ;;  %v8795_v2 = vld [vmem:[%s12710_s5 + $0x2a8] ss:$16 sps:$4 sm:$0xff]   ;;  %v8800_v3 = vld [vmem:[%s12710_s5 + $0x284] ss:$16 sps:$4 sm:$0xff]  }
 0x246   : > { %2172 = vmatprep.subr.mxu1 %v7648_v33  ;;  %2257 = vmatprep.subr.mxu0 %v7704_v31  ;;  %v8803_v33 = vld [vmem:[%s12710_s5 + $0x28c] ss:$16 sps:$4 sm:$0xff]   ;;  %v8798_v31 = vld [vmem:[%s12710_s5 + $0x280] ss:$16 sps:$4 sm:$0xff]  }
 0x247   : > { %2173 = vmatpush2.msra.mxu1 %v7647_v1  ;;  %2258 = vmatpush2.msra.mxu0 %v7703_v20  ;;  %v8801_v1 = vld [vmem:[%s12710_s5 + $0x288] ss:$16 sps:$4 sm:$0xff]   ;;  %v8806_v20 = vld [vmem:[%s12710_s5 + $0x264] ss:$16 sps:$4 sm:$0xff]  }
 0x248   : > { %2174 = vmatprep.subr.mxu1 %v7646_v21  ;;  %2259 = vmatprep.subr.mxu0 %v7702_v61  ;;  %v8809_v21 = vld [vmem:[%s12710_s5 + $0x26c] ss:$16 sps:$4 sm:$0xff]   ;;  %v8804_v61 = vld [vmem:[%s12710_s5 + $0x260] ss:$16 sps:$4 sm:$0xff]  }
 0x249   : > { %2175 = vmatpush2.msra.mxu1 %v7645_v63  ;;  %2260 = vmatpush2.msra.mxu0 %v7701_v0  ;;  %v8807_v63 = vld [vmem:[%s12710_s5 + $0x268] ss:$16 sps:$4 sm:$0xff]   ;;  %v8812_v0 = vld [vmem:[%s12710_s5 + $0x244] ss:$16 sps:$4 sm:$0xff]  }
 0x24a   : > { %2176 = vmatprep.subr.mxu1 %v7644_v22  ;;  %2261 = vmatprep.subr.mxu0 %v7700_v34  ;;  %v8815_v22 = vld [vmem:[%s12710_s5 + $0x24c] ss:$16 sps:$4 sm:$0xff]   ;;  %v8810_v34 = vld [vmem:[%s12710_s5 + $0x240] ss:$16 sps:$4 sm:$0xff]  }
 0x24b   : > { %2177 = vmatpush2.msra.mxu1 %v7643_v35  ;;  %2262 = vmatpush2.msra.mxu0 %v7699_v36  ;;  %v8813_v35 = vld [vmem:[%s12710_s5 + $0x248] ss:$16 sps:$4 sm:$0xff]   ;;  %v8818_v36 = vld [vmem:[%s12710_s5 + $0x224] ss:$16 sps:$4 sm:$0xff]  }
 0x24c   : > { %2178 = vmatprep.subr.mxu1 %v7642_v23  ;;  %2263 = vmatprep.subr.mxu0 %v7698_v37  ;;  %v8821_v23 = vld [vmem:[%s12710_s5 + $0x22c] ss:$16 sps:$4 sm:$0xff]   ;;  %v8816_v37 = vld [vmem:[%s12710_s5 + $0x220] ss:$16 sps:$4 sm:$0xff]  }
 0x24d   : > { %2179 = vmatpush2.msra.mxu1 %v7641_v38  ;;  %2264 = vmatpush2.msra.mxu0 %v7697_v24  ;;  %v8819_v38 = vld [vmem:[%s12710_s5 + $0x228] ss:$16 sps:$4 sm:$0xff]   ;;  %v8824_v24 = vld [vmem:[%s12710_s5 + $0x204] ss:$16 sps:$4 sm:$0xff]  }
 0x24e   : > { %2180 = vmatprep.subr.mxu1 %v7640_v39  ;;  %2265 = vmatprep.subr.mxu0 %v7696_v25  ;;  %v8827_v39 = vld [vmem:[%s12710_s5 + $0x20c] ss:$16 sps:$4 sm:$0xff]   ;;  %v8822_v25 = vld [vmem:[%s12710_s5 + $0x200] ss:$16 sps:$4 sm:$0xff]  }
 0x24f   : > { %2181 = vmatpush2.msra.mxu1 %v7639_v26  ;;  %2266 = vmatpush2.msra.mxu0 %v7695_v29  ;;  %v8825_v26 = vld [vmem:[%s12710_s5 + $0x208] ss:$16 sps:$4 sm:$0xff]   ;;  %v8830_v29 = vld [vmem:[%s12710_s5 + $0x1e4] ss:$16 sps:$4 sm:$0xff]  }
 0x250   : > { %2182 = vmatprep.subr.mxu1 %v7638_v13  ;;  %2267 = vmatprep.subr.mxu0 %v7694_v40  ;;  %v8833_v13 = vld [vmem:[%s12710_s5 + $0x1ec] ss:$16 sps:$4 sm:$0xff]   ;;  %v8828_v40 = vld [vmem:[%s12710_s5 + $0x1e0] ss:$16 sps:$4 sm:$0xff]  }
 0x251   : > { %2183 = vmatpush2.msra.mxu1 %v7637_v62  ;;  %2268 = vmatpush2.msra.mxu0 %v7693_v27  ;;  %v8831_v62 = vld [vmem:[%s12710_s5 + $0x1e8] ss:$16 sps:$4 sm:$0xff]   ;;  %v8836_v27 = vld [vmem:[%s12710_s5 + $0x3a4] ss:$16 sps:$4 sm:$0xff]  }
 0x252   : > { %2184 = vmatprep.subr.mxu1 %v7636_v28  ;;  %2269 = vmatprep.subr.mxu0 %v7692_v42  ;;  %v8839_v28 = vld [vmem:[%s12710_s5 + $0x3ac] ss:$16 sps:$4 sm:$0xff]   ;;  %v8834_v42 = vld [vmem:[%s12710_s5 + $0x3a0] ss:$16 sps:$4 sm:$0xff]  }
 0x253   : > { %2185 = vmatpush2.msra.mxu1 %v7635_v43  ;;  %2270 = vmatpush2.msra.mxu0 %v7691_v44  ;;  %v8837_v43 = vld [vmem:[%s12710_s5 + $0x3a8] ss:$16 sps:$4 sm:$0xff]   ;;  %v8842_v44 = vld [vmem:[%s12710_s5 + $0x384] ss:$16 sps:$4 sm:$0xff]  }
 0x254   : > { %2186 = vmatprep.subr.mxu1 %v7634_v49  ;;  %2271 = vmatprep.subr.mxu0 %v7690_v50  ;;  %v8845_v49 = vld [vmem:[%s12710_s5 + $0x38c] ss:$16 sps:$4 sm:$0xff]   ;;  %v8840_v50 = vld [vmem:[%s12710_s5 + $0x380] ss:$16 sps:$4 sm:$0xff]  }
 0x255   : > { %2187 = vmatpush2.msra.mxu1 %v7633_v51  ;;  %2272 = vmatpush2.msra.mxu0 %v7689_v52  ;;  %v8843_v51 = vld [vmem:[%s12710_s5 + $0x388] ss:$16 sps:$4 sm:$0xff]   ;;  %v8848_v52 = vld [vmem:[%s12710_s5 + $0x364] ss:$16 sps:$4 sm:$0xff]  }
 0x256   : > { %2188 = vmatprep.subr.mxu1 %v7632_v57  ;;  %2273 = vmatprep.subr.mxu0 %v7688_v17  ;;  %v8851_v57 = vld [vmem:[%s12710_s5 + $0x36c] ss:$16 sps:$4 sm:$0xff]   ;;  %v8846_v17 = vld [vmem:[%s12710_s5 + $0x360] ss:$16 sps:$4 sm:$0xff]  }
 0x257   : > { %2189 = vmatpush2.msra.mxu1 %v7631_v53  ;;  %2274 = vmatpush2.msra.mxu0 %v7687_v54  ;;  %v8849_v53 = vld [vmem:[%s12710_s5 + $0x368] ss:$16 sps:$4 sm:$0xff]   ;;  %v8854_v54 = vld [vmem:[%s12710_s5 + $0x344] ss:$16 sps:$4 sm:$0xff]  }
 0x258   : > { %2190 = vmatprep.subr.mxu1 %v7630_v55  ;;  %2275 = vmatprep.subr.mxu0 %v7686_v56  ;;  %v8857_v55 = vld [vmem:[%s12710_s5 + $0x34c] ss:$16 sps:$4 sm:$0xff]   ;;  %v8852_v56 = vld [vmem:[%s12710_s5 + $0x340] ss:$16 sps:$4 sm:$0xff]  }
 0x259   : > { %2191 = vmatpush2.msra.mxu1 %v7629_v58  ;;  %2276 = vmatpush2.msra.mxu0 %v7685_v30  ;;  %v8855_v58 = vld [vmem:[%s12710_s5 + $0x348] ss:$16 sps:$4 sm:$0xff]   ;;  %v8860_v30 = vld [vmem:[%s12710_s5 + $0x324] ss:$16 sps:$4 sm:$0xff]  }
 0x25a   : > { %2192 = vmatprep.subr.mxu1 %v7628_v8  ;;  %2277 = vmatprep.subr.mxu0 %v7684_v60  ;;  %v8863_v8 = vld [vmem:[%s12710_s5 + $0x32c] ss:$16 sps:$4 sm:$0xff]   ;;  %v8858_v60 = vld [vmem:[%s12710_s5 + $0x320] ss:$16 sps:$4 sm:$0xff]  }
 0x25b   : > { %2193 = vmatpush2.msra.mxu1 %v7627_v11  ;;  %2278 = vmatpush2.msra.mxu0 %v7683_v4  ;;  %v8861_v11 = vld [vmem:[%s12710_s5 + $0x328] ss:$16 sps:$4 sm:$0xff]   ;;  %v8866_v4 = vld [vmem:[%s12710_s5 + $0x304] ss:$16 sps:$4 sm:$0xff]  }
 0x25c   : > { %2194 = vmatprep.subr.mxu1 %v7626_v5  ;;  %2280 = vmatmul.mubr.f32.vlgmr.msra.gmra.mxu0 %v10557_v59  ;;  %v7620_v59 = vld [vmem:[%s12709_s4 + $0x4c8] sm:$0xff] }
 0x25d   : > { %2195 = vmatpush2.msra.mxu1 %v7625_v9  ;;  %7708 = vmatprep.mubr.msk.f32.mxu0 %vm1856_vm6, %v10582_v7  ;;  %v7619_v7 = vld [vmem:[%s12709_s4 + $0x4c0] sm:$0xff]  ;;  %v8869_v5 = vld [vmem:[%s12710_s5 + $0x30c] ss:$16 sps:$4 sm:$0xff]  }
 0x25e   : > { %2196 = vmatprep.subr.mxu1 %v7624_v10  ;;  %v8864_v9 = vld [vmem:[%s12710_s5 + $0x300] ss:$16 sps:$4 sm:$0xff]   ;;  %v8867_v10 = vld [vmem:[%s12710_s5 + $0x308] ss:$16 sps:$4 sm:$0xff]  }
 0x25f   : > { %2197 = vmatpush2.msra.mxu1 %v7623_v12  ;;  %v8872_v12 = vld [vmem:[%s12710_s5 + $0x2e4] ss:$16 sps:$4 sm:$0xff]  }
 0x260   : > { %2198 = vmatprep.subr.mxu1 %v7622_v16  ;;  %2286 = vmatmul.mubr.f32.gmra.mxu0 %v10592_v18  ;;  %v8788_v18 = vld [vmem:[%s12710_s5 + $0x2c4] ss:$16 sps:$4 sm:$0xff]   ;;  %v8870_v16 = vld [vmem:[%s12710_s5 + $0x2e0] ss:$16 sps:$4 sm:$0xff]  }
 0x261   : > { %2199 = vmatpush2.msra.mxu1 %v7621_v6  ;;  %2740 = vmatprep.subr.bf16.mxu0 %v8788_v18  ;;  %v8873_v6 = vld [vmem:[%s12710_s5 + $0x2e8] ss:$16 sps:$4 sm:$0xff]  }
 0x262   : > { %2200 = vmatprep.subr.mxu1 %v7620_v59  ;;  %2741 = vmatpush1.bf16.msra.mxu0 %v8786_v48  ;;  %v8875_v59 = vld [vmem:[%s12710_s5 + $0x2ec] ss:$16 sps:$4 sm:$0xff]  }
 0x263   : > { %2201 = vmatpush2.msra.mxu1 %v7619_v7  ;;  %v8878_v7 = vld [vmem:[%s12710_s5 + $0xe4] ss:$16 sps:$4 sm:$0xff]   ;;  %v8881_v48 = vld [vmem:[%s12710_s5 + $0xec] ss:$16 sps:$4 sm:$0xff]  }
 0x264   : > { %2203 = vmatmul.mubr.f32.vlgmr.msra.gmra.mxu1 %v10555_v32  ;;  %v8791_v32 = vld [vmem:[%s12710_s5 + $0x2cc] ss:$16 sps:$4 sm:$0xff]  }
 0x265   : > { %2208 = vmatprep.mubr.f32.mxu1 %v10580_v47  ;;  %v8794_v47 = vld [vmem:[%s12710_s5 + $0x2a4] ss:$16 sps:$4 sm:$0xff]   ;;  %2781 = vmatprep.subr.bf16.mxu1 %v8791_v32 }
 0x266   : > { %2782 = vmatpush1.bf16.msra.mxu1 %v8789_v14  ;;  %2742 = vmatprep.subr.bf16.mxu0 %v8794_v47 }
 0x267   : > { %2743 = vmatpush1.bf16.msra.mxu0 %v8792_v19 }
 0x268   : > { %2209 = vmatmul.mubr.f32.gmra.mxu1 %v10590_v15  ;;  %v8797_v15 = vld [vmem:[%s12710_s5 + $0x2ac] ss:$16 sps:$4 sm:$0xff]   ;;  %2744 = vmatprep.subr.bf16.mxu0 %v8800_v3 }
 0x269   : > { %2783 = vmatprep.subr.bf16.mxu1 %v8797_v15 }
 0x26a   : > { %2784 = vmatpush1.bf16.msra.mxu1 %v8795_v2 }
 0x26b   : > { %2785 = vmatprep.subr.bf16.mxu1 %v8803_v33  ;;  %2745 = vmatpush1.bf16.msra.mxu0 %v8798_v31 }
 0x26c   : > { %2746 = vmatprep.subr.bf16.mxu0 %v8806_v20 }
 0x26e   : > { %2786 = vmatpush1.bf16.msra.mxu1 %v8801_v1 }
 0x26f   : > { %2787 = vmatprep.subr.bf16.mxu1 %v8809_v21  ;;  %2747 = vmatpush1.bf16.msra.mxu0 %v8804_v61 }
 0x270   : > { %2748 = vmatprep.subr.bf16.mxu0 %v8812_v0 }
 0x272   : > { %2788 = vmatpush1.bf16.msra.mxu1 %v8807_v63 }
 0x273   : > { %2789 = vmatprep.subr.bf16.mxu1 %v8815_v22  ;;  %2749 = vmatpush1.bf16.msra.mxu0 %v8810_v34 }
 0x274   : > { %2750 = vmatprep.subr.bf16.mxu0 %v8818_v36 }
 0x276   : > { %2790 = vmatpush1.bf16.msra.mxu1 %v8813_v35 }
 0x277   : > { %2791 = vmatprep.subr.bf16.mxu1 %v8821_v23  ;;  %2751 = vmatpush1.bf16.msra.mxu0 %v8816_v37 }
 0x278   : > { %2752 = vmatprep.subr.bf16.mxu0 %v8824_v24 }
 0x27a   : > { %2792 = vmatpush1.bf16.msra.mxu1 %v8819_v38 }
 0x27b   : > { %2793 = vmatprep.subr.bf16.mxu1 %v8827_v39  ;;  %2753 = vmatpush1.bf16.msra.mxu0 %v8822_v25 }
 0x27c   : > { %2754 = vmatprep.subr.bf16.mxu0 %v8830_v29 }
 0x27e   : > { %2794 = vmatpush1.bf16.msra.mxu1 %v8825_v26 }
 0x27f   : > { %2795 = vmatprep.subr.bf16.mxu1 %v8833_v13  ;;  %2755 = vmatpush1.bf16.msra.mxu0 %v8828_v40 }
 0x280   : > { %2758 = vmatprep.subr.bf16.mxu0 %v8836_v27 }
 0x282   : > { %2796 = vmatpush1.bf16.msra.mxu1 %v8831_v62 }
 0x283   : > { %2799 = vmatprep.subr.bf16.mxu1 %v8839_v28  ;;  %2759 = vmatpush2.bf16.msra.mxu0 %v8834_v42 }
 0x284   : > { %2760 = vmatprep.subr.bf16.mxu0 %v8842_v44 }
 0x286   : > { %2800 = vmatpush2.bf16.msra.mxu1 %v8837_v43 }
 0x287   : > { %2801 = vmatprep.subr.bf16.mxu1 %v8845_v49  ;;  %2761 = vmatpush2.bf16.msra.mxu0 %v8840_v50 }
 0x288   : > { %2762 = vmatprep.subr.bf16.mxu0 %v8848_v52 }
 0x28a   : > { %2802 = vmatpush2.bf16.msra.mxu1 %v8843_v51 }
 0x28b   : > { %2803 = vmatprep.subr.bf16.mxu1 %v8851_v57  ;;  %2763 = vmatpush2.bf16.msra.mxu0 %v8846_v17 }
 0x28c   : > { %2764 = vmatprep.subr.bf16.mxu0 %v8854_v54  ;;  %v8879_v54 = vld [vmem:[%s12710_s5 + $0xe8] ss:$16 sps:$4 sm:$0xff]  }
 0x28e   : > { %2804 = vmatpush2.bf16.msra.mxu1 %v8849_v53  ;;  %v8876_v53 = vld [vmem:[%s12710_s5 + $0xe0] ss:$16 sps:$4 sm:$0xff]  }
 0x28f   : > { %2805 = vmatprep.subr.bf16.mxu1 %v8857_v55  ;;  %2765 = vmatpush2.bf16.msra.mxu0 %v8852_v56 }
 0x290   : > { %2766 = vmatprep.subr.bf16.mxu0 %v8860_v30  ;;  %v8887_v30 = vld [vmem:[%s12710_s5 + $0xcc] ss:$16 sps:$4 sm:$0xff]  }
 0x292   : > { %2806 = vmatpush2.bf16.msra.mxu1 %v8855_v58  ;;  %v8884_v58 = vld [vmem:[%s12710_s5 + $0xc4] ss:$16 sps:$4 sm:$0xff]  }
 0x293   : > { %2807 = vmatprep.subr.bf16.mxu1 %v8863_v8  ;;  %2767 = vmatpush2.bf16.msra.mxu0 %v8858_v60  ;;  %v8882_v60 = vld [vmem:[%s12710_s5 + $0xc0] ss:$16 sps:$4 sm:$0xff]  }
 0x294   : > { %2768 = vmatprep.subr.bf16.mxu0 %v8866_v4  ;;  %v8890_v4 = vld [vmem:[%s12710_s5 + $0xa4] ss:$16 sps:$4 sm:$0xff]  }
 0x296   : > { %2808 = vmatpush2.bf16.msra.mxu1 %v8861_v11  ;;  %v8885_v11 = vld [vmem:[%s12710_s5 + $0xc8] ss:$16 sps:$4 sm:$0xff]  }
 0x297   : > { %2809 = vmatprep.subr.bf16.mxu1 %v8869_v5  ;;  %2769 = vmatpush2.bf16.msra.mxu0 %v8864_v9  ;;  %v8893_v5 = vld [vmem:[%s12710_s5 + $0xac] ss:$16 sps:$4 sm:$0xff]   ;;  %v8888_v9 = vld [vmem:[%s12710_s5 + $0xa0] ss:$16 sps:$4 sm:$0xff]  }
 0x298   : > { %2770 = vmatprep.subr.bf16.mxu0 %v8872_v12  ;;  %v8896_v12 = vld [vmem:[%s12710_s5 + $0x84] ss:$16 sps:$4 sm:$0xff]  }
 0x29a   : > { %2810 = vmatpush2.bf16.msra.mxu1 %v8867_v10  ;;  %v8891_v10 = vld [vmem:[%s12710_s5 + $0xa8] ss:$16 sps:$4 sm:$0xff]  }
 0x29b   : > { %2811 = vmatprep.subr.bf16.mxu1 %v8875_v59  ;;  %2771 = vmatpush2.bf16.msra.mxu0 %v8870_v16  ;;  %v8899_v16 = vld [vmem:[%s12710_s5 + $0x8c] ss:$16 sps:$4 sm:$0xff]   ;;  %v8897_v59 = vld [vmem:[%s12710_s5 + $0x88] ss:$16 sps:$4 sm:$0xff]  }
 0x29c   : > { %3125 = vmatprep.subr.bf16.mxu0 %v8878_v7  ;;  %v8902_v7 = vld [vmem:[%s12710_s5 + $0x64] ss:$16 sps:$4 sm:$0xff]  }
 0x29e   : > { %2812 = vmatpush2.bf16.msra.mxu1 %v8873_v6  ;;  %v8894_v6 = vld [vmem:[%s12710_s5 + $0x80] ss:$16 sps:$4 sm:$0xff]  }
 0x29f   : > { %3166 = vmatprep.subr.bf16.mxu1 %v8881_v48  ;;  %v8905_v48 = vld [vmem:[%s12710_s5 + $0x6c] ss:$16 sps:$4 sm:$0xff]  }
 0x2e1   : > { %v1929_v18 = vpop.f32.mrf.mxu0  ;;  %v2006_v32 = vpop.f32.mrf.mxu1 }
 0x2e2   : > { %v2007_v0 = vadd.f32 %v2006_v32, %v1929_v18  ;;  %v8900_v18 = vld [vmem:[%s12710_s5 + $0x60] ss:$16 sps:$4 sm:$0xff]   ;;  %v8908_v32 = vld [vmem:[%s12710_s5 + $0x44] ss:$16 sps:$4 sm:$0xff]  }
 0x2e3   : > { %v1931_v14 = vpop.f32.mrf.mxu0  ;;  %v2008_v15 = vpop.f32.mrf.mxu1 }
 0x2e4   : > { %v2009_v36 = vadd.f32 %v2008_v15, %v1931_v14  ;;  %v8903_v14 = vld [vmem:[%s12710_s5 + $0x68] ss:$16 sps:$4 sm:$0xff]   ;;  %v8906_v15 = vld [vmem:[%s12710_s5 + $0x40] ss:$16 sps:$4 sm:$0xff]  }
 0x2e7   : > { %v1935_v47 = vpop.f32.mrf.mxu0  ;;  %v2012_v2 = vpop.f32.mrf.mxu1 }
 0x2e8   : > { %v2013_v22 = vadd.f32 %v2012_v2, %v1935_v47  ;;  %v8911_v47 = vld [vmem:[%s12710_s5 + $0x4c] ss:$16 sps:$4 sm:$0xff]   ;;  %v8914_v2 = vld [vmem:[%s12710_s5 + $0x24] ss:$16 sps:$4 sm:$0xff]  }
 0x2e9   : > { %v1937_v19 = vpop.f32.mrf.mxu0  ;;  %v2014_v33 = vpop.f32.mrf.mxu1 }
 0x2ea   : > { %v2015_v38 = vadd.f32 %v2014_v33, %v1937_v19  ;;  %v8909_v19 = vld [vmem:[%s12710_s5 + $0x48] ss:$16 sps:$4 sm:$0xff]   ;;  %v8912_v33 = vld [vmem:[%s12710_s5 + $0x20] ss:$16 sps:$4 sm:$0xff]  }
 0x31c   : > { %v2281_v3 = vpop.f32.mrf.mxu0 }
 0x31e   : > { %v2283_v31 = vpop.f32.mrf.mxu0 }
 0x320   : > { %v2287_v20 = vpop.f32.mrf.mxu0 }
 0x322   : > { %v2289_v23 = vpop.f32.mrf.mxu0 }
 0x324   : > { %v2204_v1 = vpop.f32.mrf.mxu1 }
 0x325   : > { %v2282_v61 = vadd.f32 %v2281_v3, %v2204_v1  ;;  %v8917_v3 = vld [vmem:[%s12710_s5 + $0x2c] ss:$16 sps:$4 sm:$0xff]   ;;  %v8920_v1 = vld [vmem:[%s12710_s5 + $0x4] ss:$16 sps:$4 sm:$0xff]  }
 0x326   : > { %v2206_v21 = vpop.f32.mrf.mxu1 }
 0x327   : > { %v2284_v34 = vadd.f32 %v2283_v31, %v2206_v21  ;;  %v11123_v24 = vmax.f32 %v2007_v0, %v2282_v61  ;;  %v8915_v31 = vld [vmem:[%s12710_s5 + $0x28] ss:$16 sps:$4 sm:$0xff]   ;;  %v8918_v21 = vld [vmem:[%s12710_s5] ss:$16 sps:$4 sm:$0xff]   ;;  %v8929_v0 = vld [vmem:[%s12710_s5 + $0x1cc] ss:$16 sps:$4 sm:$0xff]  }
 0x328   : > { %v2210_v63 = vpop.f32.mrf.mxu1  ;;  %v8921_v61 = vld [vmem:[%s12710_s5 + $0x8] ss:$16 sps:$4 sm:$0xff]  }
 0x329   : > { %v2288_v35 = vadd.f32 %v2287_v20, %v2210_v63  ;;  %v2293_v26 = vmax.f32 %v2009_v36, %v2284_v34  ;;  %v8923_v20 = vld [vmem:[%s12710_s5 + $0xc] ss:$16 sps:$4 sm:$0xff]   ;;  %v8926_v63 = vld [vmem:[%s12710_s5 + $0x1c4] ss:$16 sps:$4 sm:$0xff]   ;;  %v8927_v34 = vld [vmem:[%s12710_s5 + $0x1c8] ss:$16 sps:$4 sm:$0xff]  }
 0x32a   : > { %v2212_v37 = vpop.f32.mrf.mxu1  ;;  %v8935_v36 = vld [vmem:[%s12710_s5 + $0x1ac] ss:$16 sps:$4 sm:$0xff]  }
 0x32b   : > { %v2294_v39 = vmax.f32 %v2013_v22, %v2288_v35  ;;  %v2290_v25 = vadd.f32 %v2289_v23, %v2212_v37  ;;  %v2297_v8 = vpack.c.bf16 %v2293_v26, %v2293_v26  ;;  %v8924_v22 = vld [vmem:[%s12710_s5 + $0x1c0] ss:$16 sps:$4 sm:$0xff]   ;;  %v8932_v35 = vld [vmem:[%s12710_s5 + $0x1a4] ss:$16 sps:$4 sm:$0xff]   ;;  %v8933_v37 = vld [vmem:[%s12710_s5 + $0x1a8] ss:$16 sps:$4 sm:$0xff]  }
 0x32c   : > { %v8930_v23 = vld [vmem:[%s12710_s5 + $0x1a0] ss:$16 sps:$4 sm:$0xff]  }
 0x32d   : > { %v11126_v29 = vpack.c.bf16 %v2294_v39, %v11123_v24  ;;  %v2295_v13 = vmax.f32 %v2015_v38, %v2290_v25  ;;  %v8938_v38 = vld [vmem:[%s12710_s5 + $0x184] ss:$16 sps:$4 sm:$0xff]   ;;  %v8941_v39 = vld [vmem:[%s12710_s5 + $0x18c] ss:$16 sps:$4 sm:$0xff]   ;;  %v8936_v25 = vld [vmem:[%s12710_s5 + $0x180] ss:$16 sps:$4 sm:$0xff]  }
 0x32f   : > { %v2422_v40 = vshrl.u32 %v11126_v29, 16  ;;  %v2424_v62 = vshll.u32 %v11126_v29, 16  ;;  %v11130_v27 = vpack.c.bf16 %v2295_v13, %v2293_v26  ;;  %v8939_v26 = vld [vmem:[%s12710_s5 + $0x188] ss:$16 sps:$4 sm:$0xff]   ;;  %v8944_v13 = vld [vmem:[%s12710_s5 + $0x164] ss:$16 sps:$4 sm:$0xff]  }
 0x331   : > { %v2429_v28 = vshrl.u32 %v11130_v27, 16  ;;  %v2431_v42 = vshll.u32 %v11130_v27, 16  ;;  %v2426_v43 = vrot.slane %v2424_v62, 1  ;;  %v3723_v44 = vrot.slane %v2422_v40, 1 }
 0x332   : > { %v3724_v49 = vrot.slane %v2424_v62, 2  ;;  %v8942_v62 = vld [vmem:[%s12710_s5 + $0x160] ss:$16 sps:$4 sm:$0xff]  }
 0x333   : > { %v2433_v50 = vrot.slane %v2431_v42, 1  ;;  %v3726_v51 = vrot.slane %v2429_v28, 1  ;;  %v3727_v52 = vrot.slane %v2431_v42, 2  ;;  %v2427_v56 = vor.u32 %v2426_v43, %v2422_v40  ;;  %v8947_v40 = vld [vmem:[%s12710_s5 + $0x16c] ss:$16 sps:$4 sm:$0xff]  }
 0x334   : > { %v11134_v57 = vor.u32 %v3724_v49, %v3723_v44  ;;  %v8950_v42 = vld [vmem:[%s12710_s5 + $0x144] ss:$16 sps:$4 sm:$0xff]   ;;  %v8953_v43 = vld [vmem:[%s12710_s5 + $0x14c] ss:$16 sps:$4 sm:$0xff]   ;;  %v8948_v44 = vld [vmem:[%s12710_s5 + $0x140] ss:$16 sps:$4 sm:$0xff]  }
 0x335   : > { %v2434_v17 = vor.u32 %v2433_v50, %v2429_v28  ;;  %v11142_v55 = vor.u32 %v3727_v52, %v3726_v51  ;;  %v8945_v28 = vld [vmem:[%s12710_s5 + $0x168] ss:$16 sps:$4 sm:$0xff]   ;;  %v8956_v50 = vld [vmem:[%s12710_s5 + $0x124] ss:$16 sps:$4 sm:$0xff]   ;;  %v8959_v51 = vld [vmem:[%s12710_s5 + $0x12c] ss:$16 sps:$4 sm:$0xff]  }
 0x336   : > { %v8951_v49 = vld [vmem:[%s12710_s5 + $0x148] ss:$16 sps:$4 sm:$0xff]   ;;  %v8954_v52 = vld [vmem:[%s12710_s5 + $0x120] ss:$16 sps:$4 sm:$0xff]  }
 0x337   : > { %7829 = vmatprep.mubr.msk.bf16.mxu0 %vm2736_vm7, %v2434_v17  ;;  %7830 = vmatprep.mubr.msk.bf16.mxu1 %vm2736_vm7, %v2434_v17  ;;  %v8957_v17 = vld [vmem:[%s12710_s5 + $0x128] ss:$16 sps:$4 sm:$0xff]  }
 0x338   : > { %2773 = vmatmul.mubr.bf16.vlgmr.msra.gmra.mxu0 %v2427_v56  ;;  %2814 = vmatmul.mubr.bf16.vlgmr.msra.gmra.mxu1 %v2427_v56  ;;  %v8960_v56 = vld [vmem:[%s12710_s5 + $0x100] ss:$16 sps:$4 sm:$0xff]  }
 0x339   : > { %3126 = vmatpush1.bf16.msra.mxu0 %v8876_v53  ;;  %3167 = vmatpush1.bf16.msra.mxu1 %v8879_v54  ;;  %v8962_v53 = vld [vmem:[%s12710_s5 + $0x104] ss:$16 sps:$4 sm:$0xff]   ;;  %v8965_v54 = vld [vmem:[%s12710_s5 + $0x10c] ss:$16 sps:$4 sm:$0xff]  }
 0x33a   : > { %7891 = vmatprep.mubr.msk.bf16.mxu0 %vm2736_vm7, %v2297_v8  ;;  %7892 = vmatprep.mubr.msk.bf16.mxu1 %vm2736_vm7, %v2297_v8  ;;  %v8971_v8 = vld [vmem:[%s12710_s5 + $0x4ac] ss:$16 sps:$4 sm:$0xff]  }
 0x33b   : > { %3127 = vmatprep.subr.bf16.mxu0 %v8884_v58  ;;  %3168 = vmatprep.subr.bf16.mxu1 %v8887_v30  ;;  %v8963_v58 = vld [vmem:[%s12710_s5 + $0x108] ss:$16 sps:$4 sm:$0xff]   ;;  %v8968_v30 = vld [vmem:[%s12710_s5 + $0x4a4] ss:$16 sps:$4 sm:$0xff]  }
 0x33d   : > { %3128 = vmatpush1.bf16.msra.mxu0 %v8882_v60  ;;  %3169 = vmatpush1.bf16.msra.mxu1 %v8885_v11  ;;  %v8966_v60 = vld [vmem:[%s12710_s5 + $0x4a0] ss:$16 sps:$4 sm:$0xff]   ;;  %v2296_v11 = vpack.c.bf16 %v11123_v24, %v11123_v24 }
 0x33e   : > { %3129 = vmatprep.subr.bf16.mxu0 %v8890_v4  ;;  %3170 = vmatprep.subr.bf16.mxu1 %v8893_v5  ;;  %v8969_v4 = vld [vmem:[%s12710_s5 + $0x4a8] ss:$16 sps:$4 sm:$0xff]   ;;  %v3271_v5 = vrot.slane %v11130_v27, 1  ;;  %v8972_v24 = vld [vmem:[%s12710_s5 + $0x480] ss:$16 sps:$4 sm:$0xff]  }
 0x341   : > { %3130 = vmatpush1.bf16.msra.mxu0 %v8888_v9  ;;  %3171 = vmatpush1.bf16.msra.mxu1 %v8891_v10  ;;  %v8974_v9 = vld [vmem:[%s12710_s5 + $0x484] ss:$16 sps:$4 sm:$0xff]   ;;  %v8977_v10 = vld [vmem:[%s12710_s5 + $0x48c] ss:$16 sps:$4 sm:$0xff]  }
 0x342   : > { %3131 = vmatprep.subr.bf16.mxu0 %v8896_v12  ;;  %3172 = vmatprep.subr.bf16.mxu1 %v8899_v16  ;;  %v8975_v12 = vld [vmem:[%s12710_s5 + $0x488] ss:$16 sps:$4 sm:$0xff]   ;;  %v8980_v16 = vld [vmem:[%s12710_s5 + $0x464] ss:$16 sps:$4 sm:$0xff]  }
 0x345   : > { %3132 = vmatpush1.bf16.msra.mxu0 %v8894_v6  ;;  %3173 = vmatpush1.bf16.msra.mxu1 %v8897_v59  ;;  %v8983_v6 = vld [vmem:[%s12710_s5 + $0x46c] ss:$16 sps:$4 sm:$0xff]   ;;  %v8978_v59 = vld [vmem:[%s12710_s5 + $0x460] ss:$16 sps:$4 sm:$0xff]  }
 0x346   : > { %3133 = vmatprep.subr.bf16.mxu0 %v8902_v7  ;;  %3174 = vmatprep.subr.bf16.mxu1 %v8905_v48  ;;  %v8981_v7 = vld [vmem:[%s12710_s5 + $0x468] ss:$16 sps:$4 sm:$0xff]   ;;  %v8986_v48 = vld [vmem:[%s12710_s5 + $0x444] ss:$16 sps:$4 sm:$0xff]  }
 0x349   : > { %3134 = vmatpush1.bf16.msra.mxu0 %v8900_v18  ;;  %3175 = vmatpush1.bf16.msra.mxu1 %v8903_v14  ;;  %v8989_v18 = vld [vmem:[%s12710_s5 + $0x44c] ss:$16 sps:$4 sm:$0xff]   ;;  %v8984_v14 = vld [vmem:[%s12710_s5 + $0x440] ss:$16 sps:$4 sm:$0xff]  }
 0x34a   : > { %3135 = vmatprep.subr.bf16.mxu0 %v8908_v32  ;;  %3176 = vmatprep.subr.bf16.mxu1 %v8911_v47  ;;  %v8987_v32 = vld [vmem:[%s12710_s5 + $0x448] ss:$16 sps:$4 sm:$0xff]   ;;  %v8992_v47 = vld [vmem:[%s12710_s5 + $0x424] ss:$16 sps:$4 sm:$0xff]  }
 0x34d   : > { %3136 = vmatpush1.bf16.msra.mxu0 %v8906_v15  ;;  %3177 = vmatpush1.bf16.msra.mxu1 %v8909_v19  ;;  %v8995_v15 = vld [vmem:[%s12710_s5 + $0x42c] ss:$16 sps:$4 sm:$0xff]   ;;  %v8990_v19 = vld [vmem:[%s12710_s5 + $0x420] ss:$16 sps:$4 sm:$0xff]  }
 0x34e   : > { %3137 = vmatprep.subr.bf16.mxu0 %v8914_v2  ;;  %3178 = vmatprep.subr.bf16.mxu1 %v8917_v3  ;;  %v8993_v2 = vld [vmem:[%s12710_s5 + $0x428] ss:$16 sps:$4 sm:$0xff]   ;;  %v8998_v3 = vld [vmem:[%s12710_s5 + $0x404] ss:$16 sps:$4 sm:$0xff]  }
 0x351   : > { %3138 = vmatpush1.bf16.msra.mxu0 %v8912_v33  ;;  %3179 = vmatpush1.bf16.msra.mxu1 %v8915_v31  ;;  %v9001_v33 = vld [vmem:[%s12710_s5 + $0x40c] ss:$16 sps:$4 sm:$0xff]   ;;  %v8996_v31 = vld [vmem:[%s12710_s5 + $0x400] ss:$16 sps:$4 sm:$0xff]  }
 0x352   : > { %3139 = vmatprep.subr.bf16.mxu0 %v8920_v1  ;;  %3180 = vmatprep.subr.bf16.mxu1 %v8923_v20  ;;  %v8999_v1 = vld [vmem:[%s12710_s5 + $0x408] ss:$16 sps:$4 sm:$0xff]   ;;  %v9004_v20 = vld [vmem:[%s12710_s5 + $0x3e4] ss:$16 sps:$4 sm:$0xff]  }
 0x355   : > { %3140 = vmatpush1.bf16.msra.mxu0 %v8918_v21  ;;  %3181 = vmatpush1.bf16.msra.mxu1 %v8921_v61  ;;  %v9007_v21 = vld [vmem:[%s12710_s5 + $0x3ec] ss:$16 sps:$4 sm:$0xff]   ;;  %v9002_v61 = vld [vmem:[%s12710_s5 + $0x3e0] ss:$16 sps:$4 sm:$0xff]  }
 0x356   : > { %3143 = vmatprep.subr.bf16.mxu0 %v8926_v63  ;;  %3184 = vmatprep.subr.bf16.mxu1 %v8929_v0  ;;  %v9005_v63 = vld [vmem:[%s12710_s5 + $0x3e8] ss:$16 sps:$4 sm:$0xff]   ;;  %v9010_v0 = vld [vmem:[%s12710_s5 + $0x3c4] ss:$16 sps:$4 sm:$0xff]  }
 0x359   : > { %3144 = vmatpush2.bf16.msra.mxu0 %v8924_v22  ;;  %3185 = vmatpush2.bf16.msra.mxu1 %v8927_v34  ;;  %v9013_v22 = vld [vmem:[%s12710_s5 + $0x3cc] ss:$16 sps:$4 sm:$0xff]   ;;  %v9008_v34 = vld [vmem:[%s12710_s5 + $0x3c0] ss:$16 sps:$4 sm:$0xff]  }
 0x35a   : > { %3145 = vmatprep.subr.bf16.mxu0 %v8932_v35  ;;  %3186 = vmatprep.subr.bf16.mxu1 %v8935_v36  ;;  %v9011_v35 = vld [vmem:[%s12710_s5 + $0x3c8] ss:$16 sps:$4 sm:$0xff]   ;;  %v9016_v36 = vld [vmem:[%s12710_s5 + $0x584] ss:$16 sps:$4 sm:$0xff]  }
 0x35d   : > { %3146 = vmatpush2.bf16.msra.mxu0 %v8930_v23  ;;  %3187 = vmatpush2.bf16.msra.mxu1 %v8933_v37  ;;  %v9019_v23 = vld [vmem:[%s12710_s5 + $0x58c] ss:$16 sps:$4 sm:$0xff]   ;;  %v9014_v37 = vld [vmem:[%s12710_s5 + $0x580] ss:$16 sps:$4 sm:$0xff]  }
 0x35e   : > { %3147 = vmatprep.subr.bf16.mxu0 %v8938_v38  ;;  %3188 = vmatprep.subr.bf16.mxu1 %v8941_v39  ;;  %v9017_v38 = vld [vmem:[%s12710_s5 + $0x588] ss:$16 sps:$4 sm:$0xff]   ;;  %v9022_v39 = vld [vmem:[%s12710_s5 + $0x564] ss:$16 sps:$4 sm:$0xff]  }
 0x361   : > { %3148 = vmatpush2.bf16.msra.mxu0 %v8936_v25  ;;  %3189 = vmatpush2.bf16.msra.mxu1 %v8939_v26  ;;  %v9025_v25 = vld [vmem:[%s12710_s5 + $0x56c] ss:$16 sps:$4 sm:$0xff]   ;;  %v9020_v26 = vld [vmem:[%s12710_s5 + $0x560] ss:$16 sps:$4 sm:$0xff]  }
 0x362   : > { %3149 = vmatprep.subr.bf16.mxu0 %v8944_v13  ;;  %3190 = vmatprep.subr.bf16.mxu1 %v8947_v40  ;;  %v9023_v13 = vld [vmem:[%s12710_s5 + $0x568] ss:$16 sps:$4 sm:$0xff]   ;;  %v9028_v40 = vld [vmem:[%s12710_s5 + $0x544] ss:$16 sps:$4 sm:$0xff]  }
 0x365   : > { %3150 = vmatpush2.bf16.msra.mxu0 %v8942_v62  ;;  %3191 = vmatpush2.bf16.msra.mxu1 %v8945_v28  ;;  %v9031_v62 = vld [vmem:[%s12710_s5 + $0x54c] ss:$16 sps:$4 sm:$0xff]   ;;  %v9026_v28 = vld [vmem:[%s12710_s5 + $0x540] ss:$16 sps:$4 sm:$0xff]  }
 0x366   : > { %3151 = vmatprep.subr.bf16.mxu0 %v8950_v42  ;;  %3192 = vmatprep.subr.bf16.mxu1 %v8953_v43  ;;  %v9029_v42 = vld [vmem:[%s12710_s5 + $0x548] ss:$16 sps:$4 sm:$0xff]   ;;  %v9034_v43 = vld [vmem:[%s12710_s5 + $0x524] ss:$16 sps:$4 sm:$0xff]  }
 0x369   : > { %3152 = vmatpush2.bf16.msra.mxu0 %v8948_v44  ;;  %3193 = vmatpush2.bf16.msra.mxu1 %v8951_v49  ;;  %v9037_v44 = vld [vmem:[%s12710_s5 + $0x52c] ss:$16 sps:$4 sm:$0xff]   ;;  %v9032_v49 = vld [vmem:[%s12710_s5 + $0x520] ss:$16 sps:$4 sm:$0xff]  }
 0x36a   : > { %3153 = vmatprep.subr.bf16.mxu0 %v8956_v50  ;;  %3194 = vmatprep.subr.bf16.mxu1 %v8959_v51  ;;  %v9035_v50 = vld [vmem:[%s12710_s5 + $0x528] ss:$16 sps:$4 sm:$0xff]   ;;  %v9040_v51 = vld [vmem:[%s12710_s5 + $0x504] ss:$16 sps:$4 sm:$0xff]  }
 0x36d   : > { %3154 = vmatpush2.bf16.msra.mxu0 %v8954_v52  ;;  %3195 = vmatpush2.bf16.msra.mxu1 %v8957_v17  ;;  %v9043_v52 = vld [vmem:[%s12710_s5 + $0x50c] ss:$16 sps:$4 sm:$0xff]   ;;  %v9038_v17 = vld [vmem:[%s12710_s5 + $0x500] ss:$16 sps:$4 sm:$0xff]  }
 0x36e   : > { %3155 = vmatprep.subr.bf16.mxu0 %v8962_v53  ;;  %3196 = vmatprep.subr.bf16.mxu1 %v8965_v54  ;;  %v9041_v53 = vld [vmem:[%s12710_s5 + $0x508] ss:$16 sps:$4 sm:$0xff]   ;;  %v9046_v54 = vld [vmem:[%s12710_s5 + $0x4e4] ss:$16 sps:$4 sm:$0xff]  }
 0x371   : > { %3156 = vmatpush2.bf16.msra.mxu0 %v8960_v56  ;;  %3197 = vmatpush2.bf16.msra.mxu1 %v8963_v58  ;;  %v9049_v56 = vld [vmem:[%s12710_s5 + $0x4ec] ss:$16 sps:$4 sm:$0xff]   ;;  %v9044_v58 = vld [vmem:[%s12710_s5 + $0x4e0] ss:$16 sps:$4 sm:$0xff]  }
 0x372   : > { %3576 = vmatprep.subr.bf16.mxu0 %v8968_v30  ;;  %3617 = vmatprep.subr.bf16.mxu1 %v8971_v8  ;;  %v9047_v30 = vld [vmem:[%s12710_s5 + $0x4e8] ss:$16 sps:$4 sm:$0xff]   ;;  %v9052_v8 = vld [vmem:[%s12710_s5 + $0x4c4] ss:$16 sps:$4 sm:$0xff]  }
 0x374   : > { %3158 = vmatmul.mubr.bf16.vlgmr.msra.gmra.mxu0 %v2296_v11  ;;  %3199 = vmatmul.mubr.bf16.vlgmr.msra.gmra.mxu1 %v2296_v11  ;;  %v9050_v11 = vld [vmem:[%s12710_s5 + $0x4c0] ss:$16 sps:$4 sm:$0xff]  }
 0x375   : > { %3577 = vmatpush1.bf16.msra.mxu0 %v8966_v60  ;;  %8013 = vmatprep.mubr.msk.bf16.mxu0 %vm2736_vm7, %v3271_v5  ;;  %v9055_v60 = vld [vmem:[%s12710_s5 + $0x4cc] ss:$16 sps:$4 sm:$0xff]  }
 0x376   : > { %3618 = vmatpush1.bf16.msra.mxu1 %v8969_v4  ;;  %8014 = vmatprep.mubr.msk.bf16.mxu1 %vm2736_vm7, %v3271_v5  ;;  %v9053_v4 = vld [vmem:[%s12710_s5 + $0x4c8] ss:$16 sps:$4 sm:$0xff]   ;;  %v9058_v5 = vld [vmem:[%s12710_s5 + $0x684] ss:$16 sps:$4 sm:$0xff]  }
 0x377   : > { %3578 = vmatprep.subr.bf16.mxu0 %v8974_v9  ;;  %3619 = vmatprep.subr.bf16.mxu1 %v8977_v10  ;;  %v9061_v9 = vld [vmem:[%s12710_s5 + $0x68c] ss:$16 sps:$4 sm:$0xff]   ;;  %v9056_v10 = vld [vmem:[%s12710_s5 + $0x680] ss:$16 sps:$4 sm:$0xff]  }
 0x379   : > { %3579 = vmatpush1.bf16.msra.mxu0 %v8972_v24  ;;  %v3270_v24 = vrot.slane %v11126_v29, 1 }
 0x37a   : > { %3620 = vmatpush1.bf16.msra.mxu1 %v8975_v12  ;;  %3580 = vmatprep.subr.bf16.mxu0 %v8980_v16  ;;  %v9059_v12 = vld [vmem:[%s12710_s5 + $0x688] ss:$16 sps:$4 sm:$0xff]   ;;  %v9064_v16 = vld [vmem:[%s12710_s5 + $0x664] ss:$16 sps:$4 sm:$0xff]  }
 0x37b   : > { %3621 = vmatprep.subr.bf16.mxu1 %v8983_v6  ;;  %v9067_v6 = vld [vmem:[%s12710_s5 + $0x66c] ss:$16 sps:$4 sm:$0xff]  }
 0x37d   : > { %3581 = vmatpush1.bf16.msra.mxu0 %v8978_v59  ;;  %v9062_v59 = vld [vmem:[%s12710_s5 + $0x660] ss:$16 sps:$4 sm:$0xff]  }
 0x37e   : > { %3622 = vmatpush1.bf16.msra.mxu1 %v8981_v7  ;;  %3582 = vmatprep.subr.bf16.mxu0 %v8986_v48  ;;  %v9065_v7 = vld [vmem:[%s12710_s5 + $0x668] ss:$16 sps:$4 sm:$0xff]   ;;  %v9070_v48 = vld [vmem:[%s12710_s5 + $0x644] ss:$16 sps:$4 sm:$0xff]  }
 0x37f   : > { %3623 = vmatprep.subr.bf16.mxu1 %v8989_v18  ;;  %v9073_v18 = vld [vmem:[%s12710_s5 + $0x64c] ss:$16 sps:$4 sm:$0xff]  }
 0x381   : > { %3583 = vmatpush1.bf16.msra.mxu0 %v8984_v14  ;;  %v9068_v14 = vld [vmem:[%s12710_s5 + $0x640] ss:$16 sps:$4 sm:$0xff]  }
 0x382   : > { %3624 = vmatpush1.bf16.msra.mxu1 %v8987_v32  ;;  %3584 = vmatprep.subr.bf16.mxu0 %v8992_v47  ;;  %v9071_v32 = vld [vmem:[%s12710_s5 + $0x648] ss:$16 sps:$4 sm:$0xff]   ;;  %v9079_v47 = vld [vmem:[%s12710_s5 + $0x62c] ss:$16 sps:$4 sm:$0xff]  }
 0x383   : > { %3625 = vmatprep.subr.bf16.mxu1 %v8995_v15  ;;  %v9074_v15 = vld [vmem:[%s12710_s5 + $0x620] ss:$16 sps:$4 sm:$0xff]  }
 0x385   : > { %3585 = vmatpush1.bf16.msra.mxu0 %v8990_v19  ;;  %v9077_v19 = vld [vmem:[%s12710_s5 + $0x628] ss:$16 sps:$4 sm:$0xff]  }
 0x386   : > { %3626 = vmatpush1.bf16.msra.mxu1 %v8993_v2  ;;  %3586 = vmatprep.subr.bf16.mxu0 %v8998_v3  ;;  %v9082_v2 = vld [vmem:[%s12710_s5 + $0x604] ss:$16 sps:$4 sm:$0xff]   ;;  %v9085_v3 = vld [vmem:[%s12710_s5 + $0x60c] ss:$16 sps:$4 sm:$0xff]  }
 0x387   : > { %3627 = vmatprep.subr.bf16.mxu1 %v9001_v33  ;;  %v9080_v33 = vld [vmem:[%s12710_s5 + $0x600] ss:$16 sps:$4 sm:$0xff]  }
 0x389   : > { %3587 = vmatpush1.bf16.msra.mxu0 %v8996_v31  ;;  %v9083_v31 = vld [vmem:[%s12710_s5 + $0x608] ss:$16 sps:$4 sm:$0xff]  }
 0x38a   : > { %3628 = vmatpush1.bf16.msra.mxu1 %v8999_v1  ;;  %3588 = vmatprep.subr.bf16.mxu0 %v9004_v20  ;;  %v9088_v1 = vld [vmem:[%s12710_s5 + $0x5e4] ss:$16 sps:$4 sm:$0xff]   ;;  %v9091_v20 = vld [vmem:[%s12710_s5 + $0x5ec] ss:$16 sps:$4 sm:$0xff]  }
 0x38b   : > { %3629 = vmatprep.subr.bf16.mxu1 %v9007_v21  ;;  %v9086_v21 = vld [vmem:[%s12710_s5 + $0x5e0] ss:$16 sps:$4 sm:$0xff]  }
 0x38d   : > { %3589 = vmatpush1.bf16.msra.mxu0 %v9002_v61  ;;  %v9089_v61 = vld [vmem:[%s12710_s5 + $0x5e8] ss:$16 sps:$4 sm:$0xff]  }
 0x38e   : > { %3630 = vmatpush1.bf16.msra.mxu1 %v9005_v63  ;;  %3590 = vmatprep.subr.bf16.mxu0 %v9010_v0  ;;  %v9094_v63 = vld [vmem:[%s12710_s5 + $0x5c4] ss:$16 sps:$4 sm:$0xff]   ;;  %v9097_v0 = vld [vmem:[%s12710_s5 + $0x5cc] ss:$16 sps:$4 sm:$0xff]  }
 0x38f   : > { %3631 = vmatprep.subr.bf16.mxu1 %v9013_v22  ;;  %v9092_v22 = vld [vmem:[%s12710_s5 + $0x5c0] ss:$16 sps:$4 sm:$0xff]  }
 0x391   : > { %3591 = vmatpush1.bf16.msra.mxu0 %v9008_v34  ;;  %v9095_v34 = vld [vmem:[%s12710_s5 + $0x5c8] ss:$16 sps:$4 sm:$0xff]  }
 0x392   : > { %3632 = vmatpush1.bf16.msra.mxu1 %v9011_v35  ;;  %3594 = vmatprep.subr.bf16.mxu0 %v9016_v36  ;;  %v9100_v35 = vld [vmem:[%s12710_s5 + $0x5a4] ss:$16 sps:$4 sm:$0xff]   ;;  %v9103_v36 = vld [vmem:[%s12710_s5 + $0x5ac] ss:$16 sps:$4 sm:$0xff]  }
 0x393   : > { %3635 = vmatprep.subr.bf16.mxu1 %v9019_v23  ;;  %v9098_v23 = vld [vmem:[%s12710_s5 + $0x5a0] ss:$16 sps:$4 sm:$0xff]  }
 0x395   : > { %3595 = vmatpush2.bf16.msra.mxu0 %v9014_v37  ;;  %v9101_v37 = vld [vmem:[%s12710_s5 + $0x5a8] ss:$16 sps:$4 sm:$0xff]  }
 0x396   : > { %3636 = vmatpush2.bf16.msra.mxu1 %v9017_v38  ;;  %3596 = vmatprep.subr.bf16.mxu0 %v9022_v39  ;;  %v9106_v38 = vld [vmem:[%s12710_s5 + $0x764] ss:$16 sps:$4 sm:$0xff]   ;;  %v9109_v39 = vld [vmem:[%s12710_s5 + $0x76c] ss:$16 sps:$4 sm:$0xff]  }
 0x397   : > { %3637 = vmatprep.subr.bf16.mxu1 %v9025_v25  ;;  %v9104_v25 = vld [vmem:[%s12710_s5 + $0x760] ss:$16 sps:$4 sm:$0xff]  }
 0x399   : > { %3597 = vmatpush2.bf16.msra.mxu0 %v9020_v26  ;;  %v9107_v26 = vld [vmem:[%s12710_s5 + $0x768] ss:$16 sps:$4 sm:$0xff]  }
 0x39a   : > { %3638 = vmatpush2.bf16.msra.mxu1 %v9023_v13  ;;  %3598 = vmatprep.subr.bf16.mxu0 %v9028_v40  ;;  %v9112_v13 = vld [vmem:[%s12710_s5 + $0x744] ss:$16 sps:$4 sm:$0xff]   ;;  %v9115_v40 = vld [vmem:[%s12710_s5 + $0x74c] ss:$16 sps:$4 sm:$0xff]  }
 0x39b   : > { %3639 = vmatprep.subr.bf16.mxu1 %v9031_v62  ;;  %v9110_v62 = vld [vmem:[%s12710_s5 + $0x740] ss:$16 sps:$4 sm:$0xff]  }
 0x39d   : > { %3599 = vmatpush2.bf16.msra.mxu0 %v9026_v28  ;;  %v9113_v28 = vld [vmem:[%s12710_s5 + $0x748] ss:$16 sps:$4 sm:$0xff]  }
 0x39e   : > { %3640 = vmatpush2.bf16.msra.mxu1 %v9029_v42  ;;  %3600 = vmatprep.subr.bf16.mxu0 %v9034_v43  ;;  %v9118_v42 = vld [vmem:[%s12710_s5 + $0x724] ss:$16 sps:$4 sm:$0xff]   ;;  %v9121_v43 = vld [vmem:[%s12710_s5 + $0x72c] ss:$16 sps:$4 sm:$0xff]  }
 0x39f   : > { %3641 = vmatprep.subr.bf16.mxu1 %v9037_v44  ;;  %v9116_v44 = vld [vmem:[%s12710_s5 + $0x720] ss:$16 sps:$4 sm:$0xff]  }
 0x3a1   : > { %3601 = vmatpush2.bf16.msra.mxu0 %v9032_v49  ;;  %v9119_v49 = vld [vmem:[%s12710_s5 + $0x728] ss:$16 sps:$4 sm:$0xff]  }
 0x3a2   : > { %3642 = vmatpush2.bf16.msra.mxu1 %v9035_v50  ;;  %3602 = vmatprep.subr.bf16.mxu0 %v9040_v51  ;;  %v9124_v50 = vld [vmem:[%s12710_s5 + $0x704] ss:$16 sps:$4 sm:$0xff]   ;;  %v9127_v51 = vld [vmem:[%s12710_s5 + $0x70c] ss:$16 sps:$4 sm:$0xff]  }
 0x3a3   : > { %3643 = vmatprep.subr.bf16.mxu1 %v9043_v52  ;;  %v9122_v52 = vld [vmem:[%s12710_s5 + $0x700] ss:$16 sps:$4 sm:$0xff]  }
 0x3a5   : > { %3603 = vmatpush2.bf16.msra.mxu0 %v9038_v17  ;;  %v9125_v17 = vld [vmem:[%s12710_s5 + $0x708] ss:$16 sps:$4 sm:$0xff]  }
 0x3a6   : > { %3644 = vmatpush2.bf16.msra.mxu1 %v9041_v53  ;;  %3604 = vmatprep.subr.bf16.mxu0 %v9046_v54  ;;  %v9130_v53 = vld [vmem:[%s12710_s5 + $0x6e4] ss:$16 sps:$4 sm:$0xff]   ;;  %v9133_v54 = vld [vmem:[%s12710_s5 + $0x6ec] ss:$16 sps:$4 sm:$0xff]  }
 0x3a7   : > { %3645 = vmatprep.subr.bf16.mxu1 %v9049_v56  ;;  %v9128_v56 = vld [vmem:[%s12710_s5 + $0x6e0] ss:$16 sps:$4 sm:$0xff]  }
 0x3a9   : > { %3605 = vmatpush2.bf16.msra.mxu0 %v9044_v58  ;;  %v9131_v58 = vld [vmem:[%s12710_s5 + $0x6e8] ss:$16 sps:$4 sm:$0xff]  }
 0x3aa   : > { %3646 = vmatpush2.bf16.msra.mxu1 %v9047_v30  ;;  %3606 = vmatprep.subr.bf16.mxu0 %v9052_v8  ;;  %v9136_v30 = vld [vmem:[%s12710_s5 + $0x6c4] ss:$16 sps:$4 sm:$0xff]   ;;  %v9139_v8 = vld [vmem:[%s12710_s5 + $0x6cc] ss:$16 sps:$4 sm:$0xff]  }
 0x3ab   : > { %3647 = vmatprep.subr.bf16.mxu1 %v9055_v60  ;;  %v9134_v60 = vld [vmem:[%s12710_s5 + $0x6c0] ss:$16 sps:$4 sm:$0xff]  }
 0x3ad   : > { %3607 = vmatpush2.bf16.msra.mxu0 %v9050_v11  ;;  %v9137_v11 = vld [vmem:[%s12710_s5 + $0x6c8] ss:$16 sps:$4 sm:$0xff]  }
 0x3ae   : > { %3648 = vmatpush2.bf16.msra.mxu1 %v9053_v4  ;;  %4033 = vmatprep.subr.bf16.mxu0 %v9058_v5  ;;  %v9142_v4 = vld [vmem:[%s12710_s5 + $0x6a4] ss:$16 sps:$4 sm:$0xff]   ;;  %v9145_v5 = vld [vmem:[%s12710_s5 + $0x6ac] ss:$16 sps:$4 sm:$0xff]  }
 0x3af   : > { %4074 = vmatprep.subr.bf16.mxu1 %v9061_v9  ;;  %v9140_v9 = vld [vmem:[%s12710_s5 + $0x6a0] ss:$16 sps:$4 sm:$0xff]  }
 0x3b0   : > { %3609 = vmatmul.mubr.bf16.vlgmr.msra.gmra.mxu0 %v3270_v24 }
 0x3b1   : > { %3650 = vmatmul.mubr.bf16.vlgmr.msra.gmra.mxu1 %v3270_v24  ;;  %4034 = vmatpush1.bf16.msra.mxu0 %v9056_v10  ;;  %v9143_v10 = vld [vmem:[%s12710_s5 + $0x6a8] ss:$16 sps:$4 sm:$0xff]   ;;  %v9148_v24 = vld [vmem:[%s12710_s5 + $0x864] ss:$16 sps:$4 sm:$0xff]  }
 0x3b2   : > { %8135 = vmatprep.mubr.msk.bf16.mxu0 %vm2736_vm7, %v11142_v55  ;;  %4075 = vmatpush1.bf16.msra.mxu1 %v9059_v12  ;;  %v9151_v12 = vld [vmem:[%s12710_s5 + $0x86c] ss:$16 sps:$4 sm:$0xff]  }
 0x3b3   : > { %8136 = vmatprep.mubr.msk.bf16.mxu1 %vm2736_vm7, %v11142_v55  ;;  %4035 = vmatprep.subr.bf16.mxu0 %v9064_v16  ;;  %v9076_v55 = vld [vmem:[%s12710_s5 + $0x624] ss:$16 sps:$4 sm:$0xff]   ;;  %v9146_v16 = vld [vmem:[%s12710_s5 + $0x860] ss:$16 sps:$4 sm:$0xff]  }
 0x3b4   : > { %4076 = vmatprep.subr.bf16.mxu1 %v9067_v6  ;;  %v9149_v6 = vld [vmem:[%s12710_s5 + $0x868] ss:$16 sps:$4 sm:$0xff]  }
 0x3b5   : > { %4036 = vmatpush1.bf16.msra.mxu0 %v9062_v59  ;;  %v9154_v59 = vld [vmem:[%s12710_s5 + $0x844] ss:$16 sps:$4 sm:$0xff]  }
 0x3b6   : > { %4077 = vmatpush1.bf16.msra.mxu1 %v9065_v7  ;;  %4037 = vmatprep.subr.bf16.mxu0 %v9070_v48  ;;  %v4181_v7 = vrot.slane %v11130_v27, 2  ;;  %v9157_v48 = vld [vmem:[%s12710_s5 + $0x84c] ss:$16 sps:$4 sm:$0xff]   ;;  %v9160_v27 = vld [vmem:[%s12710_s5 + $0x824] ss:$16 sps:$4 sm:$0xff]  }
 0x3b7   : > { %4078 = vmatprep.subr.bf16.mxu1 %v9073_v18  ;;  %v9152_v18 = vld [vmem:[%s12710_s5 + $0x840] ss:$16 sps:$4 sm:$0xff]  }
 0x3b9   : > { %4038 = vmatpush1.bf16.msra.mxu0 %v9068_v14  ;;  %v9155_v14 = vld [vmem:[%s12710_s5 + $0x848] ss:$16 sps:$4 sm:$0xff]  }
 0x3ba   : > { %4079 = vmatpush1.bf16.msra.mxu1 %v9071_v32  ;;  %4039 = vmatprep.subr.bf16.mxu0 %v9076_v55  ;;  %v9158_v32 = vld [vmem:[%s12710_s5 + $0x820] ss:$16 sps:$4 sm:$0xff]   ;;  %v9161_v55 = vld [vmem:[%s12710_s5 + $0x828] ss:$16 sps:$4 sm:$0xff]  }
 0x3bb   : > { %4080 = vmatprep.subr.bf16.mxu1 %v9079_v47  ;;  %v9166_v47 = vld [vmem:[%s12710_s5 + $0x804] ss:$16 sps:$4 sm:$0xff]  }
 0x3bd   : > { %4040 = vmatpush1.bf16.msra.mxu0 %v9074_v15  ;;  %v9169_v15 = vld [vmem:[%s12710_s5 + $0x80c] ss:$16 sps:$4 sm:$0xff]  }
 0x3be   : > { %4081 = vmatpush1.bf16.msra.mxu1 %v9077_v19  ;;  %4041 = vmatprep.subr.bf16.mxu0 %v9082_v2  ;;  %v9164_v19 = vld [vmem:[%s12710_s5 + $0x800] ss:$16 sps:$4 sm:$0xff]   ;;  %v9167_v2 = vld [vmem:[%s12710_s5 + $0x808] ss:$16 sps:$4 sm:$0xff]  }
 0x3bf   : > { %4082 = vmatprep.subr.bf16.mxu1 %v9085_v3  ;;  %v9172_v3 = vld [vmem:[%s12710_s5 + $0x7e4] ss:$16 sps:$4 sm:$0xff]  }
 0x3c1   : > { %4042 = vmatpush1.bf16.msra.mxu0 %v9080_v33  ;;  %v9175_v33 = vld [vmem:[%s12710_s5 + $0x7ec] ss:$16 sps:$4 sm:$0xff]  }
 0x3c2   : > { %4083 = vmatpush1.bf16.msra.mxu1 %v9083_v31  ;;  %4043 = vmatprep.subr.bf16.mxu0 %v9088_v1 }
 0x3c3   : > { %4084 = vmatprep.subr.bf16.mxu1 %v9091_v20  ;;  %v9170_v20 = vld [vmem:[%s12710_s5 + $0x7e0] ss:$16 sps:$4 sm:$0xff]  }
 0x3c5   : > { %4044 = vmatpush1.bf16.msra.mxu0 %v9086_v21 }
 0x3c6   : > { %4085 = vmatpush1.bf16.msra.mxu1 %v9089_v61  ;;  %4045 = vmatprep.subr.bf16.mxu0 %v9094_v63  ;;  %v9173_v63 = vld [vmem:[%s12710_s5 + $0x7e8] ss:$16 sps:$4 sm:$0xff]  }
 0x3c7   : > { %4086 = vmatprep.subr.bf16.mxu1 %v9097_v0  ;;  %v9178_v0 = vld [vmem:[%s12710_s5 + $0x7c4] ss:$16 sps:$4 sm:$0xff]  }
 0x3c9   : > { %4046 = vmatpush1.bf16.msra.mxu0 %v9092_v22  ;;  %v9181_v22 = vld [vmem:[%s12710_s5 + $0x7cc] ss:$16 sps:$4 sm:$0xff]  }
 0x3ca   : > { %4087 = vmatpush1.bf16.msra.mxu1 %v9095_v34  ;;  %4047 = vmatprep.subr.bf16.mxu0 %v9100_v35 }
 0x3cb   : > { %4088 = vmatprep.subr.bf16.mxu1 %v9103_v36  ;;  %v9176_v36 = vld [vmem:[%s12710_s5 + $0x7c0] ss:$16 sps:$4 sm:$0xff]  }
 0x3cd   : > { %4048 = vmatpush1.bf16.msra.mxu0 %v9098_v23 }
 0x3ce   : > { %4089 = vmatpush1.bf16.msra.mxu1 %v9101_v37  ;;  %4051 = vmatprep.subr.bf16.mxu0 %v9106_v38  ;;  %v9179_v38 = vld [vmem:[%s12710_s5 + $0x7c8] ss:$16 sps:$4 sm:$0xff]  }
 0x3cf   : > { %4092 = vmatprep.subr.bf16.mxu1 %v9109_v39  ;;  %v9184_v39 = vld [vmem:[%s12710_s5 + $0x7a4] ss:$16 sps:$4 sm:$0xff]  }
 0x3d1   : > { %4052 = vmatpush2.bf16.msra.mxu0 %v9104_v25  ;;  %v9187_v25 = vld [vmem:[%s12710_s5 + $0x7ac] ss:$16 sps:$4 sm:$0xff]  }
 0x3d2   : > { %4093 = vmatpush2.bf16.msra.mxu1 %v9107_v26  ;;  %4053 = vmatprep.subr.bf16.mxu0 %v9112_v13  ;;  %v9182_v26 = vld [vmem:[%s12710_s5 + $0x7a0] ss:$16 sps:$4 sm:$0xff]   ;;  %v9185_v13 = vld [vmem:[%s12710_s5 + $0x7a8] ss:$16 sps:$4 sm:$0xff]  }
 0x3d3   : > { %4094 = vmatprep.subr.bf16.mxu1 %v9115_v40  ;;  %v9190_v40 = vld [vmem:[%s12710_s5 + $0x784] ss:$16 sps:$4 sm:$0xff]  }
 0x3d5   : > { %4054 = vmatpush2.bf16.msra.mxu0 %v9110_v62  ;;  %v9193_v62 = vld [vmem:[%s12710_s5 + $0x78c] ss:$16 sps:$4 sm:$0xff]  }
 0x3d6   : > { %4095 = vmatpush2.bf16.msra.mxu1 %v9113_v28  ;;  %4055 = vmatprep.subr.bf16.mxu0 %v9118_v42  ;;  %v9188_v28 = vld [vmem:[%s12710_s5 + $0x780] ss:$16 sps:$4 sm:$0xff]   ;;  %v9191_v42 = vld [vmem:[%s12710_s5 + $0x788] ss:$16 sps:$4 sm:$0xff]  }
 0x3d7   : > { %4096 = vmatprep.subr.bf16.mxu1 %v9121_v43  ;;  %v9196_v43 = vld [vmem:[%s12710_s5 + $0x944] ss:$16 sps:$4 sm:$0xff]  }
 0x3d9   : > { %4056 = vmatpush2.bf16.msra.mxu0 %v9116_v44  ;;  %v9199_v44 = vld [vmem:[%s12710_s5 + $0x94c] ss:$16 sps:$4 sm:$0xff]  }
 0x3da   : > { %4097 = vmatpush2.bf16.msra.mxu1 %v9119_v49  ;;  %4057 = vmatprep.subr.bf16.mxu0 %v9124_v50  ;;  %v9194_v49 = vld [vmem:[%s12710_s5 + $0x940] ss:$16 sps:$4 sm:$0xff]   ;;  %v9197_v50 = vld [vmem:[%s12710_s5 + $0x948] ss:$16 sps:$4 sm:$0xff]  }
 0x3db   : > { %4098 = vmatprep.subr.bf16.mxu1 %v9127_v51  ;;  %v9202_v51 = vld [vmem:[%s12710_s5 + $0x924] ss:$16 sps:$4 sm:$0xff]  }
 0x3dd   : > { %4058 = vmatpush2.bf16.msra.mxu0 %v9122_v52  ;;  %v9205_v52 = vld [vmem:[%s12710_s5 + $0x92c] ss:$16 sps:$4 sm:$0xff]  }
 0x3de   : > { %4099 = vmatpush2.bf16.msra.mxu1 %v9125_v17  ;;  %4059 = vmatprep.subr.bf16.mxu0 %v9130_v53  ;;  %v9200_v17 = vld [vmem:[%s12710_s5 + $0x920] ss:$16 sps:$4 sm:$0xff]   ;;  %v9203_v53 = vld [vmem:[%s12710_s5 + $0x928] ss:$16 sps:$4 sm:$0xff]  }
 0x3df   : > { %4100 = vmatprep.subr.bf16.mxu1 %v9133_v54  ;;  %v9208_v54 = vld [vmem:[%s12710_s5 + $0x904] ss:$16 sps:$4 sm:$0xff]  }
 0x3e1   : > { %4060 = vmatpush2.bf16.msra.mxu0 %v9128_v56  ;;  %v9211_v56 = vld [vmem:[%s12710_s5 + $0x90c] ss:$16 sps:$4 sm:$0xff]  }
 0x3e2   : > { %4101 = vmatpush2.bf16.msra.mxu1 %v9131_v58  ;;  %4061 = vmatprep.subr.bf16.mxu0 %v9136_v30  ;;  %v9206_v58 = vld [vmem:[%s12710_s5 + $0x900] ss:$16 sps:$4 sm:$0xff]   ;;  %v9209_v30 = vld [vmem:[%s12710_s5 + $0x908] ss:$16 sps:$4 sm:$0xff]  }
 0x3e3   : > { %4102 = vmatprep.subr.bf16.mxu1 %v9139_v8  ;;  %v9214_v8 = vld [vmem:[%s12710_s5 + $0x8e4] ss:$16 sps:$4 sm:$0xff]  }
 0x3e5   : > { %4062 = vmatpush2.bf16.msra.mxu0 %v9134_v60  ;;  %v9217_v60 = vld [vmem:[%s12710_s5 + $0x8ec] ss:$16 sps:$4 sm:$0xff]  }
 0x3e6   : > { %4103 = vmatpush2.bf16.msra.mxu1 %v9137_v11  ;;  %4063 = vmatprep.subr.bf16.mxu0 %v9142_v4  ;;  %v9212_v11 = vld [vmem:[%s12710_s5 + $0x8e0] ss:$16 sps:$4 sm:$0xff]   ;;  %v9215_v4 = vld [vmem:[%s12710_s5 + $0x8e8] ss:$16 sps:$4 sm:$0xff]  }
 0x3e7   : > { %4104 = vmatprep.subr.bf16.mxu1 %v9145_v5  ;;  %v9220_v5 = vld [vmem:[%s12710_s5 + $0x8c4] ss:$16 sps:$4 sm:$0xff]  }
 0x3e9   : > { %4064 = vmatpush2.bf16.msra.mxu0 %v9140_v9  ;;  %v9223_v9 = vld [vmem:[%s12710_s5 + $0x8cc] ss:$16 sps:$4 sm:$0xff]  }
 0x3ea   : > { %4105 = vmatpush2.bf16.msra.mxu1 %v9143_v10  ;;  %4486 = vmatprep.subr.bf16.mxu0 %v9148_v24  ;;  %v9218_v10 = vld [vmem:[%s12710_s5 + $0x8c0] ss:$16 sps:$4 sm:$0xff]   ;;  %v9221_v24 = vld [vmem:[%s12710_s5 + $0x8c8] ss:$16 sps:$4 sm:$0xff]  }
 0x3eb   : > { %4527 = vmatprep.subr.bf16.mxu1 %v9151_v12  ;;  %v9226_v12 = vld [vmem:[%s12710_s5 + $0x8a4] ss:$16 sps:$4 sm:$0xff]  }
 0x3ec   : > { %4066 = vmatmul.mubr.bf16.vlgmr.msra.gmra.mxu0 %v11134_v57 }
 0x3ed   : > { %4107 = vmatmul.mubr.bf16.vlgmr.msra.gmra.mxu1 %v11134_v57  ;;  %4487 = vmatpush1.bf16.msra.mxu0 %v9146_v16  ;;  %v9163_v57 = vld [vmem:[%s12710_s5 + $0x82c] ss:$16 sps:$4 sm:$0xff]  }
 0x3ee   : > { %8257 = vmatprep.mubr.msk.bf16.mxu0 %vm2736_vm7, %v4181_v7  ;;  %4528 = vmatpush1.bf16.msra.mxu1 %v9149_v6  ;;  %v9229_v16 = vld [vmem:[%s12710_s5 + $0x8ac] ss:$16 sps:$4 sm:$0xff]   ;;  %v9224_v6 = vld [vmem:[%s12710_s5 + $0x8a0] ss:$16 sps:$4 sm:$0xff]  }
 0x3ef   : > { %8258 = vmatprep.mubr.msk.bf16.mxu1 %vm2736_vm7, %v4181_v7  ;;  %4488 = vmatprep.subr.bf16.mxu0 %v9154_v59  ;;  %v9227_v59 = vld [vmem:[%s12710_s5 + $0x8a8] ss:$16 sps:$4 sm:$0xff]   ;;  %v9232_v7 = vld [vmem:[%s12710_s5 + $0x884] ss:$16 sps:$4 sm:$0xff]  }
 0x3f0   : > { %4529 = vmatprep.subr.bf16.mxu1 %v9157_v48  ;;  %v9235_v48 = vld [vmem:[%s12710_s5 + $0x88c] ss:$16 sps:$4 sm:$0xff]  }
 0x3f1   : > { %4489 = vmatpush1.bf16.msra.mxu0 %v9152_v18  ;;  %v9230_v18 = vld [vmem:[%s12710_s5 + $0x880] ss:$16 sps:$4 sm:$0xff]  }
 0x3f2   : > { %4530 = vmatpush1.bf16.msra.mxu1 %v9155_v14  ;;  %4490 = vmatprep.subr.bf16.mxu0 %v9160_v27  ;;  %v9233_v14 = vld [vmem:[%s12710_s5 + $0x888] ss:$16 sps:$4 sm:$0xff]   ;;  %v4180_v27 = vrot.slane %v11126_v29, 2 }
 0x3f3   : > { %4531 = vmatprep.subr.bf16.mxu1 %v9163_v57 }
 0x3f5   : > { %4491 = vmatpush1.bf16.msra.mxu0 %v9158_v32 }
 0x3f6   : > { %4532 = vmatpush1.bf16.msra.mxu1 %v9161_v55  ;;  %4492 = vmatprep.subr.bf16.mxu0 %v9166_v47 }
 0x3f7   : > { %4533 = vmatprep.subr.bf16.mxu1 %v9169_v15 }
 0x3f8   : > { %v11745_v31 = vpop.f32.mrf.mxu0  ;;  %v11747_v1 = vpop.f32.mrf.mxu1 }
 0x3f9   : > { %4493 = vmatpush1.bf16.msra.mxu0 %v9164_v19 }
 0x3fa   : > { %4534 = vmatpush1.bf16.msra.mxu1 %v9167_v2  ;;  %v11752_v21 = vpop.f32.mrf.mxu0  ;;  %v11754_v61 = vpop.f32.mrf.mxu1  ;;  %4494 = vmatprep.subr.bf16.mxu0 %v9172_v3 }
 0x3fb   : > { %4535 = vmatprep.subr.bf16.mxu1 %v9175_v33 }
 0x3fc   : > { %v2778_v34 = vpop.f32.mrf.mxu0  ;;  %v2819_v35 = vpop.f32.mrf.mxu1 }
 0x3fd   : > { %4495 = vmatpush1.bf16.msra.mxu0 %v9170_v20 }
 0x3fe   : > { %4536 = vmatpush1.bf16.msra.mxu1 %v9173_v63  ;;  %v2779_v23 = vpop.f32.mrf.mxu0  ;;  %v2820_v37 = vpop.f32.mrf.mxu1  ;;  %4496 = vmatprep.subr.bf16.mxu0 %v9178_v0 }
 0x3ff   : > { %4537 = vmatprep.subr.bf16.mxu1 %v9181_v22 }
 0x401   : > { %4497 = vmatpush1.bf16.msra.mxu0 %v9176_v36 }
 0x402   : > { %4538 = vmatpush1.bf16.msra.mxu1 %v9179_v38  ;;  %4498 = vmatprep.subr.bf16.mxu0 %v9184_v39 }
 0x403   : > { %4539 = vmatprep.subr.bf16.mxu1 %v9187_v25 }
 0x405   : > { %4499 = vmatpush1.bf16.msra.mxu0 %v9182_v26 }
 0x406   : > { %4540 = vmatpush1.bf16.msra.mxu1 %v9185_v13  ;;  %4500 = vmatprep.subr.bf16.mxu0 %v9190_v40 }
 0x407   : > { %4541 = vmatprep.subr.bf16.mxu1 %v9193_v62 }
 0x409   : > { %4501 = vmatpush1.bf16.msra.mxu0 %v9188_v28 }
 0x40a   : > { %4542 = vmatpush1.bf16.msra.mxu1 %v9191_v42  ;;  %4504 = vmatprep.subr.bf16.mxu0 %v9196_v43  ;;  %v4572_v43 = vld [vmem:[%s12711_s6] sm:$0xf] }
 0x40b   : > { %4545 = vmatprep.subr.bf16.mxu1 %v9199_v44 }
 0x40d   : > { %4505 = vmatpush2.bf16.msra.mxu0 %v9194_v49 }
 0x40e   : > { %4546 = vmatpush2.bf16.msra.mxu1 %v9197_v50  ;;  %4506 = vmatprep.subr.bf16.mxu0 %v9202_v51  ;;  %v12742_v51 = vld [vmem:[#allocation11_spill] sm:$0xff] }
 0x40f   : > { %4547 = vmatprep.subr.bf16.mxu1 %v9205_v52  ;;  %v4577_v52 = vrot.slane %v4572_v43, %v12742_v51 }
 0x411   : > { %4507 = vmatpush2.bf16.msra.mxu0 %v9200_v17 }
 0x412   : > { %4548 = vmatpush2.bf16.msra.mxu1 %v9203_v53  ;;  %4508 = vmatprep.subr.bf16.mxu0 %v9208_v54 }
 0x413   : > { %4549 = vmatprep.subr.bf16.mxu1 %v9211_v56  ;;  %v12743_v56 = vld [vmem:[#allocation12_spill] sm:$0xff] }
 0x415   : > { %4509 = vmatpush2.bf16.msra.mxu0 %v9206_v58  ;;  %v4585_v58 = vrot.slane %v4572_v43, %v12743_v56 }
 0x416   : > { %4550 = vmatpush2.bf16.msra.mxu1 %v9209_v30  ;;  %4510 = vmatprep.subr.bf16.mxu0 %v9214_v8  ;;  %v4581_v30 = vrot.slane %v4572_v43, %v10101_v45 }
 0x417   : > { %4551 = vmatprep.subr.bf16.mxu1 %v9217_v60 }
 0x419   : > { %4511 = vmatpush2.bf16.msra.mxu0 %v9212_v11 }
 0x41a   : > { %4552 = vmatpush2.bf16.msra.mxu1 %v9215_v4  ;;  %4512 = vmatprep.subr.bf16.mxu0 %v9220_v5  ;;  %v4589_v4 = vrot.slane %v4572_v43, %v10103_v46  ;;  %v4916_v43 = vld [vmem:[%s12713_s8 + $0x80] sm:$0xff] }
 0x41b   : > { %4553 = vmatprep.subr.bf16.mxu1 %v9223_v9 }
 0x41d   : > { %4513 = vmatpush2.bf16.msra.mxu0 %v9218_v10 }
 0x41e   : > { %4554 = vmatpush2.bf16.msra.mxu1 %v9221_v24  ;;  %4514 = vmatprep.subr.bf16.mxu0 %v9226_v12 }
 0x41f   : > { %4555 = vmatprep.subr.bf16.mxu1 %v9229_v16 }
 0x421   : > { %4515 = vmatpush2.bf16.msra.mxu0 %v9224_v6 }
 0x422   : > { %4556 = vmatpush2.bf16.msra.mxu1 %v9227_v59  ;;  %4516 = vmatprep.subr.bf16.mxu0 %v9232_v7 }
 0x423   : > { %4557 = vmatprep.subr.bf16.mxu1 %v9235_v48 }
 0x425   : > { %4517 = vmatpush2.bf16.msra.mxu0 %v9230_v18 }
 0x426   : > { %4558 = vmatpush2.bf16.msra.mxu1 %v9233_v14 }
 0x428   : > { %4519 = vmatmul.mubr.bf16.vlgmr.msra.gmra.mxu0 %v4180_v27 }
 0x429   : > { %4560 = vmatmul.mubr.bf16.vlgmr.msra.gmra.mxu1 %v4180_v27  ;;  %4671 = vmatprep.mubr.f32.mxu0 %v12741_v41 }
 0x42a   : > { %4742 = vmatprep.mubr.f32.mxu1 %v12741_v41 }
 0x434   : > { %v3159_v57 = vpop.f32.mrf.mxu0  ;;  %v3200_v32 = vpop.f32.mrf.mxu1 }
 0x435   : > { %v3160_v55 = vadd.f32 %v3159_v57, %v11745_v31  ;;  %v3201_v47 = vadd.f32 %v3200_v32, %v11747_v1  ;;  %v4602_v32 = vld [vmem:[%s12712_s7] sm:$0xf] }
 0x436   : > { %v3161_v15 = vpop.f32.mrf.mxu0  ;;  %v3202_v19 = vpop.f32.mrf.mxu1 }
 0x437   : > { %v3162_v2 = vadd.f32 %v3161_v15, %v11752_v21  ;;  %v3203_v3 = vadd.f32 %v3202_v19, %v11754_v61  ;;  %v4931_v15 = vld [vmem:[%s12713_s8 + $0xf8] sm:$0xff]  ;;  %v4930_v19 = vld [vmem:[%s12713_s8 + $0xf0] sm:$0xff] }
 0x438   : > { %v3163_v33 = vpop.f32.mrf.mxu0  ;;  %v3204_v29 = vpop.f32.mrf.mxu1 }
 0x439   : > { %v4994_v33 = vld [vmem:[%s12713_s8 + $0x2f0] sm:$0xff]  ;;  %v4928_v29 = vld [vmem:[%s12713_s8 + $0xe0] sm:$0xff] }
 0x43a   : > { %v3164_v20 = vpop.f32.mrf.mxu0  ;;  %v3205_v63 = vpop.f32.mrf.mxu1 }
 0x43b   : > { %v4927_v20 = vld [vmem:[%s12713_s8 + $0xd8] sm:$0xff]  ;;  %v4992_v63 = vld [vmem:[%s12713_s8 + $0x2e0] sm:$0xff] }
 0x470   : > { %v3610_v0 = vpop.f32.mrf.mxu0 }
 0x471   : > { %v3658_v22 = vadd.f32 %v3610_v0, %v3160_v55  ;;  %v3651_v34 = vpop.f32.mrf.mxu1  ;;  %v4926_v0 = vld [vmem:[%s12713_s8 + $0xd0] sm:$0xff] }
 0x472   : > { %v3660_v35 = vadd.f32 %v3651_v34, %v3201_v47  ;;  %v3612_v36 = vpop.f32.mrf.mxu0  ;;  %v8261_v47 = vld [vmem:[%s12712_s7 + $0x4] sm:$0xf]  ;;  %v4925_v34 = vld [vmem:[%s12713_s8 + $0xc8] sm:$0xff] }
 0x473   : > { %v3659_v23 = vadd.f32 %v3612_v36, %v3162_v2  ;;  %v3653_v37 = vpop.f32.mrf.mxu1  ;;  %v4995_v2 = vld [vmem:[%s12713_s8 + $0x2f8] sm:$0xff]  ;;  %v4924_v36 = vld [vmem:[%s12713_s8 + $0xc0] sm:$0xff] }
 0x474   : > { %v3661_v31 = vadd.f32 %v3653_v37, %v3203_v3  ;;  %v3614_v38 = vpop.f32.mrf.mxu0  ;;  %v4929_v3 = vld [vmem:[%s12713_s8 + $0xe8] sm:$0xff]  ;;  %v4923_v37 = vld [vmem:[%s12713_s8 + $0xb8] sm:$0xff] }
 0x475   : > { %v3655_v1 = vpop.f32.mrf.mxu1  ;;  %v4922_v38 = vld [vmem:[%s12713_s8 + $0xb0] sm:$0xff] }
 0x476   : > { %v3615_v39 = vpop.f32.mrf.mxu0  ;;  %v4987_v1 = vld [vmem:[%s12713_s8 + $0x2b8] sm:$0xff] }
 0x477   : > { %v3656_v25 = vpop.f32.mrf.mxu1  ;;  %v4921_v39 = vld [vmem:[%s12713_s8 + $0xa8] sm:$0xff] }
 0x478   : > { %v4986_v25 = vld [vmem:[%s12713_s8 + $0x2b0] sm:$0xff] }
 0x4ac   : > { %v4067_v26 = vpop.f32.mrf.mxu0 }
 0x4ad   : > { %v4108_v21 = vpop.f32.mrf.mxu1  ;;  %v4115_v44 = vadd.f32 %v4067_v26, %v3658_v22  ;;  %v4991_v22 = vld [vmem:[%s12713_s8 + $0x2d8] sm:$0xff]  ;;  %v4920_v26 = vld [vmem:[%s12713_s8 + $0xa0] sm:$0xff] }
 0x4ae   : > { %v4069_v13 = vpop.f32.mrf.mxu0  ;;  %v4117_v49 = vadd.f32 %v4108_v21, %v3660_v35  ;;  %v4990_v35 = vld [vmem:[%s12713_s8 + $0x2d0] sm:$0xff]  ;;  %v4985_v21 = vld [vmem:[%s12713_s8 + $0x2a8] sm:$0xff] }
 0x4af   : > { %v4110_v61 = vpop.f32.mrf.mxu1  ;;  %v4116_v17 = vadd.f32 %v4069_v13, %v3659_v23  ;;  %v4989_v23 = vld [vmem:[%s12713_s8 + $0x2c8] sm:$0xff]  ;;  %v4919_v13 = vld [vmem:[%s12713_s8 + $0x98] sm:$0xff] }
 0x4b0   : > { %v4071_v40 = vpop.f32.mrf.mxu0  ;;  %v4118_v8 = vadd.f32 %v4110_v61, %v3661_v31  ;;  %v4988_v31 = vld [vmem:[%s12713_s8 + $0x2c0] sm:$0xff] }
 0x4b1   : > { %v4112_v62 = vpop.f32.mrf.mxu1  ;;  %v4984_v61 = vld [vmem:[%s12713_s8 + $0x2a0] sm:$0xff]  ;;  %v4918_v40 = vld [vmem:[%s12713_s8 + $0x90] sm:$0xff] }
 0x4b2   : > { %v4072_v28 = vpop.f32.mrf.mxu0  ;;  %v4983_v62 = vld [vmem:[%s12713_s8 + $0x298] sm:$0xff] }
 0x4b3   : > { %v4113_v42 = vpop.f32.mrf.mxu1  ;;  %v4917_v28 = vld [vmem:[%s12713_s8 + $0x88] sm:$0xff] }
 0x4b4   : > { %v4982_v42 = vld [vmem:[%s12713_s8 + $0x290] sm:$0xff] }
 0x4e8   : > { %v4520_v50 = vpop.f32.mrf.mxu0 }
 0x4e9   : > { %v4568_v53 = vadd.f32 %v4520_v50, %v4115_v44  ;;  %v4561_v54 = vpop.f32.mrf.mxu1  ;;  %v4981_v44 = vld [vmem:[%s12713_s8 + $0x288] sm:$0xff]  ;;  %v4980_v50 = vld [vmem:[%s12713_s8 + $0x280] sm:$0xff] }
 0x4ea   : > { %v4570_v60 = vadd.f32 %v4561_v54, %v4117_v49  ;;  %v4522_v11 = vpop.f32.mrf.mxu0  ;;  %v4915_v49 = vld [vmem:[%s12713_s8 + $0x78] sm:$0xff]  ;;  %v4978_v54 = vld [vmem:[%s12713_s8 + $0x270] sm:$0xff] }
 0x4eb   : > { %v4569_v5 = vadd.f32 %v4522_v11, %v4116_v17  ;;  %v4563_v9 = vpop.f32.mrf.mxu1  ;;  %v4594_v10 = vadd.f32 %v4577_v52, %v4568_v53  ;;  %v4914_v52 = vld [vmem:[%s12713_s8 + $0x70] sm:$0xff]  ;;  %v4979_v17 = vld [vmem:[%s12713_s8 + $0x278] sm:$0xff]  ;;  %v4913_v53 = vld [vmem:[%s12713_s8 + $0x68] sm:$0xff] }
 0x4ec   : > { %v4571_v24 = vadd.f32 %v4563_v9, %v4118_v8  ;;  %v4524_v12 = vpop.f32.mrf.mxu0  ;;  %v4596_v16 = vadd.f32 %v4585_v58, %v4570_v60  ;;  %v4912_v58 = vld [vmem:[%s12713_s8 + $0x60] sm:$0xff]  ;;  %v4911_v8 = vld [vmem:[%s12713_s8 + $0x58] sm:$0xff]  ;;  %v4910_v11 = vld [vmem:[%s12713_s8 + $0x50] sm:$0xff] }
 0x4ed   : > { %v4595_v6 = vadd.f32 %v4581_v30, %v4569_v5  ;;  %v4565_v59 = vpop.f32.mrf.mxu1  ;;  %v4598_v27 = vmax.f32 %v4594_v10, 0.0  ;;  %v4977_v30 = vld [vmem:[%s12713_s8 + $0x268] sm:$0xff]  ;;  %v4976_v60 = vld [vmem:[%s12713_s8 + $0x260] sm:$0xff]  ;;  %v4974_v9 = vld [vmem:[%s12713_s8 + $0x250] sm:$0xff] }
 0x4ee   : > { %v4597_v7 = vadd.f32 %v4589_v4, %v4571_v24  ;;  %v4525_v48 = vpop.f32.mrf.mxu0  ;;  %v4600_v55 = vmax.f32 %v4596_v16, 0.0  ;;  %v4975_v4 = vld [vmem:[%s12713_s8 + $0x258] sm:$0xff]  ;;  %v4909_v5 = vld [vmem:[%s12713_s8 + $0x48] sm:$0xff]  ;;  %v4908_v10 = vld [vmem:[%s12713_s8 + $0x40] sm:$0xff] }
 0x4ef   : > { %v4599_v18 = vmax.f32 %v4595_v6, 0.0  ;;  %v4566_v14 = vpop.f32.mrf.mxu1  ;;  %v4973_v24 = vld [vmem:[%s12713_s8 + $0x248] sm:$0xff]  ;;  %v4907_v12 = vld [vmem:[%s12713_s8 + $0x38] sm:$0xff]  ;;  %v4972_v16 = vld [vmem:[%s12713_s8 + $0x240] sm:$0xff] }
 0x4f0   : > { %v4601_v57 = vmax.f32 %v4597_v7, 0.0  ;;  %v4906_v6 = vld [vmem:[%s12713_s8 + $0x30] sm:$0xff]  ;;  %v4971_v59 = vld [vmem:[%s12713_s8 + $0x238] sm:$0xff]  ;;  %v4905_v7 = vld [vmem:[%s12713_s8 + $0x28] sm:$0xff] }
 0x4f1   : > { %4637 = vmatprep.subr.mxu0 %v4599_v18  ;;  %v4970_v48 = vld [vmem:[%s12713_s8 + $0x230] sm:$0xff]  ;;  %v4969_v14 = vld [vmem:[%s12713_s8 + $0x228] sm:$0xff] }
 0x4f2   : > { %4708 = vmatprep.subr.mxu1 %v4601_v57  ;;  %4638 = vmatpush1.msra.mxu0 %v4598_v27 }
 0x4f3   : > { %4709 = vmatpush1.msra.mxu1 %v4600_v55  ;;  %8259 = vmatmul.mubr.msk.f32.vlgmr.msra.gmra.mxu0 %vm4603_vm8, %v4602_v32 }
 0x4f4   : > { %8260 = vmatmul.mubr.msk.f32.vlgmr.msra.gmra.mxu1 %vm4603_vm8, %v4602_v32  ;;  %4784 = vmatprep.subr.mxu0 %v4599_v18  ;;  %v4904_v18 = vld [vmem:[%s12713_s8 + $0x20] sm:$0xff]  ;;  %v4901_v32 = vld [vmem:[%s12713_s8 + $0x8] sm:$0xff] }
 0x4f5   : > { %4855 = vmatprep.subr.mxu1 %v4601_v57  ;;  %4785 = vmatpush1.msra.mxu0 %v4598_v27  ;;  %v4903_v27 = vld [vmem:[%s12713_s8 + $0x18] sm:$0xff]  ;;  %v4902_v57 = vld [vmem:[%s12713_s8 + $0x10] sm:$0xff] }
 0x4f6   : > { %4856 = vmatpush1.msra.mxu1 %v4600_v55  ;;  %4818 = vmatprep.mubr.f32.mxu0 %v12741_v41  ;;  %v4900_v55 = vld [vmem:[%s12713_s8] sm:$0xff] }
 0x4f7   : > { %4889 = vmatprep.mubr.f32.mxu1 %v12741_v41  ;;  %8262 = vmatmul.mubr.msk.f32.vlgmr.msra.gmra.mxu0 %vm4603_vm8, %v8261_v47  ;;  %v4993_v41 = vld [vmem:[%s12713_s8 + $0x2e8] sm:$0xff] }
 0x4f8   : > { %8263 = vmatmul.mubr.msk.f32.vlgmr.msra.gmra.mxu1 %vm4603_vm8, %v8261_v47  ;;  %5004 = vmatprep.subr.mxu0 %v4931_v15  ;;  %v4963_v47 = vld [vmem:[%s12713_s8 + $0x1f8] sm:$0xff]  ;;  %v4962_v15 = vld [vmem:[%s12713_s8 + $0x1f0] sm:$0xff] }
 0x4f9   : > { %5005 = vmatpush1.msra.mxu0 %v4930_v19  ;;  %5075 = vmatprep.subr.mxu1 %v4995_v2  ;;  %v4961_v19 = vld [vmem:[%s12713_s8 + $0x1e8] sm:$0xff]  ;;  %v4960_v2 = vld [vmem:[%s12713_s8 + $0x1e0] sm:$0xff] }
 0x4fa   : > { %5006 = vmatprep.subr.mxu0 %v4929_v3  ;;  %5076 = vmatpush1.msra.mxu1 %v4994_v33  ;;  %v4959_v3 = vld [vmem:[%s12713_s8 + $0x1d8] sm:$0xff]  ;;  %v4958_v33 = vld [vmem:[%s12713_s8 + $0x1d0] sm:$0xff] }
 0x4fb   : > { %5007 = vmatpush1.msra.mxu0 %v4928_v29  ;;  %5077 = vmatprep.subr.mxu1 %v4993_v41  ;;  %v4957_v29 = vld [vmem:[%s12713_s8 + $0x1c8] sm:$0xff]  ;;  %v4956_v41 = vld [vmem:[%s12713_s8 + $0x1c0] sm:$0xff] }
 0x4fc   : > { %5008 = vmatprep.subr.mxu0 %v4927_v20  ;;  %5078 = vmatpush1.msra.mxu1 %v4992_v63  ;;  %v4955_v20 = vld [vmem:[%s12713_s8 + $0x1b8] sm:$0xff]  ;;  %v4954_v63 = vld [vmem:[%s12713_s8 + $0x1b0] sm:$0xff] }
 0x4fd   : > { %5009 = vmatpush1.msra.mxu0 %v4926_v0  ;;  %5079 = vmatprep.subr.mxu1 %v4991_v22  ;;  %v4953_v0 = vld [vmem:[%s12713_s8 + $0x1a8] sm:$0xff]  ;;  %v4952_v22 = vld [vmem:[%s12713_s8 + $0x1a0] sm:$0xff] }
 0x4fe   : > { %5010 = vmatprep.subr.mxu0 %v4925_v34  ;;  %5080 = vmatpush1.msra.mxu1 %v4990_v35  ;;  %v4951_v34 = vld [vmem:[%s12713_s8 + $0x198] sm:$0xff]  ;;  %v4950_v35 = vld [vmem:[%s12713_s8 + $0x190] sm:$0xff] }
 0x4ff   : > { %5011 = vmatpush1.msra.mxu0 %v4924_v36  ;;  %5081 = vmatprep.subr.mxu1 %v4989_v23  ;;  %v4949_v36 = vld [vmem:[%s12713_s8 + $0x188] sm:$0xff]  ;;  %v4948_v23 = vld [vmem:[%s12713_s8 + $0x180] sm:$0xff] }
 0x500   : > { %5012 = vmatprep.subr.mxu0 %v4923_v37  ;;  %5082 = vmatpush1.msra.mxu1 %v4988_v31  ;;  %v4947_v37 = vld [vmem:[%s12713_s8 + $0x178] sm:$0xff]  ;;  %v4946_v31 = vld [vmem:[%s12713_s8 + $0x170] sm:$0xff] }
 0x501   : > { %5013 = vmatpush1.msra.mxu0 %v4922_v38  ;;  %5083 = vmatprep.subr.mxu1 %v4987_v1  ;;  %v4945_v38 = vld [vmem:[%s12713_s8 + $0x168] sm:$0xff]  ;;  %v4944_v1 = vld [vmem:[%s12713_s8 + $0x160] sm:$0xff] }
 0x502   : > { %5014 = vmatprep.subr.mxu0 %v4921_v39  ;;  %5084 = vmatpush1.msra.mxu1 %v4986_v25  ;;  %v4943_v39 = vld [vmem:[%s12713_s8 + $0x158] sm:$0xff]  ;;  %v4942_v25 = vld [vmem:[%s12713_s8 + $0x150] sm:$0xff] }
 0x503   : > { %5015 = vmatpush1.msra.mxu0 %v4920_v26  ;;  %5085 = vmatprep.subr.mxu1 %v4985_v21  ;;  %v4941_v26 = vld [vmem:[%s12713_s8 + $0x148] sm:$0xff]  ;;  %v4940_v21 = vld [vmem:[%s12713_s8 + $0x140] sm:$0xff] }
 0x504   : > { %5016 = vmatprep.subr.mxu0 %v4919_v13  ;;  %5086 = vmatpush1.msra.mxu1 %v4984_v61  ;;  %v4968_v13 = vld [vmem:[%s12713_s8 + $0x220] sm:$0xff]  ;;  %v4939_v61 = vld [vmem:[%s12713_s8 + $0x138] sm:$0xff] }
 0x505   : > { %5017 = vmatpush1.msra.mxu0 %v4918_v40  ;;  %5087 = vmatprep.subr.mxu1 %v4983_v62  ;;  %v4967_v40 = vld [vmem:[%s12713_s8 + $0x218] sm:$0xff]  ;;  %v4938_v62 = vld [vmem:[%s12713_s8 + $0x130] sm:$0xff] }
 0x506   : > { %5018 = vmatprep.subr.mxu0 %v4917_v28  ;;  %5088 = vmatpush1.msra.mxu1 %v4982_v42  ;;  %v4966_v28 = vld [vmem:[%s12713_s8 + $0x210] sm:$0xff]  ;;  %v4937_v42 = vld [vmem:[%s12713_s8 + $0x128] sm:$0xff] }
 0x507   : > { %5019 = vmatpush1.msra.mxu0 %v4916_v43  ;;  %5089 = vmatprep.subr.mxu1 %v4981_v44  ;;  %v4965_v43 = vld [vmem:[%s12713_s8 + $0x208] sm:$0xff]  ;;  %v4936_v44 = vld [vmem:[%s12713_s8 + $0x120] sm:$0xff] }
 0x508   : > { %5020 = vmatprep.subr.mxu0 %v4915_v49  ;;  %5090 = vmatpush1.msra.mxu1 %v4980_v50  ;;  %v4964_v49 = vld [vmem:[%s12713_s8 + $0x200] sm:$0xff]  ;;  %v4935_v50 = vld [vmem:[%s12713_s8 + $0x118] sm:$0xff] }
 0x509   : > { %5021 = vmatpush1.msra.mxu0 %v4914_v52  ;;  %5091 = vmatprep.subr.mxu1 %v4979_v17  ;;  %v4999_v52 = vld [vmem:[%s12713_s8 + $0x318] sm:$0xff]  ;;  %v4934_v17 = vld [vmem:[%s12713_s8 + $0x110] sm:$0xff] }
 0x50a   : > { %5022 = vmatprep.subr.mxu0 %v4913_v53  ;;  %5092 = vmatpush1.msra.mxu1 %v4978_v54  ;;  %v4998_v53 = vld [vmem:[%s12713_s8 + $0x310] sm:$0xff]  ;;  %v4933_v54 = vld [vmem:[%s12713_s8 + $0x108] sm:$0xff] }
 0x50b   : > { %5023 = vmatpush1.msra.mxu0 %v4912_v58  ;;  %5093 = vmatprep.subr.mxu1 %v4977_v30  ;;  %v4997_v58 = vld [vmem:[%s12713_s8 + $0x308] sm:$0xff]  ;;  %v4932_v30 = vld [vmem:[%s12713_s8 + $0x100] sm:$0xff] }
 0x50c   : > { %5024 = vmatprep.subr.mxu0 %v4911_v8  ;;  %5094 = vmatpush1.msra.mxu1 %v4976_v60  ;;  %v4996_v8 = vld [vmem:[%s12713_s8 + $0x300] sm:$0xff]  ;;  %v8296_v60 = vld [vmem:[%s12713_s8 + $0x418] sm:$0xff] }
 0x50d   : > { %5025 = vmatpush1.msra.mxu0 %v4910_v11  ;;  %5095 = vmatprep.subr.mxu1 %v4975_v4  ;;  %v8360_v11 = vld [vmem:[%s12713_s8 + $0x618] sm:$0xff] }
 0x50e   : > { %5026 = vmatprep.subr.mxu0 %v4909_v5  ;;  %5096 = vmatpush1.msra.mxu1 %v4974_v9 }
 0x50f   : > { %5027 = vmatpush1.msra.mxu0 %v4908_v10  ;;  %5097 = vmatprep.subr.mxu1 %v4973_v24 }
 0x510   : > { %5028 = vmatprep.subr.mxu0 %v4907_v12  ;;  %5098 = vmatpush1.msra.mxu1 %v4972_v16 }
 0x511   : > { %5029 = vmatpush1.msra.mxu0 %v4906_v6  ;;  %5099 = vmatprep.subr.mxu1 %v4971_v59 }
 0x512   : > { %5030 = vmatprep.subr.mxu0 %v4905_v7  ;;  %5100 = vmatpush1.msra.mxu1 %v4970_v48 }
 0x513   : > { %5031 = vmatpush1.msra.mxu0 %v4904_v18  ;;  %5101 = vmatprep.subr.mxu1 %v4969_v14  ;;  %v8359_v18 = vld [vmem:[%s12713_s8 + $0x610] sm:$0xff] }
 0x514   : > { %5032 = vmatprep.subr.mxu0 %v4903_v27  ;;  %5102 = vmatpush1.msra.mxu1 %v4968_v13  ;;  %v8295_v27 = vld [vmem:[%s12713_s8 + $0x410] sm:$0xff]  ;;  %v8345_v13 = vld [vmem:[%s12713_s8 + $0x5a0] sm:$0xff] }
 0x515   : > { %5033 = vmatpush1.msra.mxu0 %v4902_v57  ;;  %5103 = vmatprep.subr.mxu1 %v4967_v40  ;;  %v8358_v57 = vld [vmem:[%s12713_s8 + $0x608] sm:$0xff]  ;;  %v8344_v40 = vld [vmem:[%s12713_s8 + $0x598] sm:$0xff] }
 0x516   : > { %5034 = vmatprep.subr.mxu0 %v4901_v32  ;;  %5104 = vmatpush1.msra.mxu1 %v4966_v28  ;;  %v8294_v32 = vld [vmem:[%s12713_s8 + $0x408] sm:$0xff]  ;;  %v8343_v28 = vld [vmem:[%s12713_s8 + $0x590] sm:$0xff] }
 0x517   : > { %5035 = vmatpush1.msra.mxu0 %v4900_v55  ;;  %5105 = vmatprep.subr.mxu1 %v4965_v43  ;;  %v8357_v55 = vld [vmem:[%s12713_s8 + $0x600] sm:$0xff]  ;;  %v8342_v43 = vld [vmem:[%s12713_s8 + $0x588] sm:$0xff] }
 0x518   : > { %5036 = vmatprep.subr.mxu0 %v4963_v47  ;;  %5106 = vmatpush1.msra.mxu1 %v4964_v49  ;;  %v8293_v47 = vld [vmem:[%s12713_s8 + $0x400] sm:$0xff] }
 0x519   : > { %5037 = vmatpush2.msra.mxu0 %v4962_v15  ;;  %5135 = vmatprep.subr.mxu1 %v4999_v52  ;;  %v8356_v15 = vld [vmem:[%s12713_s8 + $0x5f8] sm:$0xff]  ;;  %v8341_v49 = vld [vmem:[%s12713_s8 + $0x580] sm:$0xff] }
 0x51a   : > { %5038 = vmatprep.subr.mxu0 %v4961_v19  ;;  %5136 = vmatpush2.msra.mxu1 %v4998_v53  ;;  %v8292_v19 = vld [vmem:[%s12713_s8 + $0x3f8] sm:$0xff]  ;;  %v8339_v53 = vld [vmem:[%s12713_s8 + $0x570] sm:$0xff] }
 0x51b   : > { %5039 = vmatpush2.msra.mxu0 %v4960_v2  ;;  %5137 = vmatprep.subr.mxu1 %v4997_v58  ;;  %v8355_v2 = vld [vmem:[%s12713_s8 + $0x5f0] sm:$0xff]  ;;  %v8340_v52 = vld [vmem:[%s12713_s8 + $0x578] sm:$0xff]  ;;  %v8338_v58 = vld [vmem:[%s12713_s8 + $0x568] sm:$0xff] }
 0x51c   : > { %5040 = vmatprep.subr.mxu0 %v4959_v3  ;;  %5138 = vmatpush2.msra.mxu1 %v4996_v8  ;;  %v8291_v3 = vld [vmem:[%s12713_s8 + $0x3f0] sm:$0xff]  ;;  %v8337_v8 = vld [vmem:[%s12713_s8 + $0x560] sm:$0xff] }
 0x51d   : > { %5041 = vmatpush2.msra.mxu0 %v4958_v33  ;;  %5247 = vmatprep.subr.mxu1 %v8296_v60  ;;  %v8290_v33 = vld [vmem:[%s12713_s8 + $0x3e8] sm:$0xff]  ;;  %v8272_v60 = vld [vmem:[%s12713_s8 + $0x358] sm:$0xff] }
 0x51e   : > { %5042 = vmatprep.subr.mxu0 %v4957_v29  ;;  %v8354_v29 = vld [vmem:[%s12713_s8 + $0x5e8] sm:$0xff] }
 0x51f   : > { %5043 = vmatpush2.msra.mxu0 %v4956_v41  ;;  %v8289_v41 = vld [vmem:[%s12713_s8 + $0x3e0] sm:$0xff] }
 0x520   : > { %5044 = vmatprep.subr.mxu0 %v4955_v20  ;;  %v8353_v20 = vld [vmem:[%s12713_s8 + $0x5e0] sm:$0xff] }
 0x521   : > { %5045 = vmatpush2.msra.mxu0 %v4954_v63  ;;  %v8288_v63 = vld [vmem:[%s12713_s8 + $0x3d8] sm:$0xff] }
 0x522   : > { %5046 = vmatprep.subr.mxu0 %v4953_v0  ;;  %v8352_v0 = vld [vmem:[%s12713_s8 + $0x5d8] sm:$0xff] }
 0x523   : > { %5047 = vmatpush2.msra.mxu0 %v4952_v22  ;;  %v8287_v22 = vld [vmem:[%s12713_s8 + $0x3d0] sm:$0xff] }
 0x524   : > { %5048 = vmatprep.subr.mxu0 %v4951_v34  ;;  %v8351_v34 = vld [vmem:[%s12713_s8 + $0x5d0] sm:$0xff] }
 0x525   : > { %5049 = vmatpush2.msra.mxu0 %v4950_v35  ;;  %v8286_v35 = vld [vmem:[%s12713_s8 + $0x3c8] sm:$0xff] }
 0x526   : > { %5050 = vmatprep.subr.mxu0 %v4949_v36  ;;  %v8350_v36 = vld [vmem:[%s12713_s8 + $0x5c8] sm:$0xff] }
 0x527   : > { %5051 = vmatpush2.msra.mxu0 %v4948_v23  ;;  %v8285_v23 = vld [vmem:[%s12713_s8 + $0x3c0] sm:$0xff] }
 0x528   : > { %5052 = vmatprep.subr.mxu0 %v4947_v37  ;;  %v8349_v37 = vld [vmem:[%s12713_s8 + $0x5c0] sm:$0xff] }
 0x529   : > { %5053 = vmatpush2.msra.mxu0 %v4946_v31  ;;  %v8284_v31 = vld [vmem:[%s12713_s8 + $0x3b8] sm:$0xff] }
 0x52a   : > { %5054 = vmatprep.subr.mxu0 %v4945_v38  ;;  %v8348_v38 = vld [vmem:[%s12713_s8 + $0x5b8] sm:$0xff] }
 0x52b   : > { %5055 = vmatpush2.msra.mxu0 %v4944_v1  ;;  %v8283_v1 = vld [vmem:[%s12713_s8 + $0x3b0] sm:$0xff] }
 0x52c   : > { %5056 = vmatprep.subr.mxu0 %v4943_v39  ;;  %v8347_v39 = vld [vmem:[%s12713_s8 + $0x5b0] sm:$0xff] }
 0x52d   : > { %5057 = vmatpush2.msra.mxu0 %v4942_v25  ;;  %v8282_v25 = vld [vmem:[%s12713_s8 + $0x3a8] sm:$0xff] }
 0x52e   : > { %5058 = vmatprep.subr.mxu0 %v4941_v26  ;;  %v8346_v26 = vld [vmem:[%s12713_s8 + $0x5a8] sm:$0xff] }
 0x52f   : > { %5059 = vmatpush2.msra.mxu0 %v4940_v21  ;;  %v8281_v21 = vld [vmem:[%s12713_s8 + $0x3a0] sm:$0xff] }
 0x530   : > { %5060 = vmatprep.subr.mxu0 %v4939_v61  ;;  %v8280_v61 = vld [vmem:[%s12713_s8 + $0x398] sm:$0xff] }
 0x531   : > { %5061 = vmatpush2.msra.mxu0 %v4938_v62  ;;  %v8279_v62 = vld [vmem:[%s12713_s8 + $0x390] sm:$0xff] }
 0x532   : > { %5062 = vmatprep.subr.mxu0 %v4937_v42  ;;  %v8278_v42 = vld [vmem:[%s12713_s8 + $0x388] sm:$0xff] }
 0x533   : > { %5063 = vmatpush2.msra.mxu0 %v4936_v44  ;;  %v8277_v44 = vld [vmem:[%s12713_s8 + $0x380] sm:$0xff] }
 0x534   : > { %5064 = vmatprep.subr.mxu0 %v4935_v50  ;;  %v8276_v50 = vld [vmem:[%s12713_s8 + $0x378] sm:$0xff] }
 0x535   : > { %5065 = vmatpush2.msra.mxu0 %v4934_v17  ;;  %v8275_v17 = vld [vmem:[%s12713_s8 + $0x370] sm:$0xff] }
 0x536   : > { %5066 = vmatprep.subr.mxu0 %v4933_v54  ;;  %v8274_v54 = vld [vmem:[%s12713_s8 + $0x368] sm:$0xff] }
 0x537   : > { %5067 = vmatpush2.msra.mxu0 %v4932_v30  ;;  %v8273_v30 = vld [vmem:[%s12713_s8 + $0x360] sm:$0xff] }
 0x538   : > { %5318 = vmatprep.subr.mxu0 %v8360_v11  ;;  %v8336_v11 = vld [vmem:[%s12713_s8 + $0x558] sm:$0xff] }
 0x5b3   : > { %v4673_v4 = vpop.f32.mrf.mxu0 }
 0x5b4   : > { %v4744_v5 = vpop.f32.mrf.mxu1 }
 0x5b5   : > { %v4675_v9 = vpop.f32.mrf.mxu0 }
 0x5b6   : > { %v4746_v10 = vpop.f32.mrf.mxu1 }
 0x5b7   : > { %v4820_v24 = vpop.f32.mrf.mxu0 }
 0x5b8   : > { %v4891_v12 = vpop.f32.mrf.mxu1  ;;  %v12211_v16 = vmax.f32 %v4673_v4, %v4820_v24  ;;  %v8271_v4 = vld [vmem:[%s12713_s8 + $0x350] sm:$0xff]  ;;  %v8269_v24 = vld [vmem:[%s12713_s8 + $0x340] sm:$0xff] }
 0x5b9   : > { %v4822_v6 = vpop.f32.mrf.mxu0  ;;  %v12218_v14 = vmax.f32 %v4744_v5, %v4891_v12  ;;  %v8335_v5 = vld [vmem:[%s12713_s8 + $0x550] sm:$0xff]  ;;  %v8333_v12 = vld [vmem:[%s12713_s8 + $0x540] sm:$0xff] }
 0x5ba   : > { %v12213_v59 = vmax.f32 %v4675_v9, %v4822_v6  ;;  %v4893_v7 = vpop.f32.mrf.mxu1  ;;  %v8270_v9 = vld [vmem:[%s12713_s8 + $0x348] sm:$0xff]  ;;  %v8268_v6 = vld [vmem:[%s12713_s8 + $0x338] sm:$0xff] }
 0x5bb   : > { %v4899_v48 = vmax.f32 %v4746_v10, %v4893_v7  ;;  %v8334_v10 = vld [vmem:[%s12713_s8 + $0x548] sm:$0xff]  ;;  %v8332_v7 = vld [vmem:[%s12713_s8 + $0x538] sm:$0xff] }
 0x5bc   : > { %5068 = vmatprep.mubr.f32.mxu0 %v12213_v59 }
 0x5bd   : > { %8264 = vmatprep.mubr.msk.f32.mxu1 %vm5000_vm9, %v4899_v48  ;;  %5069 = vmatmul.mubr.f32.vlgmr.msra.gmra.mxu0 %v12211_v16 }
 0x5be   : > { %5140 = vmatmul.mubr.f32.vlgmr.msra.gmra.mxu1 %v12218_v14  ;;  %5319 = vmatpush1.msra.mxu0 %v8359_v18  ;;  %v8331_v18 = vld [vmem:[%s12713_s8 + $0x530] sm:$0xff] }
 0x5bf   : > { %5248 = vmatpush1.msra.mxu1 %v8295_v27  ;;  %5320 = vmatprep.subr.mxu0 %v8358_v57  ;;  %v8266_v27 = vld [vmem:[%s12713_s8 + $0x328] sm:$0xff] }
 0x5c0   : > { %5249 = vmatprep.subr.mxu1 %v8294_v32  ;;  %5321 = vmatpush1.msra.mxu0 %v8357_v55  ;;  %v8330_v57 = vld [vmem:[%s12713_s8 + $0x528] sm:$0xff]  ;;  %v8265_v32 = vld [vmem:[%s12713_s8 + $0x320] sm:$0xff] }
 0x5c1   : > { %5250 = vmatpush1.msra.mxu1 %v8293_v47  ;;  %5322 = vmatprep.subr.mxu0 %v8356_v15  ;;  %v8329_v55 = vld [vmem:[%s12713_s8 + $0x520] sm:$0xff]  ;;  %v8328_v47 = vld [vmem:[%s12713_s8 + $0x518] sm:$0xff] }
 0x5c2   : > { %5251 = vmatprep.subr.mxu1 %v8292_v19  ;;  %5323 = vmatpush1.msra.mxu0 %v8355_v2  ;;  %v8364_v15 = vld [vmem:[%s12713_s8 + $0x638] sm:$0xff]  ;;  %v8327_v19 = vld [vmem:[%s12713_s8 + $0x510] sm:$0xff] }
 0x5c3   : > { %5252 = vmatpush1.msra.mxu1 %v8291_v3  ;;  %8365 = vmatprep.mubr.msk.f32.mxu0 %vm5000_vm9, %v4899_v48  ;;  %v8267_v48 = vld [vmem:[%s12713_s8 + $0x330] sm:$0xff]  ;;  %v8326_v3 = vld [vmem:[%s12713_s8 + $0x508] sm:$0xff] }
 0x5c4   : > { %5253 = vmatprep.subr.mxu1 %v8290_v33  ;;  %5324 = vmatprep.subr.mxu0 %v8354_v29  ;;  %v8363_v2 = vld [vmem:[%s12713_s8 + $0x630] sm:$0xff]  ;;  %v8362_v33 = vld [vmem:[%s12713_s8 + $0x628] sm:$0xff]  ;;  %v8325_v29 = vld [vmem:[%s12713_s8 + $0x500] sm:$0xff] }
 0x5c5   : > { %5254 = vmatpush1.msra.mxu1 %v8289_v41  ;;  %5325 = vmatpush1.msra.mxu0 %v8353_v20  ;;  %v8361_v41 = vld [vmem:[%s12713_s8 + $0x620] sm:$0xff]  ;;  %v8324_v20 = vld [vmem:[%s12713_s8 + $0x4f8] sm:$0xff] }
 0x5c6   : > { %5255 = vmatprep.subr.mxu1 %v8288_v63  ;;  %5326 = vmatprep.subr.mxu0 %v8352_v0  ;;  %v8323_v63 = vld [vmem:[%s12713_s8 + $0x4f0] sm:$0xff]  ;;  %v8321_v0 = vld [vmem:[%s12713_s8 + $0x4e0] sm:$0xff] }
 0x5c7   : > { %5256 = vmatpush1.msra.mxu1 %v8287_v22  ;;  %5327 = vmatpush1.msra.mxu0 %v8351_v34  ;;  %v8320_v22 = vld [vmem:[%s12713_s8 + $0x4d8] sm:$0xff]  ;;  %v8319_v34 = vld [vmem:[%s12713_s8 + $0x4d0] sm:$0xff] }
 0x5c8   : > { %5257 = vmatprep.subr.mxu1 %v8286_v35  ;;  %5328 = vmatprep.subr.mxu0 %v8350_v36  ;;  %v8318_v35 = vld [vmem:[%s12713_s8 + $0x4c8] sm:$0xff]  ;;  %v8316_v36 = vld [vmem:[%s12713_s8 + $0x4b8] sm:$0xff] }
 0x5c9   : > { %5258 = vmatpush1.msra.mxu1 %v8285_v23  ;;  %5329 = vmatpush1.msra.mxu0 %v8349_v37  ;;  %v8315_v23 = vld [vmem:[%s12713_s8 + $0x4b0] sm:$0xff]  ;;  %v8314_v37 = vld [vmem:[%s12713_s8 + $0x4a8] sm:$0xff] }
 0x5ca   : > { %5259 = vmatprep.subr.mxu1 %v8284_v31  ;;  %5330 = vmatprep.subr.mxu0 %v8348_v38  ;;  %v8313_v31 = vld [vmem:[%s12713_s8 + $0x4a0] sm:$0xff]  ;;  %v8312_v38 = vld [vmem:[%s12713_s8 + $0x498] sm:$0xff] }
 0x5cb   : > { %5260 = vmatpush1.msra.mxu1 %v8283_v1  ;;  %5331 = vmatpush1.msra.mxu0 %v8347_v39  ;;  %v8311_v1 = vld [vmem:[%s12713_s8 + $0x490] sm:$0xff]  ;;  %v8310_v39 = vld [vmem:[%s12713_s8 + $0x488] sm:$0xff] }
 0x5cc   : > { %5261 = vmatprep.subr.mxu1 %v8282_v25  ;;  %5332 = vmatprep.subr.mxu0 %v8346_v26  ;;  %v8309_v25 = vld [vmem:[%s12713_s8 + $0x480] sm:$0xff]  ;;  %v8308_v26 = vld [vmem:[%s12713_s8 + $0x478] sm:$0xff] }
 0x5cd   : > { %5262 = vmatpush1.msra.mxu1 %v8281_v21  ;;  %5333 = vmatpush1.msra.mxu0 %v8345_v13  ;;  %v8307_v21 = vld [vmem:[%s12713_s8 + $0x470] sm:$0xff]  ;;  %v8306_v13 = vld [vmem:[%s12713_s8 + $0x468] sm:$0xff] }
 0x5ce   : > { %5263 = vmatprep.subr.mxu1 %v8280_v61  ;;  %5334 = vmatprep.subr.mxu0 %v8344_v40  ;;  %v8305_v61 = vld [vmem:[%s12713_s8 + $0x460] sm:$0xff]  ;;  %v8304_v40 = vld [vmem:[%s12713_s8 + $0x458] sm:$0xff] }
 0x5cf   : > { %5264 = vmatpush1.msra.mxu1 %v8279_v62  ;;  %5335 = vmatpush1.msra.mxu0 %v8343_v28  ;;  %v8303_v62 = vld [vmem:[%s12713_s8 + $0x450] sm:$0xff]  ;;  %v8302_v28 = vld [vmem:[%s12713_s8 + $0x448] sm:$0xff] }
 0x5d0   : > { %5265 = vmatprep.subr.mxu1 %v8278_v42  ;;  %5336 = vmatprep.subr.mxu0 %v8342_v43  ;;  %v8301_v42 = vld [vmem:[%s12713_s8 + $0x440] sm:$0xff]  ;;  %v8300_v43 = vld [vmem:[%s12713_s8 + $0x438] sm:$0xff] }
 0x5d1   : > { %5266 = vmatpush1.msra.mxu1 %v8277_v44  ;;  %5337 = vmatpush1.msra.mxu0 %v8341_v49  ;;  %v8299_v44 = vld [vmem:[%s12713_s8 + $0x430] sm:$0xff]  ;;  %v8298_v49 = vld [vmem:[%s12713_s8 + $0x428] sm:$0xff] }
 0x5d2   : > { %5267 = vmatprep.subr.mxu1 %v8276_v50  ;;  %5338 = vmatprep.subr.mxu0 %v8340_v52  ;;  %v8297_v50 = vld [vmem:[%s12713_s8 + $0x420] sm:$0xff] }
 0x5d3   : > { %5268 = vmatpush1.msra.mxu1 %v8275_v17  ;;  %5339 = vmatpush1.msra.mxu0 %v8339_v53  ;;  %v9236_v52 = vld [vmem:[#allocation2 + $0x270] ss:$16 sps:$4 sm:$0xff]   ;;  %v9238_v17 = vld [vmem:[#allocation2 + $0x274] ss:$16 sps:$4 sm:$0xff]   ;;  %v9239_v53 = vld [vmem:[#allocation2 + $0x278] ss:$16 sps:$4 sm:$0xff]  }
 0x5d4   : > { %5269 = vmatprep.subr.mxu1 %v8274_v54  ;;  %5340 = vmatprep.subr.mxu0 %v8338_v58  ;;  %v9241_v54 = vld [vmem:[#allocation2 + $0x27c] ss:$16 sps:$4 sm:$0xff]   ;;  %v9244_v58 = vld [vmem:[#allocation2 + $0x254] ss:$16 sps:$4 sm:$0xff]  }
 0x5d5   : > { %5270 = vmatpush1.msra.mxu1 %v8273_v30  ;;  %5341 = vmatpush1.msra.mxu0 %v8337_v8  ;;  %v9247_v30 = vld [vmem:[#allocation2 + $0x25c] ss:$16 sps:$4 sm:$0xff]   ;;  %v9242_v8 = vld [vmem:[#allocation2 + $0x250] ss:$16 sps:$4 sm:$0xff]  }
 0x5d6   : > { %5271 = vmatprep.subr.mxu1 %v8272_v60  ;;  %5342 = vmatprep.subr.mxu0 %v8336_v11  ;;  %v9245_v60 = vld [vmem:[#allocation2 + $0x258] ss:$16 sps:$4 sm:$0xff]   ;;  %v9250_v11 = vld [vmem:[#allocation2 + $0x234] ss:$16 sps:$4 sm:$0xff]  }
 0x5d7   : > { %5272 = vmatpush1.msra.mxu1 %v8271_v4  ;;  %5343 = vmatpush1.msra.mxu0 %v8335_v5  ;;  %v9253_v4 = vld [vmem:[#allocation2 + $0x23c] ss:$16 sps:$4 sm:$0xff]   ;;  %v9248_v5 = vld [vmem:[#allocation2 + $0x230] ss:$16 sps:$4 sm:$0xff]  }
 0x5d8   : > { %5273 = vmatprep.subr.mxu1 %v8270_v9  ;;  %5344 = vmatprep.subr.mxu0 %v8334_v10  ;;  %v9256_v9 = vld [vmem:[#allocation2 + $0x214] ss:$16 sps:$4 sm:$0xff]   ;;  %v9259_v10 = vld [vmem:[#allocation2 + $0x21c] ss:$16 sps:$4 sm:$0xff]  }
 0x5d9   : > { %5274 = vmatpush1.msra.mxu1 %v8269_v24  ;;  %5345 = vmatpush1.msra.mxu0 %v8333_v12  ;;  %v9254_v24 = vld [vmem:[#allocation2 + $0x210] ss:$16 sps:$4 sm:$0xff]   ;;  %v9257_v12 = vld [vmem:[#allocation2 + $0x218] ss:$16 sps:$4 sm:$0xff]  }
 0x5da   : > { %5275 = vmatprep.subr.mxu1 %v8268_v6  ;;  %5346 = vmatprep.subr.mxu0 %v8332_v7  ;;  %v9260_v6 = vld [vmem:[#allocation2 + $0x1f0] ss:$16 sps:$4 sm:$0xff]   ;;  %v9262_v7 = vld [vmem:[#allocation2 + $0x1f4] ss:$16 sps:$4 sm:$0xff]  }
 0x5db   : > { %5276 = vmatpush1.msra.mxu1 %v8267_v48  ;;  %5347 = vmatpush1.msra.mxu0 %v8331_v18  ;;  %v9263_v48 = vld [vmem:[#allocation2 + $0x1f8] ss:$16 sps:$4 sm:$0xff]   ;;  %v9265_v18 = vld [vmem:[#allocation2 + $0x1fc] ss:$16 sps:$4 sm:$0xff]  }
 0x5dc   : > { %5277 = vmatprep.subr.mxu1 %v8266_v27  ;;  %5348 = vmatprep.subr.mxu0 %v8330_v57  ;;  %v9268_v27 = vld [vmem:[#allocation2 + $0x1d4] ss:$16 sps:$4 sm:$0xff]   ;;  %v9271_v57 = vld [vmem:[#allocation2 + $0x1dc] ss:$16 sps:$4 sm:$0xff]  }
 0x5dd   : > { %5278 = vmatpush1.msra.mxu1 %v8265_v32  ;;  %5349 = vmatpush1.msra.mxu0 %v8329_v55  ;;  %v9266_v32 = vld [vmem:[#allocation2 + $0x1d0] ss:$16 sps:$4 sm:$0xff]   ;;  %v9269_v55 = vld [vmem:[#allocation2 + $0x1d8] ss:$16 sps:$4 sm:$0xff]  }
 0x5de   : > { %5279 = vmatprep.subr.mxu1 %v8328_v47  ;;  %5378 = vmatprep.subr.mxu0 %v8364_v15  ;;  %v9274_v47 = vld [vmem:[#allocation2 + $0x1b4] ss:$16 sps:$4 sm:$0xff]   ;;  %v9277_v15 = vld [vmem:[#allocation2 + $0x1bc] ss:$16 sps:$4 sm:$0xff]  }
 0x5df   : > { %5280 = vmatpush2.msra.mxu1 %v8327_v19  ;;  %5311 = vmatprep.mubr.f32.mxu1 %v12213_v59  ;;  %v8322_v59 = vld [vmem:[%s12713_s8 + $0x4e8] sm:$0xff]  ;;  %v9272_v19 = vld [vmem:[#allocation2 + $0x1b0] ss:$16 sps:$4 sm:$0xff]  }
 0x5e0   : > { %5379 = vmatpush2.msra.mxu0 %v8363_v2  ;;  %5281 = vmatprep.subr.mxu1 %v8326_v3  ;;  %v9275_v2 = vld [vmem:[#allocation2 + $0x1b8] ss:$16 sps:$4 sm:$0xff]   ;;  %v9280_v3 = vld [vmem:[#allocation2 + $0x194] ss:$16 sps:$4 sm:$0xff]  }
 0x5e1   : > { %5380 = vmatprep.subr.mxu0 %v8362_v33  ;;  %5282 = vmatpush2.msra.mxu1 %v8325_v29  ;;  %v9283_v33 = vld [vmem:[#allocation2 + $0x19c] ss:$16 sps:$4 sm:$0xff]   ;;  %v5492_v29 = vld [vmem:[#allocation2 + $0x310] sm:$0xff] }
 0x5e2   : > { %5381 = vmatpush2.msra.mxu0 %v8361_v41  ;;  %5283 = vmatprep.subr.mxu1 %v8324_v20  ;;  %v5493_v41 = vld [vmem:[#allocation2 + $0x318] sm:$0xff]  ;;  %v9278_v20 = vld [vmem:[#allocation2 + $0x190] ss:$16 sps:$4 sm:$0xff]  }
 0x5e3   : > { %5383 = vmatmul.mubr.f32.vlgmr.msra.gmra.mxu0 %v12218_v14  ;;  %5284 = vmatpush2.msra.mxu1 %v8323_v63  ;;  %v8317_v14 = vld [vmem:[%s12713_s8 + $0x4c0] sm:$0xff]  ;;  %v9281_v63 = vld [vmem:[#allocation2 + $0x198] ss:$16 sps:$4 sm:$0xff]  }
 0x5e4   : > { %5285 = vmatprep.subr.mxu1 %v8322_v59  ;;  %5768 = vmatprep.subr.bf16.mxu0 %v9238_v17  ;;  %v8415_v59 = vcombine.high %v5492_v29, %v5492_v29 }
 0x5e5   : > { %5286 = vmatpush2.msra.mxu1 %v8321_v0  ;;  %5769 = vmatpush1.bf16.msra.mxu0 %v9236_v52  ;;  %v8414_v0 = vcombine.low %v5492_v29, %v5492_v29  ;;  %v9338_v29 = vld [vmem:[#allocation2 + $0x64] ss:$16 sps:$4 sm:$0xff]  }
 0x5e6   : > { %5287 = vmatprep.subr.mxu1 %v8320_v22  ;;  %5770 = vmatprep.subr.bf16.mxu0 %v9244_v58  ;;  %v8417_v22 = vcombine.high %v5493_v41, %v5493_v41 }
 0x5e7   : > { %5288 = vmatpush2.msra.mxu1 %v8319_v34  ;;  %v8416_v34 = vcombine.low %v5493_v41, %v5493_v41  ;;  %v9341_v41 = vld [vmem:[#allocation2 + $0x6c] ss:$16 sps:$4 sm:$0xff]  }
 0x5e8   : > { %5289 = vmatprep.subr.mxu1 %v8318_v35  ;;  %v5757_v35 = vsel %vm5755_vm10, %v8414_v0, 0  ;;  %v9347_v0 = vld [vmem:[#allocation2 + $0x4c] ss:$16 sps:$4 sm:$0xff]  }
 0x5e9   : > { %5290 = vmatpush2.msra.mxu1 %v8317_v14  ;;  %5771 = vmatpush1.bf16.msra.mxu0 %v9242_v8  ;;  %v9290_v14 = vld [vmem:[#allocation2 + $0x2f4] ss:$16 sps:$4 sm:$0xff]  }
 0x5ea   : > { %5291 = vmatprep.subr.mxu1 %v8316_v36  ;;  %5772 = vmatprep.subr.bf16.mxu0 %v9250_v11  ;;  %v5763_v36 = vsel %vm5755_vm10, %v8416_v34, 0  ;;  %v9345_v34 = vld [vmem:[#allocation2 + $0x48] ss:$16 sps:$4 sm:$0xff]  }
 0x5eb   : > { %5292 = vmatpush2.msra.mxu1 %v8315_v23  ;;  %v9293_v23 = vld [vmem:[#allocation2 + $0x2fc] ss:$16 sps:$4 sm:$0xff]  }
 0x5ec   : > { %5293 = vmatprep.subr.mxu1 %v8314_v37  ;;  %v9288_v37 = vld [vmem:[#allocation2 + $0x2f0] ss:$16 sps:$4 sm:$0xff]  }
 0x5ed   : > { %5294 = vmatpush2.msra.mxu1 %v8313_v31  ;;  %5773 = vmatpush1.bf16.msra.mxu0 %v9248_v5  ;;  %v9291_v31 = vld [vmem:[#allocation2 + $0x2f8] ss:$16 sps:$4 sm:$0xff]  }
 0x5ee   : > { %5295 = vmatprep.subr.mxu1 %v8312_v38  ;;  %5774 = vmatprep.subr.bf16.mxu0 %v9256_v9  ;;  %v9296_v38 = vld [vmem:[#allocation2 + $0x2d4] ss:$16 sps:$4 sm:$0xff]  }
 0x5ef   : > { %5296 = vmatpush2.msra.mxu1 %v8311_v1  ;;  %v9299_v1 = vld [vmem:[#allocation2 + $0x2dc] ss:$16 sps:$4 sm:$0xff]  }
 0x5f0   : > { %5297 = vmatprep.subr.mxu1 %v8310_v39  ;;  %v9294_v39 = vld [vmem:[#allocation2 + $0x2d0] ss:$16 sps:$4 sm:$0xff]  }
 0x5f1   : > { %5298 = vmatpush2.msra.mxu1 %v8309_v25  ;;  %5775 = vmatpush1.bf16.msra.mxu0 %v9254_v24  ;;  %v9297_v25 = vld [vmem:[#allocation2 + $0x2d8] ss:$16 sps:$4 sm:$0xff]  }
 0x5f2   : > { %5299 = vmatprep.subr.mxu1 %v8308_v26  ;;  %5776 = vmatprep.subr.bf16.mxu0 %v9262_v7  ;;  %v9300_v26 = vld [vmem:[#allocation2 + $0x2b0] ss:$16 sps:$4 sm:$0xff]  }
 0x5f3   : > { %5300 = vmatpush2.msra.mxu1 %v8307_v21  ;;  %v9302_v21 = vld [vmem:[#allocation2 + $0x2b4] ss:$16 sps:$4 sm:$0xff]  }
 0x5f4   : > { %5301 = vmatprep.subr.mxu1 %v8306_v13  ;;  %v9303_v13 = vld [vmem:[#allocation2 + $0x2b8] ss:$16 sps:$4 sm:$0xff]  }
 0x5f5   : > { %5302 = vmatpush2.msra.mxu1 %v8305_v61  ;;  %5777 = vmatpush1.bf16.msra.mxu0 %v9260_v6  ;;  %v9305_v61 = vld [vmem:[#allocation2 + $0x2bc] ss:$16 sps:$4 sm:$0xff]   ;;  %v9315_v6 = vld [vmem:[#allocation2 + $0xe8] ss:$16 sps:$4 sm:$0xff]  }
 0x5f6   : > { %5303 = vmatprep.subr.mxu1 %v8304_v40  ;;  %5778 = vmatprep.subr.bf16.mxu0 %v9268_v27  ;;  %v9308_v40 = vld [vmem:[#allocation2 + $0x294] ss:$16 sps:$4 sm:$0xff]   ;;  %v9318_v27 = vld [vmem:[#allocation2 + $0xc0] ss:$16 sps:$4 sm:$0xff]  }
 0x5f7   : > { %5304 = vmatpush2.msra.mxu1 %v8303_v62  ;;  %v9311_v62 = vld [vmem:[#allocation2 + $0x29c] ss:$16 sps:$4 sm:$0xff]  }
 0x5f8   : > { %5305 = vmatprep.subr.mxu1 %v8302_v28  ;;  %v9306_v28 = vld [vmem:[#allocation2 + $0x290] ss:$16 sps:$4 sm:$0xff]  }
 0x5f9   : > { %5306 = vmatpush2.msra.mxu1 %v8301_v42  ;;  %5779 = vmatpush1.bf16.msra.mxu0 %v9266_v32  ;;  %v9309_v42 = vld [vmem:[#allocation2 + $0x298] ss:$16 sps:$4 sm:$0xff]   ;;  %v9326_v32 = vld [vmem:[#allocation2 + $0xa4] ss:$16 sps:$4 sm:$0xff]  }
 0x5fa   : > { %5307 = vmatprep.subr.mxu1 %v8300_v43  ;;  %5780 = vmatprep.subr.bf16.mxu0 %v9274_v47  ;;  %v9314_v43 = vld [vmem:[#allocation2 + $0xe4] ss:$16 sps:$4 sm:$0xff]   ;;  %v9324_v47 = vld [vmem:[#allocation2 + $0xa0] ss:$16 sps:$4 sm:$0xff]  }
 0x5fb   : > { %5308 = vmatpush2.msra.mxu1 %v8299_v44  ;;  %v9317_v44 = vld [vmem:[#allocation2 + $0xec] ss:$16 sps:$4 sm:$0xff]  }
 0x5fc   : > { %5309 = vmatprep.subr.mxu1 %v8298_v49 }
 0x5fd   : > { %5310 = vmatpush2.msra.mxu1 %v8297_v50  ;;  %5781 = vmatpush1.bf16.msra.mxu0 %v9272_v19  ;;  %v9332_v19 = vld [vmem:[#allocation2 + $0x84] ss:$16 sps:$4 sm:$0xff]  }
 0x5fe   : > { %5312 = vmatmul.mubr.f32.vlgmr.msra.gmra.mxu1 %v12211_v16  ;;  %5809 = vmatprep.subr.bf16.mxu1 %v9241_v54  ;;  %v9251_v16 = vld [vmem:[#allocation2 + $0x238] ss:$16 sps:$4 sm:$0xff]  }
 0x5ff   : > { %5810 = vmatpush1.bf16.msra.mxu1 %v9239_v53  ;;  %5782 = vmatprep.subr.bf16.mxu0 %v9280_v3  ;;  %v9330_v3 = vld [vmem:[#allocation2 + $0x80] ss:$16 sps:$4 sm:$0xff]  }
 0x600   : > { %5811 = vmatprep.subr.bf16.mxu1 %v9247_v30 }
 0x601   : > { %5783 = vmatpush1.bf16.msra.mxu0 %v9278_v20  ;;  %v9336_v20 = vld [vmem:[#allocation2 + $0x60] ss:$16 sps:$4 sm:$0xff]  }
 0x602   : > { %8418 = vmatprep.subr.msk.bf16.mxu0 %vm5755_vm10, %v8415_v59  ;;  %v9344_v59 = vld [vmem:[#allocation2 + $0x44] ss:$16 sps:$4 sm:$0xff]  }
 0x603   : > { %5812 = vmatpush1.bf16.msra.mxu1 %v9245_v60 }
 0x604   : > { %5813 = vmatprep.subr.bf16.mxu1 %v9253_v4 }
 0x605   : > { %5791 = vmatpush2.bf16.msra.mxu0 %v5757_v35  ;;  %v9350_v35 = vld [vmem:[#allocation2 + $0x24] ss:$16 sps:$4 sm:$0xff]  }
 0x606   : > { %5792 = vmatprep.subr.bf16.mxu0 %v9290_v14  ;;  %v9353_v14 = vld [vmem:[#allocation2 + $0x2c] ss:$16 sps:$4 sm:$0xff]  }
 0x607   : > { %5814 = vmatpush1.bf16.msra.mxu1 %v9251_v16 }
 0x608   : > { %5815 = vmatprep.subr.bf16.mxu1 %v9259_v10 }
 0x609   : > { %5793 = vmatpush2.bf16.msra.mxu0 %v9288_v37  ;;  %v9356_v37 = vld [vmem:[#allocation2 + $0x4] ss:$16 sps:$4 sm:$0xff]  }
 0x60a   : > { %5794 = vmatprep.subr.bf16.mxu0 %v9296_v38  ;;  %v5441_v38 = vld [vmem:[#allocation2 + $0x180] sm:$0xff] }
 0x60b   : > { %5816 = vmatpush1.bf16.msra.mxu1 %v9257_v12  ;;  %v9312_v12 = vld [vmem:[#allocation2 + $0xe0] ss:$16 sps:$4 sm:$0xff]  }
 0x60c   : > { %5817 = vmatprep.subr.bf16.mxu1 %v9265_v18  ;;  %v9323_v18 = vld [vmem:[#allocation2 + $0xcc] ss:$16 sps:$4 sm:$0xff]  }
 0x60d   : > { %5795 = vmatpush2.bf16.msra.mxu0 %v9294_v39  ;;  %v9354_v39 = vld [vmem:[#allocation2] ss:$16 sps:$4 sm:$0xff]  }
 0x60e   : > { %5796 = vmatprep.subr.bf16.mxu0 %v9302_v21 }
 0x60f   : > { %5818 = vmatpush1.bf16.msra.mxu1 %v9263_v48  ;;  %v9320_v48 = vld [vmem:[#allocation2 + $0xc4] ss:$16 sps:$4 sm:$0xff]  }
 0x610   : > { %5819 = vmatprep.subr.bf16.mxu1 %v9271_v57  ;;  %v9321_v57 = vld [vmem:[#allocation2 + $0xc8] ss:$16 sps:$4 sm:$0xff]  }
 0x611   : > { %5797 = vmatpush2.bf16.msra.mxu0 %v9300_v26  ;;  %v8471_v26 = vcombine.high %v5441_v38, %v5441_v38 }
 0x612   : > { %5798 = vmatprep.subr.bf16.mxu0 %v9308_v40 }
 0x613   : > { %5820 = vmatpush1.bf16.msra.mxu1 %v9269_v55  ;;  %v9329_v55 = vld [vmem:[#allocation2 + $0xac] ss:$16 sps:$4 sm:$0xff]  }
 0x614   : > { %5821 = vmatprep.subr.bf16.mxu1 %v9277_v15  ;;  %v9327_v15 = vld [vmem:[#allocation2 + $0xa8] ss:$16 sps:$4 sm:$0xff]  }
 0x615   : > { %5799 = vmatpush2.bf16.msra.mxu0 %v9306_v28  ;;  %v9366_v28 = vld [vmem:[#allocation2 + $0x164] ss:$16 sps:$4 sm:$0xff]  }
 0x616   : > { %6114 = vmatprep.subr.bf16.mxu0 %v9314_v43  ;;  %v9364_v43 = vld [vmem:[#allocation2 + $0x160] ss:$16 sps:$4 sm:$0xff]  }
 0x617   : > { %5822 = vmatpush1.bf16.msra.mxu1 %v9275_v2  ;;  %v9335_v2 = vld [vmem:[#allocation2 + $0x8c] ss:$16 sps:$4 sm:$0xff]  }
 0x618   : > { %5823 = vmatprep.subr.bf16.mxu1 %v9283_v33  ;;  %v9333_v33 = vld [vmem:[#allocation2 + $0x88] ss:$16 sps:$4 sm:$0xff]  }
 0x61b   : > { %5824 = vmatpush1.bf16.msra.mxu1 %v9281_v63  ;;  %v9339_v63 = vld [vmem:[#allocation2 + $0x68] ss:$16 sps:$4 sm:$0xff]  }
 0x61c   : > { %8420 = vmatprep.subr.msk.bf16.mxu1 %vm5755_vm10, %v8417_v22  ;;  %v9342_v22 = vld [vmem:[#allocation2 + $0x40] ss:$16 sps:$4 sm:$0xff]  }
 0x61f   : > { %5832 = vmatpush2.bf16.msra.mxu1 %v5763_v36  ;;  %v9348_v36 = vld [vmem:[#allocation2 + $0x20] ss:$16 sps:$4 sm:$0xff]  }
 0x620   : > { %5833 = vmatprep.subr.bf16.mxu1 %v9293_v23  ;;  %v9351_v23 = vld [vmem:[#allocation2 + $0x28] ss:$16 sps:$4 sm:$0xff]  }
 0x623   : > { %5834 = vmatpush2.bf16.msra.mxu1 %v9291_v31  ;;  %v9359_v31 = vld [vmem:[#allocation2 + $0xc] ss:$16 sps:$4 sm:$0xff]  }
 0x624   : > { %5835 = vmatprep.subr.bf16.mxu1 %v9299_v1  ;;  %v5442_v1 = vld [vmem:[#allocation2 + $0x188] sm:$0xff] }
 0x625   : > { %v8473_v21 = vcombine.high %v5442_v1, %v5442_v1 }
 0x627   : > { %5836 = vmatpush2.bf16.msra.mxu1 %v9297_v25  ;;  %v9357_v25 = vld [vmem:[#allocation2 + $0x8] ss:$16 sps:$4 sm:$0xff]  }
 0x628   : > { %5837 = vmatprep.subr.bf16.mxu1 %v9305_v61  ;;  %v8472_v61 = vcombine.low %v5442_v1, %v5442_v1  ;;  %v6246_v1 = vld [vmem:[#allocation2 + $0x4a8] sm:$0xff] }
 0x62b   : > { %5838 = vmatpush2.bf16.msra.mxu1 %v9303_v13  ;;  %v8470_v13 = vcombine.low %v5441_v38, %v5441_v38  ;;  %v6245_v38 = vld [vmem:[#allocation2 + $0x4a0] sm:$0xff] }
 0x62c   : > { %5839 = vmatprep.subr.bf16.mxu1 %v9311_v62  ;;  %v6109_v62 = vsel %vm5755_vm10, %v8472_v61, 0  ;;  %v8528_v61 = vcombine.low %v6246_v1, %v6246_v1 }
 0x62d   : > { %v6103_v40 = vsel %vm5755_vm10, %v8470_v13, 0  ;;  %v8529_v13 = vcombine.high %v6246_v1, %v6246_v1  ;;  %v9506_v1 = vld [vmem:[#allocation2 + $0x4b0] ss:$16 sps:$4 sm:$0xff]  }
 0x62f   : > { %5840 = vmatpush2.bf16.msra.mxu1 %v9309_v42  ;;  %v9369_v42 = vld [vmem:[#allocation2 + $0x16c] ss:$16 sps:$4 sm:$0xff]  }
 0x630   : > { %6155 = vmatprep.subr.bf16.mxu1 %v9317_v44  ;;  %v9367_v44 = vld [vmem:[#allocation2 + $0x168] ss:$16 sps:$4 sm:$0xff]  }
 0x67d   : > { %v5070_v49 = vpop.f32.mrf.mxu0 }
 0x67e   : > { %v5141_v50 = vpop.f32.mrf.mxu1 }
 0x67f   : > { %v5072_v52 = vpop.f32.mrf.mxu0  ;;  %v5142_v58 = vadd.f32 %v5141_v50, %v5070_v49  ;;  %v9372_v49 = vld [vmem:[#allocation2 + $0x144] ss:$16 sps:$4 sm:$0xff]   ;;  %v9375_v50 = vld [vmem:[#allocation2 + $0x14c] ss:$16 sps:$4 sm:$0xff]  }
 0x680   : > { %v5143_v17 = vpop.f32.mrf.mxu1 }
 0x681   : > { %v5144_v11 = vadd.f32 %v5143_v17, %v5072_v52  ;;  %v9370_v52 = vld [vmem:[#allocation2 + $0x140] ss:$16 sps:$4 sm:$0xff]   ;;  %v9373_v17 = vld [vmem:[#allocation2 + $0x148] ss:$16 sps:$4 sm:$0xff]  }
 0x6a3   : > { %v5384_v53 = vpop.f32.mrf.mxu0 }
 0x6a5   : > { %v5386_v8 = vpop.f32.mrf.mxu0 }
 0x6be   : > { %v5313_v54 = vpop.f32.mrf.mxu1 }
 0x6bf   : > { %v5385_v30 = vadd.f32 %v5384_v53, %v5313_v54  ;;  %v9378_v53 = vld [vmem:[#allocation2 + $0x124] ss:$16 sps:$4 sm:$0xff]   ;;  %v9381_v54 = vld [vmem:[#allocation2 + $0x12c] ss:$16 sps:$4 sm:$0xff]  }
 0x6c0   : > { %v5315_v60 = vpop.f32.mrf.mxu1 }
 0x6c1   : > { %v5389_v4 = vmax.f32 %v5142_v58, %v5385_v30  ;;  %v5387_v5 = vadd.f32 %v5386_v8, %v5315_v60  ;;  %v9376_v58 = vld [vmem:[#allocation2 + $0x120] ss:$16 sps:$4 sm:$0xff]   ;;  %v9379_v30 = vld [vmem:[#allocation2 + $0x128] ss:$16 sps:$4 sm:$0xff]   ;;  %v9384_v8 = vld [vmem:[#allocation2 + $0x104] ss:$16 sps:$4 sm:$0xff]  }
 0x6c2   : > { %v9387_v60 = vld [vmem:[#allocation2 + $0x10c] ss:$16 sps:$4 sm:$0xff]  }
 0x6c3   : > { %v5390_v16 = vmax.f32 %v5144_v11, %v5387_v5  ;;  %v12523_v9 = vpack.c.bf16 %v5389_v4, %v5389_v4  ;;  %v9382_v11 = vld [vmem:[#allocation2 + $0x100] ss:$16 sps:$4 sm:$0xff]   ;;  %v9385_v4 = vld [vmem:[#allocation2 + $0x108] ss:$16 sps:$4 sm:$0xff]   ;;  %v9390_v5 = vld [vmem:[#allocation2 + $0x404] ss:$16 sps:$4 sm:$0xff]  }
 0x6c5   : > { %v12525_v10 = vpack.c.bf16 %v5390_v16, %v5390_v16  ;;  %v12531_v7 = vshrl.u32 %v12523_v9, 16  ;;  %v9393_v16 = vld [vmem:[#allocation2 + $0x40c] ss:$16 sps:$4 sm:$0xff]  }
 0x6c7   : > { %v12528_v24 = vshrl.u32 %v12525_v10, 16 }
 0x6c9   : > { %8419 = vmatprep.mubr.msk.bf16.mxu0 %vm5751_vm11, %v12528_v24  ;;  %8421 = vmatprep.mubr.msk.bf16.mxu1 %vm5751_vm11, %v12528_v24 }
 0x6ca   : > { %5801 = vmatmul.mubr.bf16.vlgmr.msra.gmra.mxu0 %v12531_v7  ;;  %5842 = vmatmul.mubr.bf16.vlgmr.msra.gmra.mxu1 %v12531_v7 }
 0x6cb   : > { %6115 = vmatpush1.bf16.msra.mxu0 %v9312_v12  ;;  %6156 = vmatpush1.bf16.msra.mxu1 %v9315_v6  ;;  %v9388_v12 = vld [vmem:[#allocation2 + $0x400] ss:$16 sps:$4 sm:$0xff]   ;;  %v9391_v6 = vld [vmem:[#allocation2 + $0x408] ss:$16 sps:$4 sm:$0xff]  }
 0x6cc   : > { %8475 = vmatprep.mubr.msk.bf16.mxu0 %vm5751_vm11, %v12525_v10  ;;  %8477 = vmatprep.mubr.msk.bf16.mxu1 %vm5751_vm11, %v12525_v10 }
 0x6cd   : > { %6116 = vmatprep.subr.bf16.mxu0 %v9320_v48  ;;  %6157 = vmatprep.subr.bf16.mxu1 %v9323_v18  ;;  %v6250_v48 = vrot.slane %v12525_v10, 1  ;;  %v9396_v18 = vld [vmem:[#allocation2 + $0x3e4] ss:$16 sps:$4 sm:$0xff]   ;;  %v9400_v10 = vld [vmem:[#allocation2 + $0x3c0] ss:$16 sps:$4 sm:$0xff]  }
 0x6cf   : > { %6117 = vmatpush1.bf16.msra.mxu0 %v9318_v27  ;;  %6158 = vmatpush1.bf16.msra.mxu1 %v9321_v57  ;;  %v9399_v27 = vld [vmem:[#allocation2 + $0x3ec] ss:$16 sps:$4 sm:$0xff]   ;;  %v9394_v57 = vld [vmem:[#allocation2 + $0x3e0] ss:$16 sps:$4 sm:$0xff]  }
 0x6d0   : > { %6118 = vmatprep.subr.bf16.mxu0 %v9326_v32  ;;  %6159 = vmatprep.subr.bf16.mxu1 %v9329_v55  ;;  %v9397_v32 = vld [vmem:[#allocation2 + $0x3e8] ss:$16 sps:$4 sm:$0xff]   ;;  %v9402_v55 = vld [vmem:[#allocation2 + $0x3c4] ss:$16 sps:$4 sm:$0xff]  }
 0x6d3   : > { %6119 = vmatpush1.bf16.msra.mxu0 %v9324_v47  ;;  %6160 = vmatpush1.bf16.msra.mxu1 %v9327_v15  ;;  %v9405_v47 = vld [vmem:[#allocation2 + $0x3cc] ss:$16 sps:$4 sm:$0xff]   ;;  %v9403_v15 = vld [vmem:[#allocation2 + $0x3c8] ss:$16 sps:$4 sm:$0xff]  }
 0x6d4   : > { %6120 = vmatprep.subr.bf16.mxu0 %v9332_v19  ;;  %6161 = vmatprep.subr.bf16.mxu1 %v9335_v2  ;;  %v9408_v19 = vld [vmem:[#allocation2 + $0x3a4] ss:$16 sps:$4 sm:$0xff]   ;;  %v9411_v2 = vld [vmem:[#allocation2 + $0x3ac] ss:$16 sps:$4 sm:$0xff]  }
 0x6d7   : > { %6121 = vmatpush1.bf16.msra.mxu0 %v9330_v3  ;;  %6162 = vmatpush1.bf16.msra.mxu1 %v9333_v33  ;;  %v9406_v3 = vld [vmem:[#allocation2 + $0x3a0] ss:$16 sps:$4 sm:$0xff]   ;;  %v9409_v33 = vld [vmem:[#allocation2 + $0x3a8] ss:$16 sps:$4 sm:$0xff]  }
 0x6d8   : > { %6122 = vmatprep.subr.bf16.mxu0 %v9338_v29  ;;  %6163 = vmatprep.subr.bf16.mxu1 %v9341_v41  ;;  %v9414_v29 = vld [vmem:[#allocation2 + $0x384] ss:$16 sps:$4 sm:$0xff]   ;;  %v9417_v41 = vld [vmem:[#allocation2 + $0x38c] ss:$16 sps:$4 sm:$0xff]  }
 0x6db   : > { %6123 = vmatpush1.bf16.msra.mxu0 %v9336_v20  ;;  %6164 = vmatpush1.bf16.msra.mxu1 %v9339_v63  ;;  %v9412_v20 = vld [vmem:[#allocation2 + $0x380] ss:$16 sps:$4 sm:$0xff]   ;;  %v9415_v63 = vld [vmem:[#allocation2 + $0x388] ss:$16 sps:$4 sm:$0xff]  }
 0x6dc   : > { %6124 = vmatprep.subr.bf16.mxu0 %v9344_v59  ;;  %6165 = vmatprep.subr.bf16.mxu1 %v9347_v0  ;;  %v9420_v59 = vld [vmem:[#allocation2 + $0x364] ss:$16 sps:$4 sm:$0xff]   ;;  %v9423_v0 = vld [vmem:[#allocation2 + $0x36c] ss:$16 sps:$4 sm:$0xff]  }
 0x6df   : > { %6125 = vmatpush1.bf16.msra.mxu0 %v9342_v22  ;;  %6166 = vmatpush1.bf16.msra.mxu1 %v9345_v34  ;;  %v9418_v22 = vld [vmem:[#allocation2 + $0x360] ss:$16 sps:$4 sm:$0xff]   ;;  %v9421_v34 = vld [vmem:[#allocation2 + $0x368] ss:$16 sps:$4 sm:$0xff]  }
 0x6e0   : > { %6126 = vmatprep.subr.bf16.mxu0 %v9350_v35  ;;  %6167 = vmatprep.subr.bf16.mxu1 %v9353_v14  ;;  %v9426_v35 = vld [vmem:[#allocation2 + $0x344] ss:$16 sps:$4 sm:$0xff]   ;;  %v9429_v14 = vld [vmem:[#allocation2 + $0x34c] ss:$16 sps:$4 sm:$0xff]  }
 0x6e3   : > { %6127 = vmatpush1.bf16.msra.mxu0 %v9348_v36  ;;  %6168 = vmatpush1.bf16.msra.mxu1 %v9351_v23  ;;  %v9424_v36 = vld [vmem:[#allocation2 + $0x340] ss:$16 sps:$4 sm:$0xff]   ;;  %v9427_v23 = vld [vmem:[#allocation2 + $0x348] ss:$16 sps:$4 sm:$0xff]  }
 0x6e4   : > { %6128 = vmatprep.subr.bf16.mxu0 %v9356_v37  ;;  %6169 = vmatprep.subr.bf16.mxu1 %v9359_v31  ;;  %v9432_v37 = vld [vmem:[#allocation2 + $0x324] ss:$16 sps:$4 sm:$0xff]   ;;  %v9435_v31 = vld [vmem:[#allocation2 + $0x32c] ss:$16 sps:$4 sm:$0xff]  }
 0x6e7   : > { %6129 = vmatpush1.bf16.msra.mxu0 %v9354_v39  ;;  %6170 = vmatpush1.bf16.msra.mxu1 %v9357_v25  ;;  %v9430_v39 = vld [vmem:[#allocation2 + $0x320] ss:$16 sps:$4 sm:$0xff]   ;;  %v9433_v25 = vld [vmem:[#allocation2 + $0x328] ss:$16 sps:$4 sm:$0xff]  }
 0x6e8   : > { %8474 = vmatprep.subr.msk.bf16.mxu0 %vm5755_vm10, %v8471_v26  ;;  %8476 = vmatprep.subr.msk.bf16.mxu1 %vm5755_vm10, %v8473_v21  ;;  %v8527_v26 = vcombine.high %v6245_v38, %v6245_v38  ;;  %v8526_v21 = vcombine.low %v6245_v38, %v6245_v38  ;;  %v6653_v38 = vld [vmem:[#allocation2 + $0x638] sm:$0xff] }
 0x6eb   : > { %6137 = vmatpush2.bf16.msra.mxu0 %v6103_v40  ;;  %6178 = vmatpush2.bf16.msra.mxu1 %v6109_v62  ;;  %v6506_v40 = vsel %vm5755_vm10, %v8526_v21, 0  ;;  %v9442_v62 = vld [vmem:[#allocation2 + $0x484] ss:$16 sps:$4 sm:$0xff]   ;;  %v8585_v21 = vcombine.high %v6653_v38, %v6653_v38 }
 0x6ec   : > { %6138 = vmatprep.subr.bf16.mxu0 %v9366_v28  ;;  %6179 = vmatprep.subr.bf16.mxu1 %v9369_v42  ;;  %v6512_v28 = vsel %vm5755_vm10, %v8528_v61, 0  ;;  %v9445_v42 = vld [vmem:[#allocation2 + $0x48c] ss:$16 sps:$4 sm:$0xff]  }
 0x6ef   : > { %6139 = vmatpush2.bf16.msra.mxu0 %v9364_v43  ;;  %6180 = vmatpush2.bf16.msra.mxu1 %v9367_v44  ;;  %v9440_v43 = vld [vmem:[#allocation2 + $0x480] ss:$16 sps:$4 sm:$0xff]   ;;  %v9443_v44 = vld [vmem:[#allocation2 + $0x488] ss:$16 sps:$4 sm:$0xff]  }
 0x6f0   : > { %6140 = vmatprep.subr.bf16.mxu0 %v9372_v49  ;;  %6181 = vmatprep.subr.bf16.mxu1 %v9375_v50  ;;  %v9448_v49 = vld [vmem:[#allocation2 + $0x464] ss:$16 sps:$4 sm:$0xff]   ;;  %v9451_v50 = vld [vmem:[#allocation2 + $0x46c] ss:$16 sps:$4 sm:$0xff]  }
 0x6f3   : > { %6141 = vmatpush2.bf16.msra.mxu0 %v9370_v52  ;;  %6182 = vmatpush2.bf16.msra.mxu1 %v9373_v17  ;;  %v9446_v52 = vld [vmem:[#allocation2 + $0x460] ss:$16 sps:$4 sm:$0xff]   ;;  %v9449_v17 = vld [vmem:[#allocation2 + $0x468] ss:$16 sps:$4 sm:$0xff]  }
 0x6f4   : > { %6142 = vmatprep.subr.bf16.mxu0 %v9378_v53  ;;  %6183 = vmatprep.subr.bf16.mxu1 %v9381_v54  ;;  %v9454_v53 = vld [vmem:[#allocation2 + $0x444] ss:$16 sps:$4 sm:$0xff]   ;;  %v9457_v54 = vld [vmem:[#allocation2 + $0x44c] ss:$16 sps:$4 sm:$0xff]  }
 0x6f7   : > { %6143 = vmatpush2.bf16.msra.mxu0 %v9376_v58  ;;  %6184 = vmatpush2.bf16.msra.mxu1 %v9379_v30  ;;  %v9452_v58 = vld [vmem:[#allocation2 + $0x440] ss:$16 sps:$4 sm:$0xff]   ;;  %v9455_v30 = vld [vmem:[#allocation2 + $0x448] ss:$16 sps:$4 sm:$0xff]  }
 0x6f8   : > { %6144 = vmatprep.subr.bf16.mxu0 %v9384_v8  ;;  %6185 = vmatprep.subr.bf16.mxu1 %v9387_v60  ;;  %v9460_v8 = vld [vmem:[#allocation2 + $0x424] ss:$16 sps:$4 sm:$0xff]   ;;  %v9463_v60 = vld [vmem:[#allocation2 + $0x42c] ss:$16 sps:$4 sm:$0xff]  }
 0x6fb   : > { %6145 = vmatpush2.bf16.msra.mxu0 %v9382_v11  ;;  %6186 = vmatpush2.bf16.msra.mxu1 %v9385_v4  ;;  %v9458_v11 = vld [vmem:[#allocation2 + $0x420] ss:$16 sps:$4 sm:$0xff]   ;;  %v9461_v4 = vld [vmem:[#allocation2 + $0x428] ss:$16 sps:$4 sm:$0xff]  }
 0x6fc   : > { %6517 = vmatprep.subr.bf16.mxu0 %v9390_v5  ;;  %6558 = vmatprep.subr.bf16.mxu1 %v9393_v16  ;;  %v9466_v5 = vld [vmem:[#allocation2 + $0x594] ss:$16 sps:$4 sm:$0xff]   ;;  %v9469_v16 = vld [vmem:[#allocation2 + $0x59c] ss:$16 sps:$4 sm:$0xff]  }
 0x6fe   : > { %6147 = vmatmul.mubr.bf16.vlgmr.msra.gmra.mxu0 %v12523_v9  ;;  %6188 = vmatmul.mubr.bf16.vlgmr.msra.gmra.mxu1 %v12523_v9 }
 0x6ff   : > { %6518 = vmatpush1.bf16.msra.mxu0 %v9388_v12  ;;  %8531 = vmatprep.mubr.msk.bf16.mxu0 %vm5751_vm11, %v6250_v48  ;;  %v9464_v12 = vld [vmem:[#allocation2 + $0x590] ss:$16 sps:$4 sm:$0xff]  }
 0x700   : > { %6559 = vmatpush1.bf16.msra.mxu1 %v9391_v6  ;;  %8533 = vmatprep.mubr.msk.bf16.mxu1 %vm5751_vm11, %v6250_v48  ;;  %v6249_v6 = vrot.slane %v12523_v9, 1  ;;  %v9467_v48 = vld [vmem:[#allocation2 + $0x598] ss:$16 sps:$4 sm:$0xff]   ;;  %v9481_v9 = vld [vmem:[#allocation2 + $0x55c] ss:$16 sps:$4 sm:$0xff]  }
 0x701   : > { %6519 = vmatprep.subr.bf16.mxu0 %v9396_v18  ;;  %6560 = vmatprep.subr.bf16.mxu1 %v9399_v27  ;;  %v9472_v18 = vld [vmem:[#allocation2 + $0x574] ss:$16 sps:$4 sm:$0xff]   ;;  %v6655_v27 = vrot.slane %v12528_v24, 1 }
 0x702   : > { %v9484_v24 = vld [vmem:[#allocation2 + $0x534] ss:$16 sps:$4 sm:$0xff]  }
 0x703   : > { %6520 = vmatpush1.bf16.msra.mxu0 %v9394_v57  ;;  %v9475_v57 = vld [vmem:[#allocation2 + $0x57c] ss:$16 sps:$4 sm:$0xff]  }
 0x704   : > { %6561 = vmatpush1.bf16.msra.mxu1 %v9397_v32  ;;  %6521 = vmatprep.subr.bf16.mxu0 %v9402_v55  ;;  %v9470_v32 = vld [vmem:[#allocation2 + $0x570] ss:$16 sps:$4 sm:$0xff]   ;;  %v9473_v55 = vld [vmem:[#allocation2 + $0x578] ss:$16 sps:$4 sm:$0xff]  }
 0x705   : > { %6562 = vmatprep.subr.bf16.mxu1 %v9405_v47  ;;  %v9478_v47 = vld [vmem:[#allocation2 + $0x554] ss:$16 sps:$4 sm:$0xff]  }
 0x707   : > { %6522 = vmatpush1.bf16.msra.mxu0 %v9400_v10  ;;  %v9476_v10 = vld [vmem:[#allocation2 + $0x550] ss:$16 sps:$4 sm:$0xff]  }
 0x708   : > { %6563 = vmatpush1.bf16.msra.mxu1 %v9403_v15  ;;  %6523 = vmatprep.subr.bf16.mxu0 %v9408_v19  ;;  %v9479_v15 = vld [vmem:[#allocation2 + $0x558] ss:$16 sps:$4 sm:$0xff]   ;;  %v9487_v19 = vld [vmem:[#allocation2 + $0x53c] ss:$16 sps:$4 sm:$0xff]  }
 0x709   : > { %6564 = vmatprep.subr.bf16.mxu1 %v9411_v2  ;;  %v9482_v2 = vld [vmem:[#allocation2 + $0x530] ss:$16 sps:$4 sm:$0xff]  }
 0x70b   : > { %6524 = vmatpush1.bf16.msra.mxu0 %v9406_v3  ;;  %v9485_v3 = vld [vmem:[#allocation2 + $0x538] ss:$16 sps:$4 sm:$0xff]  }
 0x70c   : > { %6565 = vmatpush1.bf16.msra.mxu1 %v9409_v33  ;;  %6525 = vmatprep.subr.bf16.mxu0 %v9414_v29  ;;  %v9490_v33 = vld [vmem:[#allocation2 + $0x514] ss:$16 sps:$4 sm:$0xff]   ;;  %v9493_v29 = vld [vmem:[#allocation2 + $0x51c] ss:$16 sps:$4 sm:$0xff]  }
 0x70d   : > { %6566 = vmatprep.subr.bf16.mxu1 %v9417_v41  ;;  %v9488_v41 = vld [vmem:[#allocation2 + $0x510] ss:$16 sps:$4 sm:$0xff]  }
 0x70f   : > { %6526 = vmatpush1.bf16.msra.mxu0 %v9412_v20  ;;  %v9491_v20 = vld [vmem:[#allocation2 + $0x518] ss:$16 sps:$4 sm:$0xff]  }
 0x710   : > { %6567 = vmatpush1.bf16.msra.mxu1 %v9415_v63  ;;  %6527 = vmatprep.subr.bf16.mxu0 %v9420_v59  ;;  %v9496_v63 = vld [vmem:[#allocation2 + $0x4f4] ss:$16 sps:$4 sm:$0xff]   ;;  %v9499_v59 = vld [vmem:[#allocation2 + $0x4fc] ss:$16 sps:$4 sm:$0xff]  }
 0x711   : > { %6568 = vmatprep.subr.bf16.mxu1 %v9423_v0  ;;  %v9494_v0 = vld [vmem:[#allocation2 + $0x4f0] ss:$16 sps:$4 sm:$0xff]  }
 0x713   : > { %6528 = vmatpush1.bf16.msra.mxu0 %v9418_v22  ;;  %v9497_v22 = vld [vmem:[#allocation2 + $0x4f8] ss:$16 sps:$4 sm:$0xff]  }
 0x714   : > { %6569 = vmatpush1.bf16.msra.mxu1 %v9421_v34  ;;  %6529 = vmatprep.subr.bf16.mxu0 %v9426_v35  ;;  %v9502_v34 = vld [vmem:[#allocation2 + $0x4d4] ss:$16 sps:$4 sm:$0xff]   ;;  %v9505_v35 = vld [vmem:[#allocation2 + $0x4dc] ss:$16 sps:$4 sm:$0xff]  }
 0x715   : > { %6570 = vmatprep.subr.bf16.mxu1 %v9429_v14  ;;  %v9500_v14 = vld [vmem:[#allocation2 + $0x4d0] ss:$16 sps:$4 sm:$0xff]  }
 0x717   : > { %6530 = vmatpush1.bf16.msra.mxu0 %v9424_v36  ;;  %v9503_v36 = vld [vmem:[#allocation2 + $0x4d8] ss:$16 sps:$4 sm:$0xff]  }
 0x718   : > { %6571 = vmatpush1.bf16.msra.mxu1 %v9427_v23  ;;  %6531 = vmatprep.subr.bf16.mxu0 %v9432_v37  ;;  %v9508_v23 = vld [vmem:[#allocation2 + $0x4b4] ss:$16 sps:$4 sm:$0xff]   ;;  %v9511_v37 = vld [vmem:[#allocation2 + $0x4bc] ss:$16 sps:$4 sm:$0xff]  }
 0x719   : > { %6572 = vmatprep.subr.bf16.mxu1 %v9435_v31  ;;  %v6652_v31 = vld [vmem:[#allocation2 + $0x630] sm:$0xff] }
 0x71b   : > { %6532 = vmatpush1.bf16.msra.mxu0 %v9430_v39  ;;  %v9509_v39 = vld [vmem:[#allocation2 + $0x4b8] ss:$16 sps:$4 sm:$0xff]  }
 0x71c   : > { %6573 = vmatpush1.bf16.msra.mxu1 %v9433_v25  ;;  %8530 = vmatprep.subr.msk.bf16.mxu0 %vm5755_vm10, %v8527_v26  ;;  %v8583_v25 = vcombine.high %v6652_v31, %v6652_v31  ;;  %v8582_v26 = vcombine.low %v6652_v31, %v6652_v31  ;;  %v9565_v31 = vld [vmem:[%s12716_s11 + $0xc8] sm:$0xff]  }
 0x71d   : > { %8532 = vmatprep.subr.msk.bf16.mxu1 %vm5755_vm10, %v8529_v13  ;;  %v8584_v13 = vcombine.low %v6653_v38, %v6653_v38  ;;  %v9566_v38 = vld [vmem:[%s12716_s11 + $0x8] sm:$0xff]  }
 0x71e   : > { %v6911_v61 = vsel %vm5755_vm10, %v8582_v26, 0  ;;  %v9570_v26 = vld [vmem:[%s12716_s11] sm:$0xff]  }
 0x71f   : > { %6540 = vmatpush2.bf16.msra.mxu0 %v6506_v40  ;;  %v9518_v40 = vld [vmem:[#allocation2 + $0x614] ss:$16 sps:$4 sm:$0xff]  }
 0x720   : > { %6581 = vmatpush2.bf16.msra.mxu1 %v6512_v28  ;;  %6541 = vmatprep.subr.bf16.mxu0 %v9442_v62  ;;  %v6917_v62 = vsel %vm5755_vm10, %v8584_v13, 0  ;;  %v9521_v28 = vld [vmem:[#allocation2 + $0x61c] ss:$16 sps:$4 sm:$0xff]  }
 0x721   : > { %6582 = vmatprep.subr.bf16.mxu1 %v9445_v42  ;;  %v9516_v42 = vld [vmem:[#allocation2 + $0x610] ss:$16 sps:$4 sm:$0xff]  }
 0x723   : > { %6542 = vmatpush2.bf16.msra.mxu0 %v9440_v43  ;;  %v9519_v43 = vld [vmem:[#allocation2 + $0x618] ss:$16 sps:$4 sm:$0xff]  }
 0x724   : > { %6583 = vmatpush2.bf16.msra.mxu1 %v9443_v44  ;;  %6543 = vmatprep.subr.bf16.mxu0 %v9448_v49  ;;  %v9524_v44 = vld [vmem:[#allocation2 + $0x5f4] ss:$16 sps:$4 sm:$0xff]   ;;  %v9527_v49 = vld [vmem:[#allocation2 + $0x5fc] ss:$16 sps:$4 sm:$0xff]  }
 0x725   : > { %6584 = vmatprep.subr.bf16.mxu1 %v9451_v50  ;;  %v9522_v50 = vld [vmem:[#allocation2 + $0x5f0] ss:$16 sps:$4 sm:$0xff]  }
 0x727   : > { %6544 = vmatpush2.bf16.msra.mxu0 %v9446_v52  ;;  %v9525_v52 = vld [vmem:[#allocation2 + $0x5f8] ss:$16 sps:$4 sm:$0xff]  }
 0x728   : > { %6585 = vmatpush2.bf16.msra.mxu1 %v9449_v17  ;;  %6545 = vmatprep.subr.bf16.mxu0 %v9454_v53  ;;  %v9530_v17 = vld [vmem:[#allocation2 + $0x5d4] ss:$16 sps:$4 sm:$0xff]   ;;  %v9533_v53 = vld [vmem:[#allocation2 + $0x5dc] ss:$16 sps:$4 sm:$0xff]  }
 0x729   : > { %6586 = vmatprep.subr.bf16.mxu1 %v9457_v54  ;;  %v9528_v54 = vld [vmem:[#allocation2 + $0x5d0] ss:$16 sps:$4 sm:$0xff]  }
 0x72b   : > { %6546 = vmatpush2.bf16.msra.mxu0 %v9452_v58  ;;  %v9531_v58 = vld [vmem:[#allocation2 + $0x5d8] ss:$16 sps:$4 sm:$0xff]  }
 0x72c   : > { %6587 = vmatpush2.bf16.msra.mxu1 %v9455_v30  ;;  %6547 = vmatprep.subr.bf16.mxu0 %v9460_v8  ;;  %v9536_v30 = vld [vmem:[#allocation2 + $0x5b4] ss:$16 sps:$4 sm:$0xff]   ;;  %v9539_v8 = vld [vmem:[#allocation2 + $0x5bc] ss:$16 sps:$4 sm:$0xff]  }
 0x72d   : > { %6588 = vmatprep.subr.bf16.mxu1 %v9463_v60  ;;  %v9534_v60 = vld [vmem:[#allocation2 + $0x5b0] ss:$16 sps:$4 sm:$0xff]  }
 0x72f   : > { %6548 = vmatpush2.bf16.msra.mxu0 %v9458_v11  ;;  %v9537_v11 = vld [vmem:[#allocation2 + $0x5b8] ss:$16 sps:$4 sm:$0xff]  }
 0x730   : > { %6589 = vmatpush2.bf16.msra.mxu1 %v9461_v4  ;;  %6922 = vmatprep.subr.bf16.mxu0 %v9466_v5  ;;  %v6654_v4 = vrot.slane %v12531_v7, 1  ;;  %v9540_v5 = vld [vmem:[%s12716_s11 + $0x78] sm:$0xff]   ;;  %v9544_v7 = vld [vmem:[%s12716_s11 + $0x70] sm:$0xff]  }
 0x731   : > { %6963 = vmatprep.subr.bf16.mxu1 %v9469_v16  ;;  %v9541_v16 = vld [vmem:[%s12716_s11 + $0xf8] ss:$0 sps:$4 sm:$0x33]  }
 0x732   : > { %6550 = vmatmul.mubr.bf16.vlgmr.msra.gmra.mxu0 %v6249_v6 }
 0x733   : > { %6591 = vmatmul.mubr.bf16.vlgmr.msra.gmra.mxu1 %v6249_v6  ;;  %6923 = vmatpush1.bf16.msra.mxu0 %v9464_v12  ;;  %v9542_v12 = vld [vmem:[%s12716_s11 + $0x38] sm:$0xff]  }
 0x734   : > { %8587 = vmatprep.mubr.msk.bf16.mxu0 %vm5751_vm11, %v6655_v27  ;;  %6964 = vmatpush1.bf16.msra.mxu1 %v9467_v48  ;;  %v9543_v6 = vld [vmem:[%s12716_s11 + $0xb8] sm:$0xff]   ;;  %v9545_v48 = vld [vmem:[%s12716_s11 + $0xf0] sm:$0xff]  }
 0x735   : > { %8589 = vmatprep.mubr.msk.bf16.mxu1 %vm5751_vm11, %v6655_v27  ;;  %6924 = vmatprep.subr.bf16.mxu0 %v9472_v18  ;;  %v9546_v18 = vld [vmem:[%s12716_s11 + $0x30] sm:$0xff]  }
 0x736   : > { %6965 = vmatprep.subr.bf16.mxu1 %v9475_v57  ;;  %v9547_v27 = vld [vmem:[%s12716_s11 + $0xb0] sm:$0xff]   ;;  %v9548_v57 = vld [vmem:[%s12716_s11 + $0x68] sm:$0xff]  }
 0x737   : > { %6925 = vmatpush1.bf16.msra.mxu0 %v9470_v32  ;;  %v9549_v32 = vld [vmem:[%s12716_s11 + $0xe8] sm:$0xff]  }
 0x738   : > { %6966 = vmatpush1.bf16.msra.mxu1 %v9473_v55  ;;  %6926 = vmatprep.subr.bf16.mxu0 %v9478_v47  ;;  %v9550_v55 = vld [vmem:[%s12716_s11 + $0x28] sm:$0xff]  }
 0x739   : > { %6967 = vmatprep.subr.bf16.mxu1 %v9481_v9  ;;  %v9551_v47 = vld [vmem:[%s12716_s11 + $0xa8] sm:$0xff]   ;;  %v9552_v9 = vld [vmem:[%s12716_s11 + $0x60] sm:$0xff]  }
 0x73b   : > { %6927 = vmatpush1.bf16.msra.mxu0 %v9476_v10  ;;  %v9553_v10 = vld [vmem:[%s12716_s11 + $0xe0] sm:$0xff]  }
 0x73c   : > { %6968 = vmatpush1.bf16.msra.mxu1 %v9479_v15  ;;  %6928 = vmatprep.subr.bf16.mxu0 %v9484_v24  ;;  %v9554_v15 = vld [vmem:[%s12716_s11 + $0x20] sm:$0xff]  }
 0x73d   : > { %6969 = vmatprep.subr.bf16.mxu1 %v9487_v19  ;;  %v9555_v24 = vld [vmem:[%s12716_s11 + $0xa0] sm:$0xff]   ;;  %v9556_v19 = vld [vmem:[%s12716_s11 + $0x58] sm:$0xff]  }
 0x73f   : > { %6929 = vmatpush1.bf16.msra.mxu0 %v9482_v2  ;;  %v9557_v2 = vld [vmem:[%s12716_s11 + $0xd8] sm:$0xff]  }
 0x740   : > { %6970 = vmatpush1.bf16.msra.mxu1 %v9485_v3  ;;  %6930 = vmatprep.subr.bf16.mxu0 %v9490_v33  ;;  %v9558_v3 = vld [vmem:[%s12716_s11 + $0x18] sm:$0xff]  }
 0x741   : > { %6971 = vmatprep.subr.bf16.mxu1 %v9493_v29  ;;  %v9559_v33 = vld [vmem:[%s12716_s11 + $0x98] sm:$0xff]  }
 0x743   : > { %6931 = vmatpush1.bf16.msra.mxu0 %v9488_v41 }
 0x744   : > { %6972 = vmatpush1.bf16.msra.mxu1 %v9491_v20  ;;  %6932 = vmatprep.subr.bf16.mxu0 %v9496_v63 }
 0x745   : > { %6973 = vmatprep.subr.bf16.mxu1 %v9499_v59 }
 0x747   : > { %6933 = vmatpush1.bf16.msra.mxu0 %v9494_v0 }
 0x748   : > { %6974 = vmatpush1.bf16.msra.mxu1 %v9497_v22  ;;  %6934 = vmatprep.subr.bf16.mxu0 %v9502_v34 }
 0x749   : > { %6975 = vmatprep.subr.bf16.mxu1 %v9505_v35  ;;  %v9560_v35 = vld [vmem:[%s12716_s11 + $0x50] sm:$0xff]  }
 0x74b   : > { %6935 = vmatpush1.bf16.msra.mxu0 %v9500_v14  ;;  %v9561_v14 = vld [vmem:[%s12716_s11 + $0xd0] sm:$0xff]  }
 0x74c   : > { %6976 = vmatpush1.bf16.msra.mxu1 %v9503_v36  ;;  %6936 = vmatprep.subr.bf16.mxu0 %v9508_v23  ;;  %v9562_v36 = vld [vmem:[%s12716_s11 + $0x10] sm:$0xff]  }
 0x74d   : > { %6977 = vmatprep.subr.bf16.mxu1 %v9511_v37  ;;  %v9563_v23 = vld [vmem:[%s12716_s11 + $0x90] sm:$0xff]   ;;  %v9564_v37 = vld [vmem:[%s12716_s11 + $0x48] sm:$0xff]  }
 0x74f   : > { %6937 = vmatpush1.bf16.msra.mxu0 %v9506_v1  ;;  %v9567_v1 = vld [vmem:[%s12716_s11 + $0x88] sm:$0xff]  }
 0x750   : > { %6978 = vmatpush1.bf16.msra.mxu1 %v9509_v39  ;;  %8586 = vmatprep.subr.msk.bf16.mxu0 %vm5755_vm10, %v8583_v25  ;;  %v9568_v39 = vld [vmem:[%s12716_s11 + $0x40] sm:$0xff]  }
 0x751   : > { %8588 = vmatprep.subr.msk.bf16.mxu1 %vm5755_vm10, %v8585_v21  ;;  %v9569_v25 = vld [vmem:[%s12716_s11 + $0xc0] sm:$0xff]  }
 0x752   : > { %v9571_v21 = vld [vmem:[%s12716_s11 + $0x80] sm:$0xff]  }
 0x753   : > { %6945 = vmatpush2.bf16.msra.mxu0 %v6911_v61 }
 0x754   : > { %6986 = vmatpush2.bf16.msra.mxu1 %v6917_v62  ;;  %6946 = vmatprep.subr.bf16.mxu0 %v9518_v40 }
 0x755   : > { %6987 = vmatprep.subr.bf16.mxu1 %v9521_v28 }
 0x757   : > { %6947 = vmatpush2.bf16.msra.mxu0 %v9516_v42 }
 0x758   : > { %6988 = vmatpush2.bf16.msra.mxu1 %v9519_v43  ;;  %6948 = vmatprep.subr.bf16.mxu0 %v9524_v44 }
 0x759   : > { %6989 = vmatprep.subr.bf16.mxu1 %v9527_v49 }
 0x75b   : > { %6949 = vmatpush2.bf16.msra.mxu0 %v9522_v50 }
 0x75c   : > { %6990 = vmatpush2.bf16.msra.mxu1 %v9525_v52  ;;  %6950 = vmatprep.subr.bf16.mxu0 %v9530_v17 }
 0x75d   : > { %6991 = vmatprep.subr.bf16.mxu1 %v9533_v53 }
 0x75f   : > { %6951 = vmatpush2.bf16.msra.mxu0 %v9528_v54 }
 0x760   : > { %6992 = vmatpush2.bf16.msra.mxu1 %v9531_v58  ;;  %6952 = vmatprep.subr.bf16.mxu0 %v9536_v30 }
 0x761   : > { %6993 = vmatprep.subr.bf16.mxu1 %v9539_v8 }
 0x763   : > { %6953 = vmatpush2.bf16.msra.mxu0 %v9534_v60 }
 0x764   : > { %6994 = vmatpush2.bf16.msra.mxu1 %v9537_v11  ;;  %8627 = vmatprep.subr.bf16.mxu0 %v9540_v5  ;;  %v7008_v5 = vld [vmem:[%s12715_s10] sm:$0xf] }
 0x765   : > { %8671 = vmatprep.subr.msk.bf16.mxu1 %vm7299_vm12, %v9541_v16 }
 0x766   : > { %6955 = vmatmul.mubr.bf16.vlgmr.msra.gmra.mxu0 %v6654_v4 }
 0x767   : > { %6996 = vmatmul.mubr.bf16.vlgmr.msra.gmra.mxu1 %v6654_v4  ;;  %8628 = vmatpush3.bf16.msra.mxu0 %v9542_v12  ;;  %v7013_v12 = vrot.slane %v7008_v5, %v12742_v51 }
 0x768   : > { %8650 = vmatpush3.bf16.msra.mxu1 %v9543_v6  ;;  %8629 = vmatprep.subr.bf16.mxu0 %v9544_v7 }
 0x769   : > { %8651 = vmatprep.subr.bf16.mxu1 %v9545_v48  ;;  %v7021_v48 = vrot.slane %v7008_v5, %v12743_v56 }
 0x76b   : > { %8630 = vmatpush3.bf16.msra.mxu0 %v9546_v18 }
 0x76c   : > { %8652 = vmatpush3.bf16.msra.mxu1 %v9547_v27  ;;  %8631 = vmatprep.subr.bf16.mxu0 %v9548_v57 }
 0x76d   : > { %8653 = vmatprep.subr.bf16.mxu1 %v9549_v32  ;;  %v7017_v32 = vrot.slane %v7008_v5, %v10101_v45 }
 0x76f   : > { %8632 = vmatpush3.bf16.msra.mxu0 %v9550_v55 }
 0x770   : > { %8654 = vmatpush3.bf16.msra.mxu1 %v9551_v47  ;;  %8633 = vmatprep.subr.bf16.mxu0 %v9552_v9 }
 0x771   : > { %8655 = vmatprep.subr.bf16.mxu1 %v9553_v10  ;;  %v7025_v10 = vrot.slane %v7008_v5, %v10103_v46 }
 0x773   : > { %8634 = vmatpush3.bf16.msra.mxu0 %v9554_v15 }
 0x774   : > { %8656 = vmatpush3.bf16.msra.mxu1 %v9555_v24  ;;  %8635 = vmatprep.subr.bf16.mxu0 %v9556_v19 }
 0x775   : > { %8657 = vmatprep.subr.bf16.mxu1 %v9557_v2 }
 0x777   : > { %8636 = vmatpush3.bf16.msra.mxu0 %v9558_v3 }
 0x778   : > { %8658 = vmatpush3.bf16.msra.mxu1 %v9559_v33  ;;  %8637 = vmatprep.subr.bf16.mxu0 %v9560_v35 }
 0x779   : > { %8659 = vmatprep.subr.bf16.mxu1 %v9561_v14 }
 0x77b   : > { %8638 = vmatpush3.bf16.msra.mxu0 %v9562_v36 }
 0x77c   : > { %8660 = vmatpush3.bf16.msra.mxu1 %v9563_v23  ;;  %8639 = vmatprep.subr.bf16.mxu0 %v9564_v37  ;;  %v7105_v23 = vld [vmem:[%s12717_s12] sm:$0x1] }
 0x77d   : > { %8661 = vmatprep.subr.bf16.mxu1 %v9565_v31 }
 0x77f   : > { %8640 = vmatpush3.bf16.msra.mxu0 %v9566_v38 }
 0x780   : > { %8662 = vmatpush3.bf16.msra.mxu1 %v9567_v1  ;;  %8641 = vmatprep.subr.bf16.mxu0 %v9568_v39 }
 0x781   : > { %8663 = vmatprep.subr.bf16.mxu1 %v9569_v25 }
 0x783   : > { %8642 = vmatpush3.bf16.msra.mxu0 %v9570_v26 }
 0x784   : > { %8664 = vmatpush3.bf16.msra.mxu1 %v9571_v21 }
 0x78a   : > { %v5802_v29 = vpop.f32.mrf.mxu0  ;;  %v5843_v41 = vpop.f32.mrf.mxu1 }
 0x78c   : > { %v5804_v20 = vpop.f32.mrf.mxu0  ;;  %v5845_v63 = vpop.f32.mrf.mxu1 }
 0x78e   : > { %v5806_v59 = vpop.f32.mrf.mxu0  ;;  %v5847_v0 = vpop.f32.mrf.mxu1 }
 0x790   : > { %v5807_v22 = vpop.f32.mrf.mxu0  ;;  %v5848_v34 = vpop.f32.mrf.mxu1 }
 0x7be   : > { %v6148_v13 = vpop.f32.mrf.mxu0  ;;  %v6189_v61 = vpop.f32.mrf.mxu1 }
 0x7bf   : > { %v6149_v40 = vadd.f32 %v6148_v13, %v5802_v29  ;;  %v6190_v62 = vadd.f32 %v6189_v61, %v5843_v41 }
 0x7c0   : > { %v6150_v28 = vpop.f32.mrf.mxu0  ;;  %v6191_v42 = vpop.f32.mrf.mxu1 }
 0x7c1   : > { %v6151_v43 = vadd.f32 %v6150_v28, %v5804_v20  ;;  %v6192_v44 = vadd.f32 %v6191_v42, %v5845_v63 }
 0x7c2   : > { %v6152_v49 = vpop.f32.mrf.mxu0  ;;  %v6193_v50 = vpop.f32.mrf.mxu1 }
 0x7c4   : > { %v6153_v52 = vpop.f32.mrf.mxu0  ;;  %v6194_v17 = vpop.f32.mrf.mxu1 }
 0x7f2   : > { %v6551_v53 = vpop.f32.mrf.mxu0 }
 0x7f3   : > { %v6592_v54 = vpop.f32.mrf.mxu1  ;;  %v6599_v16 = vadd.f32 %v6551_v53, %v6149_v40 }
 0x7f4   : > { %v6553_v58 = vpop.f32.mrf.mxu0  ;;  %v6601_v6 = vadd.f32 %v6592_v54, %v6190_v62 }
 0x7f5   : > { %v6594_v30 = vpop.f32.mrf.mxu1  ;;  %v6600_v18 = vadd.f32 %v6553_v58, %v6151_v43 }
 0x7f6   : > { %v6555_v8 = vpop.f32.mrf.mxu0  ;;  %v6602_v55 = vadd.f32 %v6594_v30, %v6192_v44 }
 0x7f7   : > { %v6596_v60 = vpop.f32.mrf.mxu1 }
 0x7f8   : > { %v6556_v11 = vpop.f32.mrf.mxu0 }
 0x7f9   : > { %v6597_v4 = vpop.f32.mrf.mxu1 }
 0x826   : > { %v6956_v7 = vpop.f32.mrf.mxu0 }
 0x827   : > { %v7004_v27 = vadd.f32 %v6956_v7, %v6599_v16  ;;  %v6997_v57 = vpop.f32.mrf.mxu1 }
 0x828   : > { %v7006_v47 = vadd.f32 %v6997_v57, %v6601_v6  ;;  %v6958_v9 = vpop.f32.mrf.mxu0 }
 0x829   : > { %v7030_v15 = vadd.f32 %v7013_v12, %v7004_v27  ;;  %v7005_v24 = vadd.f32 %v6958_v9, %v6600_v18  ;;  %v6999_v19 = vpop.f32.mrf.mxu1 }
 0x82a   : > { %v7032_v2 = vadd.f32 %v7021_v48, %v7006_v47  ;;  %v7007_v3 = vadd.f32 %v6999_v19, %v6602_v55  ;;  %v6960_v51 = vpop.f32.mrf.mxu0 }
 0x82b   : > { %v7031_v33 = vadd.f32 %v7017_v32, %v7005_v24  ;;  %v7001_v29 = vpop.f32.mrf.mxu1  ;;  %v7034_v41 = vmax.f32 %v7030_v15, 0.0 }
 0x82c   : > { %v7033_v56 = vadd.f32 %v7025_v10, %v7007_v3  ;;  %v6961_v20 = vpop.f32.mrf.mxu0  ;;  %v7036_v63 = vmax.f32 %v7032_v2, 0.0 }
 0x82d   : > { %v7035_v59 = vmax.f32 %v7031_v33, 0.0  ;;  %v7002_v45 = vpop.f32.mrf.mxu1  ;;  %v7038_v46 = vpack.c.bf16 %v7034_v41, %v7034_v41 }
 0x82e   : > { %v7037_v0 = vmax.f32 %v7033_v56, 0.0  ;;  %v7040_v35 = vpack.c.bf16 %v7036_v63, %v7036_v63 }
 0x82f   : > { %v7039_v22 = vpack.c.bf16 %v7035_v59, %v7035_v59 }
 0x830   : > { %v7041_v34 = vpack.c.bf16 %v7037_v0, %v7037_v0 }
 0x831   : > { %7335 = vmatprep.mubr.bf16.mxu0 %v7039_v22 }
 0x832   : > { %8622 = vmatprep.mubr.msk.bf16.mxu1 %vm7295_vm13, %v7041_v34  ;;  %7336 = vmatmul.mubr.bf16.vlgmr.msra.gmra.mxu0 %v7038_v46 }
 0x833   : > { %7376 = vmatmul.mubr.bf16.vlgmr.msra.gmra.mxu1 %v7040_v35 }
 0x8f2   : > { %v8643_v14 = vpop.f32.mrf.mxu0 }
 0x8f3   : > { %v8665_v36 = vpop.f32.mrf.mxu1 }
 0x8f4   : > { %v8644_v37 = vpop.f32.mrf.mxu0 }
 0x8f5   : > { %v8645_v31 = vadd.f32 %v8644_v37, %v8643_v14  ;;  %v8666_v38 = vpop.f32.mrf.mxu1 }
 0x8f6   : > { %v8646_v1 = vpop.f32.mrf.mxu0  ;;  %v8667_v25 = vadd.f32 %v8666_v38, %v8665_v36 }
 0x8f7   : > { %v7338_v39 = vadd.f32 %v8645_v31, %v7105_v23  ;;  %v8668_v26 = vpop.f32.mrf.mxu1 }
 0x8f8   : > { %v8647_v21 = vpop.f32.mrf.mxu0 }
 0x8f9   : > { %v7378_v13 = vadd.f32 %v8667_v25, %v7338_v39  ;;  %v8669_v61 = vpop.f32.mrf.mxu1 }
 0x8fb   : > { %7384 = vst.msk [vmem:[%s447_s27] sm:$0x1] %vm7383_vm14, %v7378_v13 }
 0x8fc   : > { %9611 = shalt.err (!%p9608_p0)
}
 0x8fd   : > { %s9612_s9 = scalar_lea.hbm %s7396_s21, 16  ;;  %s9616_s27 = scalar_lea.hbm %s12718_s13, 32 }
 0x8fe   : > { %p9613_p1 = scmp.ne.s32.totalorder %s7396_s21, %s9612_s9  ;;  %p9617_p4 = scmp.lt.s32.totalorder %s7396_s21, %s12718_s13 }
 0x8ff   : > { %p9618_p7 = scmp.lt.s32.totalorder %s9616_s27, %s9612_s9 }
 0x900   : > { %p9614_p2 = pnand %p9613_p1, %p9778_p5 }
 0x901   : > { %p9619_p8 = por %p9618_p7, %p9617_p4 }
 0x902   : > { %p9615_p3 = pneg %p9614_p2 }
 0x904   : > { %p9620_p6 = pnand %p9619_p8, %p9615_p3 }
 0x906   : > { %9623 = shalt.err (!%p9620_p6)
}
 0x907   : > { %8676 = dma.vmem_to_hbm [thread:$0]  (%p9778_p5), %s7399_s22, 16, %s7396_s21, %s7386_s23  }
 0x908 PF: > { %p8688_p9 = scmp.ge.s32.totalorder %s9662_s28, 2  ;;  %s7410_s14 = sand.u32 1, %s9650_s25  }
 0x909   : > { %p12744_p10 = scmp.ne.s32.totalorder %s12734_s19, 0  ;;  %s7411_s29 = scalar_lea.sflag [#allocation4], %s7410_s14 }
 0x90b   : > { %p8683_p11 = pnand %p8688_p9, %p12744_p10 }
 0x90d   : > { %p8684_p12 = pneg %p8683_p11 }
 0x90f   : > { %9645 = dma.done.wait (%p8684_p12), %s7411_s29, 16  }
 0x910   : > { %9647 = vsyncadd (%p8684_p12), %s7411_s29, 4294967280  ;;  %s12745_s28 = sld [smem:[#allocation9_spill]]  ;;  %s12748_s25 = smov %s9654_s26 }
 0x911   : > { %s12746_s20 = sld [smem:[#allocation8_spill]] }
 0x912   : > { %s12747_s27 = sld [smem:[#allocation10_spill]] }
 0x916   : > { %p24_p13 = scmp.ge.s32.totalorder %s12745_s28, 4  }
 0x917   : > { %s12749_s26 = smov %s12746_s20 }
 0x918   :  { %26 = sbr.rel (!%p24_p13) target bundleno = 6 (0x6), region = 127 }
 0x91d   :  { %7415 = vsyncpa [#allocation3], 1 }
 0x91e   :  { %7417 = vsyncpa [#allocation3 + $0x1], 1 }
 0x91f   :  { %7418 = vsyncpa [#allocation4], 1 }
 0x920   :  { %7420 = vsyncpa [#allocation4 + $0x1], 1 }

</bundles_post_ra>
